<compile_context>
chip_gen: v6e
topology: v6e:2x2x1
jax: 0.10.0
libtpu: 0.0.40
codegen_flags: <defaults>
</compile_context>

<pallas_src>
import jax
import jax.numpy as jnp
from jax.experimental import pallas as pl
from jax.experimental.pallas import tpu as pltpu


# --------------------------------------------------------------------------
# Kernel 1: fused conv (im2col matmul) + bias + ReLU + 2x2 max-pool
#
#   p{q}_ref : (tile, 108)  corner-q patches for 4 consecutive pooled
#                            positions packed along K (4 * 9 * Cin)
#   w_ref    : (108, 128)   block-diagonal kron(I4, Wconv)   (Cout = 32)
#   b_ref    : (1, 128)     conv bias tiled 4x
#   o_ref    : (tile, 128)  4 pooled positions x 32 channels per row
# --------------------------------------------------------------------------
def _conv_relu_pool_kernel(p0_ref, p1_ref, p2_ref, p3_ref, w_ref, b_ref, o_ref):
    w = w_ref[...]
    a0 = jnp.dot(p0_ref[...], w, preferred_element_type=jnp.float32)
    a1 = jnp.dot(p1_ref[...], w, preferred_element_type=jnp.float32)
    a2 = jnp.dot(p2_ref[...], w, preferred_element_type=jnp.float32)
    a3 = jnp.dot(p3_ref[...], w, preferred_element_type=jnp.float32)
    m = jnp.maximum(jnp.maximum(a0, a1), jnp.maximum(a2, a3))   # max-pool
    o_ref[...] = jnp.maximum(m + b_ref[...], 0.0).astype(o_ref.dtype)


def conv_relu_pool(x_nhwc, w_big, b_big, *, tile_rows=128):
    """x_nhwc: (B,H,W,Cin) -> pooled features, shape (B*Ho*Wo//4, 4*Cout).

    Flat element order of the result is the NHWC flatten (b, ho, wo, c)."""
    B, H, W, Cin = x_nhwc.shape
    Ho, Wo = H // 2, W // 2
    KP, N = w_big.shape                      # (4*9*Cin, 4*Cout) = (108, 128)

    # im2col glue (XLA): zero-pad once, then build one patch matrix per
    # pooling-window corner with strided slices.  Column order (dy, dx, c).
    xp = jnp.pad(x_nhwc, ((0, 0), (1, 1), (1, 1), (0, 0)))

    def corner(py, px):
        cols = [xp[:, py + dy: py + dy + H: 2, px + dx: px + dx + W: 2, :]
                for dy in range(3) for dx in range(3)]        # each (B,Ho,Wo,Cin)
        pq = jnp.concatenate(cols, axis=-1)                   # (B,Ho,Wo,9*Cin)
        # pack 4 consecutive pooled positions along K -> (M, 4*9*Cin)
        return pq.reshape(B * Ho * Wo // 4, KP)

    p00, p01, p10, p11 = corner(0, 0), corner(0, 1), corner(1, 0), corner(1, 1)

    M = B * Ho * Wo // 4
    tile_rows = min(tile_rows, M)
    assert M % tile_rows == 0

    pspec = pl.BlockSpec((tile_rows, KP), lambda i: (i, 0))
    out = pl.pallas_call(
        _conv_relu_pool_kernel,
        out_shape=jax.ShapeDtypeStruct((M, N), jnp.float32),
        grid_spec=pltpu.PrefetchScalarGridSpec(
            num_scalar_prefetch=0,
            grid=(M // tile_rows,),
            in_specs=[pspec, pspec, pspec, pspec,
                      pl.BlockSpec((KP, N), lambda i: (0, 0)),
                      pl.BlockSpec((1, N), lambda i: (0, 0))],
            out_specs=pl.BlockSpec((tile_rows, N), lambda i: (i, 0)),
        ),
        compiler_params=pltpu.CompilerParams(
            dimension_semantics=("parallel",)),
    )(p00, p01, p10, p11, w_big, b_big)
    return out


# --------------------------------------------------------------------------
# Kernel 2: fused fc1 -> ReLU -> fc2 (K-tiled matmul with VMEM accumulator)
# --------------------------------------------------------------------------
def _mlp_kernel(x_ref, w1_ref, b1_ref, w2_ref, b2_ref, o_ref, acc_ref):
    k = pl.program_id(0)

    @pl.when(k == 0)
    def _():
        acc_ref[...] = jnp.zeros_like(acc_ref)

    acc_ref[...] += jnp.dot(x_ref[...], w1_ref[...],
                            preferred_element_type=jnp.float32)

    @pl.when(k == pl.num_programs(0) - 1)
    def _():
        h = jnp.maximum(acc_ref[...] + b1_ref[...], 0.0)
        o_ref[...] = (jnp.dot(h, w2_ref[...],
                              preferred_element_type=jnp.float32)
                      + b2_ref[...]).astype(o_ref.dtype)


def mlp_head(x, w1, b1, w2, b2, *, tile_k=8192):
    """x: (B,K); w1: (K,H1); b1: (1,H1); w2: (H1,Hout); b2: (1,Hout)."""
    B, K = x.shape
    H1 = w1.shape[1]
    Hout = w2.shape[1]
    tile_k = min(tile_k, K)
    assert K % tile_k == 0
    return pl.pallas_call(
        _mlp_kernel,
        out_shape=jax.ShapeDtypeStruct((B, Hout), jnp.float32),
        grid_spec=pltpu.PrefetchScalarGridSpec(
            num_scalar_prefetch=0,
            grid=(K // tile_k,),
            in_specs=[
                pl.BlockSpec((B, tile_k), lambda k: (0, k)),
                pl.BlockSpec((tile_k, H1), lambda k: (k, 0)),
                pl.BlockSpec((1, H1), lambda k: (0, 0)),
                pl.BlockSpec((H1, Hout), lambda k: (0, 0)),
                pl.BlockSpec((1, Hout), lambda k: (0, 0)),
            ],
            out_specs=pl.BlockSpec((B, Hout), lambda k: (0, 0)),
            scratch_shapes=[pltpu.VMEM((B, H1), jnp.float32)],
        ),
        compiler_params=pltpu.CompilerParams(
            dimension_semantics=("arbitrary",)),
    )(x, w1, b1, w2, b2)


# --------------------------------------------------------------------------
# Params: torch layout -> kernel layout (done ONCE, outside the forward pass)
# --------------------------------------------------------------------------
def init_params(key):
    ks = jax.random.split(key, 6)
    return {
        "conv_w": jax.random.normal(ks[0], (32, 3, 3, 3), jnp.float32) * 0.1,
        "conv_b": jax.random.normal(ks[1], (32,), jnp.float32) * 0.1,
        "fc1_w": jax.random.normal(ks[2], (64, 32 * 32 * 32), jnp.float32) * 0.01,
        "fc1_b": jax.random.normal(ks[3], (64,), jnp.float32) * 0.1,
        "fc2_w": jax.random.normal(ks[4], (10, 64), jnp.float32) * 0.1,
        "fc2_b": jax.random.normal(ks[5], (10,), jnp.float32) * 0.1,
    }


def prepare_params(p):
    Cout, Cin = p["conv_w"].shape[0], p["conv_w"].shape[1]
    C, Ho, Wo = 32, 32, 32
    H1 = p["fc1_w"].shape[0]
    # conv weight (Cout,Cin,kh,kw) -> (kh,kw,Cin,Cout) -> (9*Cin, Cout),
    # then block-diagonal 4x so 4 pooled positions share one 128-lane output.
    w_mat = jnp.transpose(p["conv_w"], (2, 3, 1, 0)).reshape(9 * Cin, Cout)
    w_big = jnp.kron(jnp.eye(4, dtype=w_mat.dtype), w_mat)        # (108, 128)
    b_big = jnp.tile(p["conv_b"], 4).reshape(1, 4 * Cout)         # (1, 128)
    # fc1 weight: torch columns are NCHW flatten (c,h,w); permute rows to the
    # NHWC flatten (h,w,c) produced by the fused conv/pool kernel.
    fc1_w_t = jnp.transpose(p["fc1_w"].reshape(H1, C, Ho, Wo),
                            (2, 3, 1, 0)).reshape(Ho * Wo * C, H1)
    return {
        "w_big": w_big, "b_big": b_big,
        "fc1_w_t": fc1_w_t, "fc1_b": p["fc1_b"].reshape(1, H1),
        "fc2_w_t": p["fc2_w"].T, "fc2_b": p["fc2_b"].reshape(1, -1),
    }


# --------------------------------------------------------------------------
# Full forward pass (mirrors Custom_model.forward)
# --------------------------------------------------------------------------
def custom_model_forward(x_nchw, kp):
    B = x_nchw.shape[0]
    x = jnp.transpose(x_nchw, (0, 2, 3, 1))                  # NCHW -> NHWC
    pooled = conv_relu_pool(x, kp["w_big"], kp["b_big"])     # (B*Ho*Wo/4, 128)
    feats = pooled.reshape(B, -1)                            # (B, 32*32*32)
    return mlp_head(feats, kp["fc1_w_t"], kp["fc1_b"],
                    kp["fc2_w_t"], kp["fc2_b"])              # (B, 10)


# --------------------------------------------------------------------------
# Pure-JAX reference (torch semantics) for a correctness check
# --------------------------------------------------------------------------
def reference_forward(x_nchw, p):
    y = jax.lax.conv_general_dilated(
        x_nchw, p["conv_w"], window_strides=(1, 1),
        padding=((1, 1), (1, 1)),
        dimension_numbers=("NCHW", "OIHW", "NCHW"))
    y = jnp.maximum(y + p["conv_b"][None, :, None, None], 0.0)
    y = jax.lax.reduce_window(y, -jnp.inf, jax.lax.max,
                              window_dimensions=(1, 1, 2, 2),
                              window_strides=(1, 1, 2, 2), padding="VALID")
    f = y.reshape(y.shape[0], -1)                            # NCHW flatten
    h = jnp.maximum(f @ p["fc1_w"].T + p["fc1_b"], 0.0)
    return h @ p["fc2_w"].T + p["fc2_b"]


if __name__ == "__main__":
    key = jax.random.PRNGKey(0)
    k_x, k_p = jax.random.split(key)
    # batch=2; spatial must be 64x64 so the 32*32*32 flatten matches fc1
    x = jax.random.normal(k_x, (2, 3, 64, 64), jnp.float32)
    params = init_params(k_p)
    kparams = prepare_params(params)        # one-time weight re-layout

    logits = jax.jit(custom_model_forward)(x, kparams)
    jax.block_until_ready(logits)

    assert logits.shape == (2, 10) and logits.dtype == jnp.float32
    ref = reference_forward(x, params)
    assert jnp.allclose(logits, ref, atol=2e-3, rtol=2e-3), float(
        jnp.max(jnp.abs(logits - ref)))
    print("KERNEL_OK")
</pallas_src>

<mosaic_0001>
module attributes {stable_mosaic.version = 11 : i64} {
  func.func @_conv_relu_pool_kernel(%arg0: i32, %arg1: memref<128x108xf32, #tpu.memory_space<vmem>>, %arg2: memref<128x108xf32, #tpu.memory_space<vmem>>, %arg3: memref<128x108xf32, #tpu.memory_space<vmem>>, %arg4: memref<128x108xf32, #tpu.memory_space<vmem>>, %arg5: memref<108x128xf32, #tpu.memory_space<vmem>>, %arg6: memref<1x128xf32, #tpu.memory_space<vmem>>, %arg7: memref<128x128xf32, #tpu.memory_space<vmem>>) attributes {dimension_semantics = [#tpu.dimension_semantics<parallel>], iteration_bounds = array<i64: 4>, scalar_prefetch = 0 : i64, scratch_operands = 0 : i64, tpu.core_type = #tpu.core_type<tc>, window_params = [{transform_indices = @transform_0, window_bounds = array<i64: 128, 108>}, {transform_indices = @transform_1, window_bounds = array<i64: 128, 108>}, {transform_indices = @transform_2, window_bounds = array<i64: 128, 108>}, {transform_indices = @transform_3, window_bounds = array<i64: 128, 108>}, {pipeline_mode = #tpu.pipeline_mode<synchronous>, transform_indices = @transform_4, window_bounds = array<i64: 108, 128>}, {pipeline_mode = #tpu.pipeline_mode<synchronous>, transform_indices = @transform_5, window_bounds = array<i64: 1, 128>}, {transform_indices = @transform_6, window_bounds = array<i64: 128, 128>}]} {
    %c0 = arith.constant 0 : index
    %c0_0 = arith.constant 0 : index
    %0 = vector.load %arg5[%c0, %c0_0] : memref<108x128xf32, #tpu.memory_space<vmem>>, vector<108x128xf32>
    %c0_1 = arith.constant 0 : index
    %c0_2 = arith.constant 0 : index
    %1 = vector.load %arg1[%c0_1, %c0_2] : memref<128x108xf32, #tpu.memory_space<vmem>>, vector<128x108xf32>
    %cst = arith.constant dense<0.000000e+00> : vector<128x128xf32>
    %2 = tpu.matmul %1, %0, %cst {dimension_numbers = #tpu.dot_dimension_numbers<[1], [0], [0], [1], [0, 0, 1, 1], [], []>} : vector<128x108xf32>, vector<108x128xf32>, vector<128x128xf32> -> vector<128x128xf32>
    %c0_3 = arith.constant 0 : index
    %c0_4 = arith.constant 0 : index
    %3 = vector.load %arg2[%c0_3, %c0_4] : memref<128x108xf32, #tpu.memory_space<vmem>>, vector<128x108xf32>
    %cst_5 = arith.constant dense<0.000000e+00> : vector<128x128xf32>
    %4 = tpu.matmul %3, %0, %cst_5 {dimension_numbers = #tpu.dot_dimension_numbers<[1], [0], [0], [1], [0, 0, 1, 1], [], []>} : vector<128x108xf32>, vector<108x128xf32>, vector<128x128xf32> -> vector<128x128xf32>
    %c0_6 = arith.constant 0 : index
    %c0_7 = arith.constant 0 : index
    %5 = vector.load %arg3[%c0_6, %c0_7] : memref<128x108xf32, #tpu.memory_space<vmem>>, vector<128x108xf32>
    %cst_8 = arith.constant dense<0.000000e+00> : vector<128x128xf32>
    %6 = tpu.matmul %5, %0, %cst_8 {dimension_numbers = #tpu.dot_dimension_numbers<[1], [0], [0], [1], [0, 0, 1, 1], [], []>} : vector<128x108xf32>, vector<108x128xf32>, vector<128x128xf32> -> vector<128x128xf32>
    %c0_9 = arith.constant 0 : index
    %c0_10 = arith.constant 0 : index
    %7 = vector.load %arg4[%c0_9, %c0_10] : memref<128x108xf32, #tpu.memory_space<vmem>>, vector<128x108xf32>
    %cst_11 = arith.constant dense<0.000000e+00> : vector<128x128xf32>
    %8 = tpu.matmul %7, %0, %cst_11 {dimension_numbers = #tpu.dot_dimension_numbers<[1], [0], [0], [1], [0, 0, 1, 1], [], []>} : vector<128x108xf32>, vector<108x128xf32>, vector<128x128xf32> -> vector<128x128xf32>
    %9 = arith.maximumf %2, %4 : vector<128x128xf32>
    %10 = arith.maximumf %6, %8 : vector<128x128xf32>
    %11 = arith.maximumf %9, %10 : vector<128x128xf32>
    %c0_12 = arith.constant 0 : index
    %c0_13 = arith.constant 0 : index
    %12 = vector.load %arg6[%c0_12, %c0_13] : memref<1x128xf32, #tpu.memory_space<vmem>>, vector<1x128xf32>
    %13 = vector.broadcast %12 : vector<1x128xf32> to vector<128x128xf32>
    %14 = arith.addf %11, %13 : vector<128x128xf32>
    %cst_14 = arith.constant 0.000000e+00 : f32
    %15 = vector.broadcast %cst_14 : f32 to vector<128x128xf32>
    %16 = arith.maximumf %14, %15 : vector<128x128xf32>
    %c0_15 = arith.constant 0 : index
    %c0_16 = arith.constant 0 : index
    %17 = vector.load %arg7[%c0_15, %c0_16] : memref<128x128xf32, #tpu.memory_space<vmem>>, vector<128x128xf32>
    tpu.vector_store %arg7[%c0_15, %c0_16], %16 {strides = array<i32>} : memref<128x128xf32, #tpu.memory_space<vmem>>, vector<128x128xf32>,
    return
  }
  func.func @transform_0(%arg0: i32) -> (i32, i32) {
    %c0_i32 = arith.constant 0 : i32
    %c0_i32_0 = arith.constant 0 : i32
    return %arg0, %c0_i32 : i32, i32
  }
  func.func @transform_1(%arg0: i32) -> (i32, i32) {
    %c0_i32 = arith.constant 0 : i32
    %c0_i32_0 = arith.constant 0 : i32
    return %arg0, %c0_i32 : i32, i32
  }
  func.func @transform_2(%arg0: i32) -> (i32, i32) {
    %c0_i32 = arith.constant 0 : i32
    %c0_i32_0 = arith.constant 0 : i32
    return %arg0, %c0_i32 : i32, i32
  }
  func.func @transform_3(%arg0: i32) -> (i32, i32) {
    %c0_i32 = arith.constant 0 : i32
    %c0_i32_0 = arith.constant 0 : i32
    return %arg0, %c0_i32 : i32, i32
  }
  func.func @transform_4(%arg0: i32) -> (i32, i32) {
    %c0_i32 = arith.constant 0 : i32
    %c0_i32_0 = arith.constant 0 : i32
    %c0_i32_1 = arith.constant 0 : i32
    return %c0_i32, %c0_i32_0 : i32, i32
  }
  func.func @transform_5(%arg0: i32) -> (i32, i32) {
    %c0_i32 = arith.constant 0 : i32
    %c0_i32_0 = arith.constant 0 : i32
    %c0_i32_1 = arith.constant 0 : i32
    return %c0_i32, %c0_i32_0 : i32, i32
  }
  func.func @transform_6(%arg0: i32) -> (i32, i32) {
    %c0_i32 = arith.constant 0 : i32
    %c0_i32_0 = arith.constant 0 : i32
    return %arg0, %c0_i32 : i32, i32
  }
}

module attributes {stable_mosaic.version = 11 : i64} {
  func.func @_mlp_kernel(%arg0: i32, %arg1: memref<2x8192xf32, #tpu.memory_space<vmem>>, %arg2: memref<8192x64xf32, #tpu.memory_space<vmem>>, %arg3: memref<1x64xf32, #tpu.memory_space<vmem>>, %arg4: memref<64x10xf32, #tpu.memory_space<vmem>>, %arg5: memref<1x10xf32, #tpu.memory_space<vmem>>, %arg6: memref<2x10xf32, #tpu.memory_space<vmem>>, %arg7: memref<2x64xf32, #tpu.memory_space<vmem>>) attributes {dimension_semantics = [#tpu.dimension_semantics<arbitrary>], iteration_bounds = array<i64: 4>, scalar_prefetch = 0 : i64, scratch_operands = 1 : i64, tpu.core_type = #tpu.core_type<tc>, window_params = [{transform_indices = @transform_0, window_bounds = array<i64: 2, 8192>}, {transform_indices = @transform_1, window_bounds = array<i64: 8192, 64>}, {pipeline_mode = #tpu.pipeline_mode<synchronous>, transform_indices = @transform_2, window_bounds = array<i64: 1, 64>}, {pipeline_mode = #tpu.pipeline_mode<synchronous>, transform_indices = @transform_3, window_bounds = array<i64: 64, 10>}, {pipeline_mode = #tpu.pipeline_mode<synchronous>, transform_indices = @transform_4, window_bounds = array<i64: 1, 10>}, {pipeline_mode = #tpu.pipeline_mode<synchronous>, transform_indices = @transform_5, window_bounds = array<i64: 2, 10>}]} {
    %c0_i32 = arith.constant 0 : i32
    %0 = arith.cmpi eq, %arg0, %c0_i32 : i32
    %1 = arith.extui %0 : i1 to i32
    %c0_i32_0 = arith.constant 0 : i32
    %2 = arith.cmpi ne, %1, %c0_i32_0 : i32
    scf.if %2 {
      %cst_9 = arith.constant 0.000000e+00 : f32
      %12 = vector.broadcast %cst_9 : f32 to vector<2x64xf32>
      %c0_10 = arith.constant 0 : index
      %c0_11 = arith.constant 0 : index
      %13 = vector.load %arg7[%c0_10, %c0_11] : memref<2x64xf32, #tpu.memory_space<vmem>>, vector<2x64xf32>
      tpu.vector_store %arg7[%c0_10, %c0_11], %12 {strides = array<i32>} : memref<2x64xf32, #tpu.memory_space<vmem>>, vector<2x64xf32>,
    } else {
    }
    %c0 = arith.constant 0 : index
    %c0_1 = arith.constant 0 : index
    %3 = vector.load %arg7[%c0, %c0_1] : memref<2x64xf32, #tpu.memory_space<vmem>>, vector<2x64xf32>
    %c0_2 = arith.constant 0 : index
    %c0_3 = arith.constant 0 : index
    %4 = vector.load %arg1[%c0_2, %c0_3] : memref<2x8192xf32, #tpu.memory_space<vmem>>, vector<2x8192xf32>
    %c0_4 = arith.constant 0 : index
    %c0_5 = arith.constant 0 : index
    %5 = vector.load %arg2[%c0_4, %c0_5] : memref<8192x64xf32, #tpu.memory_space<vmem>>, vector<8192x64xf32>
    %cst = arith.constant dense<0.000000e+00> : vector<2x64xf32>
    %6 = tpu.matmul %4, %5, %cst {dimension_numbers = #tpu.dot_dimension_numbers<[1], [0], [0], [1], [0, 0, 1, 1], [], []>} : vector<2x8192xf32>, vector<8192x64xf32>, vector<2x64xf32> -> vector<2x64xf32>
    %7 = arith.addf %3, %6 : vector<2x64xf32>
    %c0_6 = arith.constant 0 : index
    %c0_7 = arith.constant 0 : index
    %8 = vector.load %arg7[%c0_6, %c0_7] : memref<2x64xf32, #tpu.memory_space<vmem>>, vector<2x64xf32>
    tpu.vector_store %arg7[%c0_6, %c0_7], %7 {strides = array<i32>} : memref<2x64xf32, #tpu.memory_space<vmem>>, vector<2x64xf32>,
    %c3_i32 = arith.constant 3 : i32
    %9 = arith.cmpi eq, %arg0, %c3_i32 : i32
    %10 = arith.extui %9 : i1 to i32
    %c0_i32_8 = arith.constant 0 : i32
    %11 = arith.cmpi ne, %10, %c0_i32_8 : i32
    scf.if %11 {
      %c0_9 = arith.constant 0 : index
      %c0_10 = arith.constant 0 : index
      %12 = vector.load %arg7[%c0_9, %c0_10] : memref<2x64xf32, #tpu.memory_space<vmem>>, vector<2x64xf32>
      %c0_11 = arith.constant 0 : index
      %c0_12 = arith.constant 0 : index
      %13 = vector.load %arg3[%c0_11, %c0_12] : memref<1x64xf32, #tpu.memory_space<vmem>>, vector<1x64xf32>
      %14 = vector.broadcast %13 : vector<1x64xf32> to vector<2x64xf32>
      %15 = arith.addf %12, %14 : vector<2x64xf32>
      %cst_13 = arith.constant 0.000000e+00 : f32
      %16 = vector.broadcast %cst_13 : f32 to vector<2x64xf32>
      %17 = arith.maximumf %15, %16 : vector<2x64xf32>
      %c0_14 = arith.constant 0 : index
      %c0_15 = arith.constant 0 : index
      %18 = vector.load %arg4[%c0_14, %c0_15] : memref<64x10xf32, #tpu.memory_space<vmem>>, vector<64x10xf32>
      %cst_16 = arith.constant dense<0.000000e+00> : vector<2x10xf32>
      %19 = tpu.matmul %17, %18, %cst_16 {dimension_numbers = #tpu.dot_dimension_numbers<[1], [0], [0], [1], [0, 0, 1, 1], [], []>} : vector<2x64xf32>, vector<64x10xf32>, vector<2x10xf32> -> vector<2x10xf32>
      %c0_17 = arith.constant 0 : index
      %c0_18 = arith.constant 0 : index
      %20 = vector.load %arg5[%c0_17, %c0_18] : memref<1x10xf32, #tpu.memory_space<vmem>>, vector<1x10xf32>
      %21 = vector.broadcast %20 : vector<1x10xf32> to vector<2x10xf32>
      %22 = arith.addf %19, %21 : vector<2x10xf32>
      %c0_19 = arith.constant 0 : index
      %c0_20 = arith.constant 0 : index
      %23 = vector.load %arg6[%c0_19, %c0_20] : memref<2x10xf32, #tpu.memory_space<vmem>>, vector<2x10xf32>
      tpu.vector_store %arg6[%c0_19, %c0_20], %22 {strides = array<i32>} : memref<2x10xf32, #tpu.memory_space<vmem>>, vector<2x10xf32>,
    } else {
    }
    return
  }
  func.func @transform_0(%arg0: i32) -> (i32, i32) {
    %c0_i32 = arith.constant 0 : i32
    %c0_i32_0 = arith.constant 0 : i32
    return %c0_i32, %arg0 : i32, i32
  }
  func.func @transform_1(%arg0: i32) -> (i32, i32) {
    %c0_i32 = arith.constant 0 : i32
    %c0_i32_0 = arith.constant 0 : i32
    return %arg0, %c0_i32 : i32, i32
  }
  func.func @transform_2(%arg0: i32) -> (i32, i32) {
    %c0_i32 = arith.constant 0 : i32
    %c0_i32_0 = arith.constant 0 : i32
    %c0_i32_1 = arith.constant 0 : i32
    return %c0_i32, %c0_i32_0 : i32, i32
  }
  func.func @transform_3(%arg0: i32) -> (i32, i32) {
    %c0_i32 = arith.constant 0 : i32
    %c0_i32_0 = arith.constant 0 : i32
    %c0_i32_1 = arith.constant 0 : i32
    return %c0_i32, %c0_i32_0 : i32, i32
  }
  func.func @transform_4(%arg0: i32) -> (i32, i32) {
    %c0_i32 = arith.constant 0 : i32
    %c0_i32_0 = arith.constant 0 : i32
    %c0_i32_1 = arith.constant 0 : i32
    return %c0_i32, %c0_i32_0 : i32, i32
  }
  func.func @transform_5(%arg0: i32) -> (i32, i32) {
    %c0_i32 = arith.constant 0 : i32
    %c0_i32_0 = arith.constant 0 : i32
    %c0_i32_1 = arith.constant 0 : i32
    return %c0_i32, %c0_i32_0 : i32, i32
  }
}

</mosaic_0001>

<bundles_post_ra>
// kernel: custom_model_forward.2
= control target key start
LH: loop header
LB: loop body
LE: loop exit
PB: predicated region body
PF: predicated region fallthrough
CT: control target
= control target key end

     0   :  { %s1836_s21 = smov 0   ;;  %s2303_s0 = inlined_call_operand.vmem [shape: f32[512,108], index: 0, kind: input, shape index: {}]   ;;  %s2304_s1 = inlined_call_operand.vmem [shape: f32[512,108], index: 1, kind: input, shape index: {}]   ;;  %s2305_s2 = inlined_call_operand.vmem [shape: f32[512,108], index: 2, kind: input, shape index: {}]   ;;  %s2306_s3 = inlined_call_operand.vmem [shape: f32[512,108], index: 3, kind: input, shape index: {}]   ;;  %s2307_s4 = inlined_call_operand.vmem [shape: f32[108,128], index: 4, kind: input, shape index: {}]   ;;  %s2308_s5 = inlined_call_operand.vmem [shape: f32[1,128], index: 5, kind: input, shape index: {}]   ;;  %s2309_s6 = inlined_call_operand.vmem [shape: f32[512,128], index: 6, kind: output, shape index: {}]  }
   0x1 LB: > { %s1371_s22 = sadd.s32 4294967295, %s1799_s21   ;;  %p1375_p0 = scmp.ge.s32.totalorder %s1799_s21, 1  ;;  %s1799_s21 = sphi %s1836_s21, %s16_s21  }
   0x2   : > { %p246_p1 = scmp.lt.s32.totalorder %s1799_s21, 5 }
   0x4   : > { %p247_p2 = pnand %p1375_p0, %p246_p1 }
   0x5   : > { %s1376_s11 = sshll.u32 (!%p247_p2), %s1371_s22, 4 }
   0x6   : > { %250 = sbr.rel (%p247_p2) target bundleno = 317 (0x13d), region = 44  ;;  %p292_p3 = scmp.lt.s32.totalorder (!%p247_p2), %s1376_s11, 63 }
   0xb   : > { %v1847_v0 = vld [vmem:[%s2307_s4 + $0x68] sm:$0xf]  ;;  %vm400_vm0 = vcmask 1043456   ;;  %v1852_v1 = vld [vmem:[%s2307_s4 + $0x60] sm:$0xff]  ;;  %v1865_v2 = vld [vmem:[%s2307_s4 + $0x58] sm:$0xff]  ;;  %s2311_s11 = smov (!%p292_p3, %s1376_s11), 63 }
   0xc   : > { %1577 = vmatprep.subr.msk.mxu0 %vm400_vm0, %v1847_v0  ;;  %1629 = vmatprep.subr.msk.mxu1 %vm400_vm0, %v1847_v0  ;;  %v1874_v3 = vld [vmem:[%s2307_s4 + $0x50] sm:$0xff]  ;;  %v1883_v4 = vld [vmem:[%s2307_s4 + $0x48] sm:$0xff]  ;;  %v1892_v5 = vld [vmem:[%s2307_s4 + $0x40] sm:$0xff]  ;;  %s1941_s23 = sshll.u32 %s2311_s11, 3  ;;  %vm351_vm1 = vcmask 883712  }
   0xd   : > { %1578 = vmatpush3.msk.msra.mxu0 %vm400_vm0, %v1847_v0  ;;  %1630 = vmatpush3.msk.msra.mxu1 %vm400_vm0, %v1847_v0  ;;  %v1901_v6 = vld [vmem:[%s2307_s4 + $0x38] sm:$0xff]  ;;  %v1910_v7 = vld [vmem:[%s2307_s4 + $0x30] sm:$0xff]  ;;  %v1919_v8 = vld [vmem:[%s2307_s4 + $0x28] sm:$0xff]  ;;  %s1963_s30 = scalar_lea.vmem %s2303_s0, %s1941_s23  ;;  %s1971_s9 = scalar_lea.vmem %s2304_s1, %s1941_s23 }
   0xe   : > { %1579 = vmatprep.subr.mxu0 %v1852_v1  ;;  %1631 = vmatprep.subr.mxu1 %v1852_v1  ;;  %v1928_v9 = vld [vmem:[%s2307_s4 + $0x20] sm:$0xff]  ;;  %v1937_v10 = vld [vmem:[%s2307_s4 + $0x18] sm:$0xff]  ;;  %v1948_v11 = vld [vmem:[%s2307_s4 + $0x10] sm:$0xff]  ;;  %s2104_s14 = scalar_lea.vmem %s2305_s2, %s1941_s23  ;;  %s2112_s17 = scalar_lea.vmem %s2306_s3, %s1941_s23 }
   0xf   : > { %1580 = vmatpush3.msra.mxu0 %v1852_v1  ;;  %1632 = vmatpush3.msra.mxu1 %v1852_v1  ;;  %v1957_v12 = vld [vmem:[%s2307_s4 + $0x8] sm:$0xff]  ;;  %v1978_v13 = vld [vmem:[%s2307_s4] sm:$0xff]  ;;  %v337_v18 = vld [vmem:[%s1963_s30 + $0x10] sm:$0xff]  ;;  %s2244_s24 = scalar_lea.vmem %s2309_s6, %s1941_s23 }
  0x10   : > { %1581 = vmatprep.subr.mxu0 %v1865_v2  ;;  %1633 = vmatprep.subr.mxu1 %v1865_v2  ;;  %v335_v14 = vld [vmem:[%s1963_s30] sm:$0xff]  ;;  %v336_v16 = vld [vmem:[%s1963_s30 + $0x8] sm:$0xff]  ;;  %v551_v19 = vld [vmem:[%s1971_s9 + $0x10] sm:$0xff] }
  0x11   : > { %1582 = vmatpush3.msra.mxu0 %v1865_v2  ;;  %1634 = vmatpush3.msra.mxu1 %v1865_v2  ;;  %v549_v15 = vld [vmem:[%s1971_s9] sm:$0xff]  ;;  %v550_v17 = vld [vmem:[%s1971_s9 + $0x8] sm:$0xff]  ;;  %v338_v20 = vld [vmem:[%s1963_s30 + $0x18] sm:$0xff] }
  0x12   : > { %1583 = vmatprep.subr.mxu0 %v1874_v3  ;;  %1635 = vmatprep.subr.mxu1 %v1874_v3  ;;  %v552_v21 = vld [vmem:[%s1971_s9 + $0x18] sm:$0xff]  ;;  %v339_v22 = vld [vmem:[%s1963_s30 + $0x20] sm:$0xff]  ;;  %v340_v24 = vld [vmem:[%s1963_s30 + $0x28] sm:$0xff] }
  0x13   : > { %1584 = vmatpush3.msra.mxu0 %v1874_v3  ;;  %1636 = vmatpush3.msra.mxu1 %v1874_v3  ;;  %v553_v23 = vld [vmem:[%s1971_s9 + $0x20] sm:$0xff]  ;;  %v554_v25 = vld [vmem:[%s1971_s9 + $0x28] sm:$0xff]  ;;  %v341_v26 = vld [vmem:[%s1963_s30 + $0x30] sm:$0xff] }
  0x14   : > { %1585 = vmatprep.subr.mxu0 %v1883_v4  ;;  %1637 = vmatprep.subr.mxu1 %v1883_v4  ;;  %v555_v27 = vld [vmem:[%s1971_s9 + $0x30] sm:$0xff]  ;;  %v342_v28 = vld [vmem:[%s1963_s30 + $0x38] sm:$0xff]  ;;  %v343_v30 = vld [vmem:[%s1963_s30 + $0x40] sm:$0xff] }
  0x15   : > { %1586 = vmatpush3.msra.mxu0 %v1883_v4  ;;  %1638 = vmatpush3.msra.mxu1 %v1883_v4  ;;  %v556_v29 = vld [vmem:[%s1971_s9 + $0x38] sm:$0xff]  ;;  %v557_v31 = vld [vmem:[%s1971_s9 + $0x40] sm:$0xff]  ;;  %v344_v32 = vld [vmem:[%s1963_s30 + $0x48] sm:$0xff] }
  0x16   : > { %1587 = vmatprep.subr.mxu0 %v1892_v5  ;;  %1639 = vmatprep.subr.mxu1 %v1892_v5  ;;  %v558_v33 = vld [vmem:[%s1971_s9 + $0x48] sm:$0xff]  ;;  %v345_v34 = vld [vmem:[%s1963_s30 + $0x50] sm:$0xff]  ;;  %v346_v36 = vld [vmem:[%s1963_s30 + $0x58] sm:$0xff] }
  0x17   : > { %1588 = vmatpush3.msra.mxu0 %v1892_v5  ;;  %1640 = vmatpush3.msra.mxu1 %v1892_v5  ;;  %v559_v35 = vld [vmem:[%s1971_s9 + $0x50] sm:$0xff]  ;;  %v560_v37 = vld [vmem:[%s1971_s9 + $0x58] sm:$0xff]  ;;  %v347_v38 = vld [vmem:[%s1963_s30 + $0x60] sm:$0xff] }
  0x18   : > { %1589 = vmatprep.subr.mxu0 %v1901_v6  ;;  %1641 = vmatprep.subr.mxu1 %v1901_v6  ;;  %v561_v39 = vld [vmem:[%s1971_s9 + $0x60] sm:$0xff]  ;;  %v348_v40 = vld [vmem:[%s1963_s30 + $0x68] sm:$0xff]  ;;  %v349_v42 = vld [vmem:[%s1963_s30 + $0x70] sm:$0xff] }
  0x19   : > { %1590 = vmatpush3.msra.mxu0 %v1901_v6  ;;  %1642 = vmatpush3.msra.mxu1 %v1901_v6  ;;  %v562_v41 = vld [vmem:[%s1971_s9 + $0x68] sm:$0xff]  ;;  %v563_v43 = vld [vmem:[%s1971_s9 + $0x70] sm:$0xff]  ;;  %v350_v44 = vld [vmem:[%s1963_s30 + $0x78] sm:$0xff] }
  0x1a   : > { %1591 = vmatprep.subr.mxu0 %v1910_v7  ;;  %1643 = vmatprep.subr.mxu1 %v1910_v7  ;;  %v564_v45 = vld [vmem:[%s1971_s9 + $0x78] sm:$0xff]  ;;  %v758_v46 = vld [vmem:[%s2104_s14] sm:$0xff]  ;;  %v759_v48 = vld [vmem:[%s2104_s14 + $0x8] sm:$0xff] }
  0x1b   : > { %1592 = vmatpush3.msra.mxu0 %v1910_v7  ;;  %1644 = vmatpush3.msra.mxu1 %v1910_v7  ;;  %v967_v47 = vld [vmem:[%s2112_s17] sm:$0xff]  ;;  %v968_v49 = vld [vmem:[%s2112_s17 + $0x8] sm:$0xff]  ;;  %v760_v50 = vld [vmem:[%s2104_s14 + $0x10] sm:$0xff] }
  0x1c   : > { %1593 = vmatprep.subr.mxu0 %v1919_v8  ;;  %1645 = vmatprep.subr.mxu1 %v1919_v8  ;;  %v969_v51 = vld [vmem:[%s2112_s17 + $0x10] sm:$0xff]  ;;  %v761_v52 = vld [vmem:[%s2104_s14 + $0x18] sm:$0xff]  ;;  %v762_v54 = vld [vmem:[%s2104_s14 + $0x20] sm:$0xff] }
  0x1d   : > { %1594 = vmatpush3.msra.mxu0 %v1919_v8  ;;  %1646 = vmatpush3.msra.mxu1 %v1919_v8  ;;  %v970_v53 = vld [vmem:[%s2112_s17 + $0x18] sm:$0xff]  ;;  %v971_v55 = vld [vmem:[%s2112_s17 + $0x20] sm:$0xff]  ;;  %v763_v56 = vld [vmem:[%s2104_s14 + $0x28] sm:$0xff] }
  0x1e   : > { %1595 = vmatprep.subr.mxu0 %v1928_v9  ;;  %1647 = vmatprep.subr.mxu1 %v1928_v9  ;;  %v972_v57 = vld [vmem:[%s2112_s17 + $0x28] sm:$0xff]  ;;  %v764_v58 = vld [vmem:[%s2104_s14 + $0x30] sm:$0xff]  ;;  %v765_v60 = vld [vmem:[%s2104_s14 + $0x38] sm:$0xff] }
  0x1f   : > { %1596 = vmatpush3.msra.mxu0 %v1928_v9  ;;  %1648 = vmatpush3.msra.mxu1 %v1928_v9  ;;  %v973_v59 = vld [vmem:[%s2112_s17 + $0x30] sm:$0xff]  ;;  %v974_v61 = vld [vmem:[%s2112_s17 + $0x38] sm:$0xff]  ;;  %v766_v62 = vld [vmem:[%s2104_s14 + $0x40] sm:$0xff] }
  0x20   : > { %1597 = vmatprep.subr.mxu0 %v1937_v10  ;;  %1649 = vmatprep.subr.mxu1 %v1937_v10  ;;  %v975_v63 = vld [vmem:[%s2112_s17 + $0x40] sm:$0xff] }
  0x21   : > { %1598 = vmatpush3.msra.mxu0 %v1937_v10  ;;  %1650 = vmatpush3.msra.mxu1 %v1937_v10 }
  0x22   : > { %1599 = vmatprep.subr.mxu0 %v1948_v11  ;;  %1651 = vmatprep.subr.mxu1 %v1948_v11 }
  0x23   : > { %1600 = vmatpush3.msra.mxu0 %v1948_v11  ;;  %1652 = vmatpush3.msra.mxu1 %v1948_v11 }
  0x24   : > { %1601 = vmatprep.subr.mxu0 %v1957_v12  ;;  %1653 = vmatprep.subr.mxu1 %v1957_v12 }
  0x25   : > { %1602 = vmatpush3.msra.mxu0 %v1957_v12  ;;  %1654 = vmatpush3.msra.mxu1 %v1957_v12 }
  0x26   : > { %1603 = vmatprep.subr.mxu0 %v1978_v13  ;;  %1655 = vmatprep.subr.mxu1 %v1978_v13 }
  0x27   : > { %1604 = vmatpush3.msra.mxu0 %v1978_v13  ;;  %1605 = vmatprep.mubr.msk.f32.mxu0 %vm351_vm1, %v335_v14 }
  0x28   : > { %1656 = vmatpush3.msra.mxu1 %v1978_v13  ;;  %1657 = vmatprep.mubr.msk.f32.mxu1 %vm351_vm1, %v549_v15 }
  0x29   : > { %1606 = vmatmul.mubr.msk.f32.vlgmr.msra.gmra.mxu0 %vm351_vm1, %v336_v16  ;;  %1658 = vmatmul.mubr.msk.f32.vlgmr.msra.gmra.mxu1 %vm351_vm1, %v550_v17 }
  0x2a   : > { %1681 = vmatprep.subr.msk.mxu0 %vm400_vm0, %v1847_v0  ;;  %1733 = vmatprep.subr.msk.mxu1 %vm400_vm0, %v1847_v0 }
  0x2b   : > { %1682 = vmatpush3.msk.msra.mxu0 %vm400_vm0, %v1847_v0  ;;  %1734 = vmatpush3.msk.msra.mxu1 %vm400_vm0, %v1847_v0  ;;  %v767_v0 = vld [vmem:[%s2104_s14 + $0x48] sm:$0xff] }
  0x2c   : > { %1608 = vmatprep.mubr.msk.f32.mxu0 %vm351_vm1, %v337_v18  ;;  %1660 = vmatprep.mubr.msk.f32.mxu1 %vm351_vm1, %v551_v19 }
  0x2d   : > { %1683 = vmatprep.subr.mxu0 %v1852_v1  ;;  %1735 = vmatprep.subr.mxu1 %v1852_v1 }
  0x2e   : > { %1609 = vmatmul.mubr.msk.f32.gmra.mxu0 %vm351_vm1, %v338_v20  ;;  %1661 = vmatmul.mubr.msk.f32.gmra.mxu1 %vm351_vm1, %v552_v21 }
  0x2f   : > { %1684 = vmatpush3.msra.mxu0 %v1852_v1  ;;  %1736 = vmatpush3.msra.mxu1 %v1852_v1  ;;  %v976_v1 = vld [vmem:[%s2112_s17 + $0x48] sm:$0xff] }
  0x30   : > { %1685 = vmatprep.subr.mxu0 %v1865_v2  ;;  %1737 = vmatprep.subr.mxu1 %v1865_v2 }
  0x31   : > { %1686 = vmatpush3.msra.mxu0 %v1865_v2  ;;  %1738 = vmatpush3.msra.mxu1 %v1865_v2  ;;  %v768_v2 = vld [vmem:[%s2104_s14 + $0x50] sm:$0xff] }
  0x32   : > { %1611 = vmatprep.mubr.msk.f32.mxu0 %vm351_vm1, %v339_v22  ;;  %1663 = vmatprep.mubr.msk.f32.mxu1 %vm351_vm1, %v553_v23 }
  0x33   : > { %1687 = vmatprep.subr.mxu0 %v1874_v3  ;;  %1739 = vmatprep.subr.mxu1 %v1874_v3 }
  0x34   : > { %1612 = vmatmul.mubr.msk.f32.gmra.mxu0 %vm351_vm1, %v340_v24  ;;  %1664 = vmatmul.mubr.msk.f32.gmra.mxu1 %vm351_vm1, %v554_v25 }
  0x35   : > { %1688 = vmatpush3.msra.mxu0 %v1874_v3  ;;  %1740 = vmatpush3.msra.mxu1 %v1874_v3  ;;  %v977_v3 = vld [vmem:[%s2112_s17 + $0x50] sm:$0xff] }
  0x36   : > { %1689 = vmatprep.subr.mxu0 %v1883_v4  ;;  %1741 = vmatprep.subr.mxu1 %v1883_v4 }
  0x37   : > { %1614 = vmatprep.mubr.msk.f32.mxu0 %vm351_vm1, %v341_v26  ;;  %1666 = vmatprep.mubr.msk.f32.mxu1 %vm351_vm1, %v555_v27 }
  0x38   : > { %1690 = vmatpush3.msra.mxu0 %v1883_v4  ;;  %1742 = vmatpush3.msra.mxu1 %v1883_v4  ;;  %v769_v4 = vld [vmem:[%s2104_s14 + $0x58] sm:$0xff] }
  0x39   : > { %1615 = vmatmul.mubr.msk.f32.gmra.mxu0 %vm351_vm1, %v342_v28  ;;  %1667 = vmatmul.mubr.msk.f32.gmra.mxu1 %vm351_vm1, %v556_v29 }
  0x3a   : > { %1691 = vmatprep.subr.mxu0 %v1892_v5  ;;  %1743 = vmatprep.subr.mxu1 %v1892_v5 }
  0x3b   : > { %1692 = vmatpush3.msra.mxu0 %v1892_v5  ;;  %1744 = vmatpush3.msra.mxu1 %v1892_v5  ;;  %v978_v5 = vld [vmem:[%s2112_s17 + $0x58] sm:$0xff] }
  0x3c   : > { %1693 = vmatprep.subr.mxu0 %v1901_v6  ;;  %1745 = vmatprep.subr.mxu1 %v1901_v6 }
  0x3d   : > { %1617 = vmatprep.mubr.msk.f32.mxu0 %vm351_vm1, %v343_v30  ;;  %1669 = vmatprep.mubr.msk.f32.mxu1 %vm351_vm1, %v557_v31 }
  0x3e   : > { %1694 = vmatpush3.msra.mxu0 %v1901_v6  ;;  %1746 = vmatpush3.msra.mxu1 %v1901_v6  ;;  %v770_v6 = vld [vmem:[%s2104_s14 + $0x60] sm:$0xff] }
  0x3f   : > { %1618 = vmatmul.mubr.msk.f32.gmra.mxu0 %vm351_vm1, %v344_v32  ;;  %1670 = vmatmul.mubr.msk.f32.gmra.mxu1 %vm351_vm1, %v558_v33 }
  0x40   : > { %1695 = vmatprep.subr.mxu0 %v1910_v7  ;;  %1747 = vmatprep.subr.mxu1 %v1910_v7 }
  0x41   : > { %1696 = vmatpush3.msra.mxu0 %v1910_v7  ;;  %1748 = vmatpush3.msra.mxu1 %v1910_v7  ;;  %v979_v7 = vld [vmem:[%s2112_s17 + $0x60] sm:$0xff] }
  0x42   : > { %1620 = vmatprep.mubr.msk.f32.mxu0 %vm351_vm1, %v345_v34  ;;  %1672 = vmatprep.mubr.msk.f32.mxu1 %vm351_vm1, %v559_v35 }
  0x43   : > { %1697 = vmatprep.subr.mxu0 %v1919_v8  ;;  %1749 = vmatprep.subr.mxu1 %v1919_v8 }
  0x44   : > { %1621 = vmatmul.mubr.msk.f32.gmra.mxu0 %vm351_vm1, %v346_v36  ;;  %1673 = vmatmul.mubr.msk.f32.gmra.mxu1 %vm351_vm1, %v560_v37 }
  0x45   : > { %1698 = vmatpush3.msra.mxu0 %v1919_v8  ;;  %1750 = vmatpush3.msra.mxu1 %v1919_v8  ;;  %v771_v8 = vld [vmem:[%s2104_s14 + $0x68] sm:$0xff] }
  0x46   : > { %1699 = vmatprep.subr.mxu0 %v1928_v9  ;;  %1751 = vmatprep.subr.mxu1 %v1928_v9 }
  0x47   : > { %1700 = vmatpush3.msra.mxu0 %v1928_v9  ;;  %1752 = vmatpush3.msra.mxu1 %v1928_v9  ;;  %v980_v9 = vld [vmem:[%s2112_s17 + $0x68] sm:$0xff] }
  0x48   : > { %1623 = vmatprep.mubr.msk.f32.mxu0 %vm351_vm1, %v347_v38  ;;  %1675 = vmatprep.mubr.msk.f32.mxu1 %vm351_vm1, %v561_v39 }
  0x49   : > { %1701 = vmatprep.subr.mxu0 %v1937_v10  ;;  %1753 = vmatprep.subr.mxu1 %v1937_v10 }
  0x4a   : > { %1624 = vmatmul.mubr.msk.f32.gmra.mxu0 %vm351_vm1, %v348_v40  ;;  %1676 = vmatmul.mubr.msk.f32.gmra.mxu1 %vm351_vm1, %v562_v41 }
  0x4b   : > { %1702 = vmatpush3.msra.mxu0 %v1937_v10  ;;  %1754 = vmatpush3.msra.mxu1 %v1937_v10  ;;  %v772_v10 = vld [vmem:[%s2104_s14 + $0x70] sm:$0xff] }
  0x4c   : > { %1703 = vmatprep.subr.mxu0 %v1948_v11  ;;  %1755 = vmatprep.subr.mxu1 %v1948_v11 }
  0x4d   : > { %1626 = vmatprep.mubr.msk.f32.mxu0 %vm351_vm1, %v349_v42  ;;  %1678 = vmatprep.mubr.msk.f32.mxu1 %vm351_vm1, %v563_v43 }
  0x4e   : > { %1704 = vmatpush3.msra.mxu0 %v1948_v11  ;;  %1756 = vmatpush3.msra.mxu1 %v1948_v11  ;;  %v981_v11 = vld [vmem:[%s2112_s17 + $0x70] sm:$0xff] }
  0x4f   : > { %1627 = vmatmul.mubr.msk.f32.gmra.mxu0 %vm351_vm1, %v350_v44  ;;  %1679 = vmatmul.mubr.msk.f32.gmra.mxu1 %vm351_vm1, %v564_v45 }
  0x50   : > { %1705 = vmatprep.subr.mxu0 %v1957_v12  ;;  %1757 = vmatprep.subr.mxu1 %v1957_v12 }
  0x51   : > { %1706 = vmatpush3.msra.mxu0 %v1957_v12  ;;  %1758 = vmatpush3.msra.mxu1 %v1957_v12  ;;  %v773_v12 = vld [vmem:[%s2104_s14 + $0x78] sm:$0xff] }
  0x52   : > { %1707 = vmatprep.subr.mxu0 %v1978_v13  ;;  %1759 = vmatprep.subr.mxu1 %v1978_v13 }
  0x53   : > { %1708 = vmatpush3.msra.mxu0 %v1978_v13  ;;  %1709 = vmatprep.mubr.msk.f32.mxu0 %vm351_vm1, %v758_v46 }
  0x54   : > { %1760 = vmatpush3.msra.mxu1 %v1978_v13  ;;  %1761 = vmatprep.mubr.msk.f32.mxu1 %vm351_vm1, %v967_v47  ;;  %v982_v13 = vld [vmem:[%s2112_s17 + $0x78] sm:$0xff] }
  0x55   : > { %1710 = vmatmul.mubr.msk.f32.vlgmr.msra.gmra.mxu0 %vm351_vm1, %v759_v48  ;;  %1762 = vmatmul.mubr.msk.f32.vlgmr.msra.gmra.mxu1 %vm351_vm1, %v968_v49 }
  0x56   : > { %1712 = vmatprep.mubr.msk.f32.mxu0 %vm351_vm1, %v760_v50  ;;  %1764 = vmatprep.mubr.msk.f32.mxu1 %vm351_vm1, %v969_v51  ;;  %v2237_v50 = vld [vmem:[%s2308_s5] ss:$0 sm:$0xff] }
  0x59   : > { %1713 = vmatmul.mubr.msk.f32.gmra.mxu0 %vm351_vm1, %v761_v52  ;;  %1765 = vmatmul.mubr.msk.f32.gmra.mxu1 %vm351_vm1, %v970_v53 }
  0x5a   : > { %1715 = vmatprep.mubr.msk.f32.mxu0 %vm351_vm1, %v762_v54  ;;  %1767 = vmatprep.mubr.msk.f32.mxu1 %vm351_vm1, %v971_v55 }
  0x5d   : > { %1716 = vmatmul.mubr.msk.f32.gmra.mxu0 %vm351_vm1, %v763_v56  ;;  %1768 = vmatmul.mubr.msk.f32.gmra.mxu1 %vm351_vm1, %v972_v57 }
  0x5e   : > { %1718 = vmatprep.mubr.msk.f32.mxu0 %vm351_vm1, %v764_v58  ;;  %1770 = vmatprep.mubr.msk.f32.mxu1 %vm351_vm1, %v973_v59 }
  0x61   : > { %1719 = vmatmul.mubr.msk.f32.gmra.mxu0 %vm351_vm1, %v765_v60  ;;  %1771 = vmatmul.mubr.msk.f32.gmra.mxu1 %vm351_vm1, %v974_v61 }
  0x62   : > { %1721 = vmatprep.mubr.msk.f32.mxu0 %vm351_vm1, %v766_v62  ;;  %1773 = vmatprep.mubr.msk.f32.mxu1 %vm351_vm1, %v975_v63 }
  0x65   : > { %1722 = vmatmul.mubr.msk.f32.gmra.mxu0 %vm351_vm1, %v767_v0  ;;  %1774 = vmatmul.mubr.msk.f32.gmra.mxu1 %vm351_vm1, %v976_v1 }
  0x66   : > { %1724 = vmatprep.mubr.msk.f32.mxu0 %vm351_vm1, %v768_v2  ;;  %1776 = vmatprep.mubr.msk.f32.mxu1 %vm351_vm1, %v977_v3 }
  0x69   : > { %1725 = vmatmul.mubr.msk.f32.gmra.mxu0 %vm351_vm1, %v769_v4  ;;  %1777 = vmatmul.mubr.msk.f32.gmra.mxu1 %vm351_vm1, %v978_v5 }
  0x6a   : > { %1727 = vmatprep.mubr.msk.f32.mxu0 %vm351_vm1, %v770_v6  ;;  %1779 = vmatprep.mubr.msk.f32.mxu1 %vm351_vm1, %v979_v7 }
  0x6d   : > { %1728 = vmatmul.mubr.msk.f32.gmra.mxu0 %vm351_vm1, %v771_v8  ;;  %1780 = vmatmul.mubr.msk.f32.gmra.mxu1 %vm351_vm1, %v980_v9 }
  0x6e   : > { %1730 = vmatprep.mubr.msk.f32.mxu0 %vm351_vm1, %v772_v10  ;;  %1782 = vmatprep.mubr.msk.f32.mxu1 %vm351_vm1, %v981_v11 }
  0x71   : > { %1731 = vmatmul.mubr.msk.f32.gmra.mxu0 %vm351_vm1, %v773_v12  ;;  %1783 = vmatmul.mubr.msk.f32.gmra.mxu1 %vm351_vm1, %v982_v13 }
  0xe9   : > { %v1607_v14 = vpop.f32.mrf.mxu0  ;;  %v1659_v15 = vpop.f32.mrf.mxu1 }
  0xea   : > { %v1177_v48 = vmax.f32 %v1607_v14, %v1659_v15 }
  0xeb   : > { %v470_v16 = vpop.f32.mrf.mxu0  ;;  %v679_v17 = vpop.f32.mrf.mxu1 }
  0xec   : > { %v1176_v53 = vmax.f32 %v470_v16, %v679_v17 }
  0xee   : > { %v1610_v18 = vpop.f32.mrf.mxu0  ;;  %v1662_v19 = vpop.f32.mrf.mxu1 }
  0xef   : > { %v1179_v58 = vmax.f32 %v1610_v18, %v1662_v19 }
  0xf0   : > { %v480_v20 = vpop.f32.mrf.mxu0  ;;  %v689_v21 = vpop.f32.mrf.mxu1 }
  0xf1   : > { %v1178_v62 = vmax.f32 %v480_v20, %v689_v21 }
  0xf4   : > { %v2188_v22 = vpop.f32.mrf.mxu0  ;;  %v1665_v23 = vpop.f32.mrf.mxu1 }
  0xf5   : > { %v1181_v5 = vmax.f32 %v2188_v22, %v1665_v23 }
  0xf6   : > { %v2190_v24 = vpop.f32.mrf.mxu0  ;;  %v2192_v25 = vpop.f32.mrf.mxu1 }
  0xf7   : > { %v1180_v12 = vmax.f32 %v2190_v24, %v2192_v25 }
  0xf9   : > { %v2194_v26 = vpop.f32.mrf.mxu0  ;;  %v2196_v27 = vpop.f32.mrf.mxu1 }
  0xfa   : > { %v1183_v19 = vmax.f32 %v2194_v26, %v2196_v27 }
  0xfb   : > { %v2198_v28 = vpop.f32.mrf.mxu0  ;;  %v2200_v29 = vpop.f32.mrf.mxu1 }
  0xff   : > { %v2202_v30 = vpop.f32.mrf.mxu0  ;;  %v2204_v31 = vpop.f32.mrf.mxu1 }
 0x101   : > { %v2206_v32 = vpop.f32.mrf.mxu0  ;;  %v2208_v33 = vpop.f32.mrf.mxu1 }
 0x104   : > { %v2210_v34 = vpop.f32.mrf.mxu0  ;;  %v2212_v35 = vpop.f32.mrf.mxu1 }
 0x106   : > { %v2214_v36 = vpop.f32.mrf.mxu0  ;;  %v2216_v37 = vpop.f32.mrf.mxu1 }
 0x10a   : > { %v2218_v38 = vpop.f32.mrf.mxu0  ;;  %v2220_v39 = vpop.f32.mrf.mxu1 }
 0x10c   : > { %v2222_v40 = vpop.f32.mrf.mxu0  ;;  %v2224_v41 = vpop.f32.mrf.mxu1 }
 0x10f   : > { %v2226_v42 = vpop.f32.mrf.mxu0  ;;  %v2228_v43 = vpop.f32.mrf.mxu1 }
 0x111   : > { %v2230_v44 = vpop.f32.mrf.mxu0  ;;  %v2232_v45 = vpop.f32.mrf.mxu1 }
 0x115   : > { %v1711_v46 = vpop.f32.mrf.mxu0  ;;  %v1763_v47 = vpop.f32.mrf.mxu1 }
 0x116   : > { %v1193_v49 = vmax.f32 %v1711_v46, %v1763_v47  ;;  %v1182_v46 = vmax.f32 %v2198_v28, %v2200_v29 }
 0x117   : > { %v888_v51 = vpop.f32.mrf.mxu0  ;;  %v1097_v52 = vpop.f32.mrf.mxu1 }
 0x118   : > { %v1209_v54 = vmax.f32 %v1177_v48, %v1193_v49  ;;  %v1192_v55 = vmax.f32 %v888_v51, %v1097_v52  ;;  %v1185_v52 = vmax.f32 %v2202_v30, %v2204_v31 }
 0x119   : > { %v1714_v56 = vpop.f32.mrf.mxu0  ;;  %v1766_v57 = vpop.f32.mrf.mxu1 }
 0x11a   : > { %v1232_v59 = vadd.f32 %v2237_v50, %v1209_v54  ;;  %v1208_v60 = vmax.f32 %v1176_v53, %v1192_v55  ;;  %v1195_v61 = vmax.f32 %v1714_v56, %v1766_v57  ;;  %v1184_v57 = vmax.f32 %v2206_v32, %v2208_v33 }
 0x11b   : > { %v898_v63 = vpop.f32.mrf.mxu0  ;;  %v1107_v0 = vpop.f32.mrf.mxu1 }
 0x11c   : > { %v1248_v1 = vmax.f32 %v1232_v59, 0.0  ;;  %v1231_v2 = vadd.f32 %v2237_v50, %v1208_v60  ;;  %v1211_v3 = vmax.f32 %v1179_v58, %v1195_v61  ;;  %v1194_v4 = vmax.f32 %v898_v63, %v1107_v0 }
 0x11d   : > { %v1717_v6 = vpop.f32.mrf.mxu0  ;;  %v1769_v7 = vpop.f32.mrf.mxu1 }
 0x11e   : > { %1264 = vst [vmem:[%s2244_s24 + $0x8] sm:$0xff] %v1248_v1  ;;  %v1247_v8 = vmax.f32 %v1231_v2, 0.0  ;;  %v1234_v9 = vadd.f32 %v2237_v50, %v1211_v3  ;;  %v1210_v10 = vmax.f32 %v1178_v62, %v1194_v4  ;;  %v1197_v11 = vmax.f32 %v1717_v6, %v1769_v7 }
 0x11f   : > { %v908_v13 = vpop.f32.mrf.mxu0  ;;  %v1117_v14 = vpop.f32.mrf.mxu1  ;;  %v1187_v62 = vmax.f32 %v2210_v34, %v2212_v35  ;;  %v1186_v3 = vmax.f32 %v2214_v36, %v2216_v37 }
 0x120   : > { %1263 = vst [vmem:[%s2244_s24] sm:$0xff] %v1247_v8  ;;  %v1250_v15 = vmax.f32 %v1234_v9, 0.0  ;;  %v1233_v16 = vadd.f32 %v2237_v50, %v1210_v10  ;;  %v1213_v17 = vmax.f32 %v1181_v5, %v1197_v11  ;;  %v1196_v18 = vmax.f32 %v908_v13, %v1117_v14 }
 0x121   : > { %v1720_v20 = vpop.f32.mrf.mxu0  ;;  %v1772_v21 = vpop.f32.mrf.mxu1  ;;  %v1189_v8 = vmax.f32 %v2218_v38, %v2220_v39  ;;  %v1188_v13 = vmax.f32 %v2222_v40, %v2224_v41 }
 0x122   : > { %1266 = vst [vmem:[%s2244_s24 + $0x18] sm:$0xff] %v1250_v15  ;;  %v1249_v22 = vmax.f32 %v1233_v16, 0.0  ;;  %v1236_v23 = vadd.f32 %v2237_v50, %v1213_v17  ;;  %v1212_v24 = vmax.f32 %v1180_v12, %v1196_v18  ;;  %v1199_v25 = vmax.f32 %v1720_v20, %v1772_v21 }
 0x123   : > { %v918_v47 = vpop.f32.mrf.mxu0  ;;  %v1127_v48 = vpop.f32.mrf.mxu1  ;;  %v1191_v18 = vmax.f32 %v2226_v42, %v2228_v43 }
 0x124   : > { %1265 = vst [vmem:[%s2244_s24 + $0x10] sm:$0xff] %v1249_v22  ;;  %v1252_v49 = vmax.f32 %v1236_v23, 0.0  ;;  %v1235_v51 = vadd.f32 %v2237_v50, %v1212_v24  ;;  %v1215_v26 = vmax.f32 %v1183_v19, %v1199_v25  ;;  %v1198_v27 = vmax.f32 %v918_v47, %v1127_v48 }
 0x125   : > { %v1723_v53 = vpop.f32.mrf.mxu0  ;;  %v1775_v54 = vpop.f32.mrf.mxu1  ;;  %v1190_v23 = vmax.f32 %v2230_v44, %v2232_v45 }
 0x126   : > { %1268 = vst [vmem:[%s2244_s24 + $0x28] sm:$0xff] %v1252_v49  ;;  %v1251_v55 = vmax.f32 %v1235_v51, 0.0  ;;  %v1238_v56 = vadd.f32 %v2237_v50, %v1215_v26  ;;  %v1214_v28 = vmax.f32 %v1182_v46, %v1198_v27  ;;  %v1201_v29 = vmax.f32 %v1723_v53, %v1775_v54 }
 0x127   : > { %v928_v58 = vpop.f32.mrf.mxu0  ;;  %v1137_v59 = vpop.f32.mrf.mxu1 }
 0x128   : > { %1267 = vst [vmem:[%s2244_s24 + $0x20] sm:$0xff] %v1251_v55  ;;  %v1254_v60 = vmax.f32 %v1238_v56, 0.0  ;;  %v1237_v61 = vadd.f32 %v2237_v50, %v1214_v28  ;;  %v1217_v30 = vmax.f32 %v1185_v52, %v1201_v29  ;;  %v1200_v31 = vmax.f32 %v928_v58, %v1137_v59 }
 0x129   : > { %v1726_v63 = vpop.f32.mrf.mxu0  ;;  %v1778_v0 = vpop.f32.mrf.mxu1 }
 0x12a   : > { %1270 = vst [vmem:[%s2244_s24 + $0x38] sm:$0xff] %v1254_v60  ;;  %v1253_v1 = vmax.f32 %v1237_v61, 0.0  ;;  %v1240_v2 = vadd.f32 %v2237_v50, %v1217_v30  ;;  %v1216_v32 = vmax.f32 %v1184_v57, %v1200_v31  ;;  %v1203_v33 = vmax.f32 %v1726_v63, %v1778_v0 }
 0x12b   : > { %v938_v4 = vpop.f32.mrf.mxu0  ;;  %v1147_v5 = vpop.f32.mrf.mxu1 }
 0x12c   : > { %1269 = vst [vmem:[%s2244_s24 + $0x30] sm:$0xff] %v1253_v1  ;;  %v1256_v6 = vmax.f32 %v1240_v2, 0.0  ;;  %v1239_v7 = vadd.f32 %v2237_v50, %v1216_v32  ;;  %v1219_v34 = vmax.f32 %v1187_v62, %v1203_v33  ;;  %v1202_v35 = vmax.f32 %v938_v4, %v1147_v5 }
 0x12d   : > { %v1729_v9 = vpop.f32.mrf.mxu0  ;;  %v1781_v10 = vpop.f32.mrf.mxu1 }
 0x12e   : > { %1272 = vst [vmem:[%s2244_s24 + $0x48] sm:$0xff] %v1256_v6  ;;  %v1255_v11 = vmax.f32 %v1239_v7, 0.0  ;;  %v1242_v12 = vadd.f32 %v2237_v50, %v1219_v34  ;;  %v1218_v36 = vmax.f32 %v1186_v3, %v1202_v35  ;;  %v1205_v37 = vmax.f32 %v1729_v9, %v1781_v10 }
 0x12f   : > { %v948_v14 = vpop.f32.mrf.mxu0  ;;  %v1157_v15 = vpop.f32.mrf.mxu1 }
 0x130   : > { %1271 = vst [vmem:[%s2244_s24 + $0x40] sm:$0xff] %v1255_v11  ;;  %v1258_v16 = vmax.f32 %v1242_v12, 0.0  ;;  %v1241_v17 = vadd.f32 %v2237_v50, %v1218_v36  ;;  %v1221_v38 = vmax.f32 %v1189_v8, %v1205_v37  ;;  %v1204_v39 = vmax.f32 %v948_v14, %v1157_v15 }
 0x131   : > { %v1732_v19 = vpop.f32.mrf.mxu0  ;;  %v1784_v20 = vpop.f32.mrf.mxu1 }
 0x132   : > { %1274 = vst [vmem:[%s2244_s24 + $0x58] sm:$0xff] %v1258_v16  ;;  %v1257_v21 = vmax.f32 %v1241_v17, 0.0  ;;  %v1244_v40 = vadd.f32 %v2237_v50, %v1221_v38  ;;  %v1220_v41 = vmax.f32 %v1188_v13, %v1204_v39  ;;  %v1207_v22 = vmax.f32 %v1732_v19, %v1784_v20 }
 0x133   : > { %v958_v24 = vpop.f32.mrf.mxu0  ;;  %v1167_v25 = vpop.f32.mrf.mxu1 }
 0x134   : > { %1273 = vst [vmem:[%s2244_s24 + $0x50] sm:$0xff] %v1257_v21  ;;  %v1260_v46 = vmax.f32 %v1244_v40, 0.0  ;;  %v1243_v42 = vadd.f32 %v2237_v50, %v1220_v41  ;;  %v1223_v43 = vmax.f32 %v1191_v18, %v1207_v22  ;;  %v1206_v47 = vmax.f32 %v958_v24, %v1167_v25 }
 0x136   : > { %1276 = vst [vmem:[%s2244_s24 + $0x68] sm:$0xff] %v1260_v46  ;;  %v1259_v48 = vmax.f32 %v1243_v42, 0.0  ;;  %v1246_v49 = vadd.f32 %v2237_v50, %v1223_v43  ;;  %v1222_v51 = vmax.f32 %v1190_v23, %v1206_v47 }
 0x138   : > { %1275 = vst [vmem:[%s2244_s24 + $0x60] sm:$0xff] %v1259_v48  ;;  %v1262_v26 = vmax.f32 %v1246_v49, 0.0  ;;  %v1245_v27 = vadd.f32 %v2237_v50, %v1222_v51 }
 0x13a   : > { %1278 = vst [vmem:[%s2244_s24 + $0x78] sm:$0xff] %v1262_v26  ;;  %v1261_v44 = vmax.f32 %v1245_v27, 0.0 }
 0x13c   : > { %1277 = vst [vmem:[%s2244_s24 + $0x70] sm:$0xff] %v1261_v44 }
 0x13d PF: > { %s16_s21 = sadd.s32 1, %s1799_s21  }
 0x13e   : > { %p13_p4 = scmp.ge.s32.totalorder %s16_s21, 6  }
 0x140   :  { %15 = sbr.rel (!%p13_p4) target bundleno = 1 (0x1), region = 83 }

// kernel: custom_model_forward.3
= control target key start
LH: loop header
LB: loop body
LE: loop exit
PB: predicated region body
PF: predicated region fallthrough
CT: control target
= control target key end

     0   :  { %10 = vsyncpa [#allocation4], 0  ;;  %s5311_s18 = smov 0   ;;  %s6454_s0 = inlined_call_operand.vmem [shape: f32[2,32768], index: 0, kind: input, shape index: {}]   ;;  %s6455_s1 = inlined_call_operand.vmem [shape: f32[32768,64], index: 1, kind: input, shape index: {}]   ;;  %s6456_s2 = inlined_call_operand.vmem [shape: f32[1,64], index: 2, kind: input, shape index: {}]   ;;  %s6457_s3 = inlined_call_operand.vmem [shape: f32[64,10], index: 3, kind: input, shape index: {}]   ;;  %s6458_s4 = inlined_call_operand.vmem [shape: f32[1,10], index: 4, kind: input, shape index: {}]   ;;  %s6459_s5 = inlined_call_operand.hbm [shape: f32[2,10], index: 5, kind: output, shape index: {}]  }
   0x1 LB: > { %s5317_s19 = sadd.s32 4294967295, %s5274_s18   ;;  %p4043_p0 = scmp.ge.s32.totalorder %s5274_s18, 1  ;;  %s5274_s18 = sphi %s5311_s18, %s16_s18  }
   0x2   : > { %p195_p1 = scmp.lt.s32.totalorder %s5274_s18, 5 }
   0x4   : > { %p196_p2 = pnand %p4043_p0, %p195_p1 }
   0x5   : > { %s4044_s20 = sshll.u32 (!%p196_p2), %s5317_s19, 6  ;;  %s4046_s21 = sshll.u32 (!%p196_p2), %s5317_s19, 10 }
   0x6   : > { %199 = sbr.rel (%p196_p2) target bundleno = 998 (0x3e6), region = 40  ;;  %p224_p3 = scmp.lt.s32.totalorder (!%p196_p2), %s4044_s20, 255 }
   0x7   : > { %p230_p4 = scmp.lt.s32.totalorder (!%p196_p2), %s4046_s21, 4095  ;;  %p4048_p5 = scmp.ne.s32.totalorder (!%p196_p2), %s5317_s19, 0 }
   0xb   : > { %s6461_s20 = smov (!%p224_p3, %s4044_s20), 255  ;;  %s6463_s21 = smov (!%p230_p4, %s4046_s21), 4095 }
   0xc   : > { %s4045_s22 = sshll.u32 %s6461_s20, 1  ;;  %s4047_s26 = sshll.u32 %s6463_s21, 3 }
   0xd   : > { %s5326_s25 = scalar_lea.vmem %s6454_s0, %s4045_s22  ;;  %s5331_s29 = scalar_lea.vmem %s6455_s1, %s4047_s26 }
   0xe   : > { %238 = sbr.rel (%p4048_p5) target bundleno = 21 (0x15), region = 44 }
  0x13   : > { %vm239_vm0 = vcmask 517120   ;;  %v5276_v0 = vmov 0.0  }
  0x14   : > { %240 = vst.msk [vmem:[#allocation2] sm:$0x3] %vm239_vm0, %v5276_v0 }
  0x15 PF: > { %v289_v1 = vld [vmem:[%s5331_s29 + $0xf8] sm:$0xff]  ;;  %v288_v5 = vld [vmem:[%s5331_s29 + $0xf0] sm:$0xff]  ;;  %v287_v9 = vld [vmem:[%s5331_s29 + $0xe8] sm:$0xff]  ;;  %v5277_v31 = vmov 1983009808   ;;  %v1302_v33 = vlaneseq  ;;  %vm3875_vm1 = vcmask 517120  }
  0x16   : > { %v321_v2 = vld [vmem:[%s5331_s29 + $0x1f8] sm:$0xff]  ;;  %4057 = vmatprep.subr.mxu0 %v289_v1  ;;  %v320_v6 = vld [vmem:[%s5331_s29 + $0x1f0] sm:$0xff]  ;;  %v319_v10 = vld [vmem:[%s5331_s29 + $0x1e8] sm:$0xff]  ;;  %v1300_v32 = vunpack.c.l.s4 %v5277_v31  ;;  %p4049_p6 = scmp.ne.s32.totalorder %s5317_s19, 3 }
  0x17   : > { %v273_v3 = vld [vmem:[%s5331_s29 + $0x78] sm:$0xff]  ;;  %4092 = vmatprep.subr.mxu1 %v321_v2  ;;  %v272_v7 = vld [vmem:[%s5331_s29 + $0x70] sm:$0xff]  ;;  %v271_v11 = vld [vmem:[%s5331_s29 + $0x68] sm:$0xff]  ;;  %v1303_v43 = vshrl.u32 %v1302_v33, 7 }
  0x18   : > { %v305_v4 = vld [vmem:[%s5331_s29 + $0x178] sm:$0xff]  ;;  %4058 = vmatpush3.msra.mxu0 %v273_v3  ;;  %v304_v8 = vld [vmem:[%s5331_s29 + $0x170] sm:$0xff]  ;;  %v303_v12 = vld [vmem:[%s5331_s29 + $0x168] sm:$0xff]  ;;  %v1301_v42 = vunpack.c.0.s8 %v1300_v32 }
  0x19   : > { %4093 = vmatpush3.msra.mxu1 %v305_v4  ;;  %4059 = vmatprep.subr.mxu0 %v288_v5  ;;  %v286_v13 = vld [vmem:[%s5331_s29 + $0xe0] sm:$0xff]  ;;  %v285_v17 = vld [vmem:[%s5331_s29 + $0xd8] sm:$0xff]  ;;  %v284_v21 = vld [vmem:[%s5331_s29 + $0xd0] sm:$0xff] }
  0x1a   : > { %4094 = vmatprep.subr.mxu1 %v320_v6  ;;  %4060 = vmatpush3.msra.mxu0 %v272_v7  ;;  %v318_v14 = vld [vmem:[%s5331_s29 + $0x1e0] sm:$0xff]  ;;  %v317_v18 = vld [vmem:[%s5331_s29 + $0x1d8] sm:$0xff]  ;;  %v316_v22 = vld [vmem:[%s5331_s29 + $0x1d0] sm:$0xff]  ;;  %v5380_v52 = vsub.s32 %v1301_v42, %v1303_v43 }
  0x1b   : > { %4095 = vmatpush3.msra.mxu1 %v304_v8  ;;  %4061 = vmatprep.subr.mxu0 %v287_v9  ;;  %v270_v15 = vld [vmem:[%s5331_s29 + $0x60] sm:$0xff]  ;;  %v269_v19 = vld [vmem:[%s5331_s29 + $0x58] sm:$0xff]  ;;  %v268_v23 = vld [vmem:[%s5331_s29 + $0x50] sm:$0xff] }
  0x1c   : > { %4096 = vmatprep.subr.mxu1 %v319_v10  ;;  %v302_v16 = vld [vmem:[%s5331_s29 + $0x160] sm:$0xff]  ;;  %4062 = vmatpush3.msra.mxu0 %v271_v11  ;;  %v301_v20 = vld [vmem:[%s5331_s29 + $0x158] sm:$0xff]  ;;  %v300_v24 = vld [vmem:[%s5331_s29 + $0x150] sm:$0xff] }
  0x1d   : > { %4097 = vmatpush3.msra.mxu1 %v303_v12  ;;  %4063 = vmatprep.subr.mxu0 %v286_v13  ;;  %v283_v25 = vld [vmem:[%s5331_s29 + $0xc8] sm:$0xff]  ;;  %v282_v29 = vld [vmem:[%s5331_s29 + $0xc0] sm:$0xff]  ;;  %v281_v36 = vld [vmem:[%s5331_s29 + $0xb8] sm:$0xff] }
  0x1e   : > { %4098 = vmatprep.subr.mxu1 %v318_v14  ;;  %4064 = vmatpush3.msra.mxu0 %v270_v15  ;;  %v315_v26 = vld [vmem:[%s5331_s29 + $0x1c8] sm:$0xff]  ;;  %v314_v30 = vld [vmem:[%s5331_s29 + $0x1c0] sm:$0xff]  ;;  %v313_v37 = vld [vmem:[%s5331_s29 + $0x1b8] sm:$0xff] }
  0x1f   : > { %4099 = vmatpush3.msra.mxu1 %v302_v16  ;;  %4065 = vmatprep.subr.mxu0 %v285_v17  ;;  %v267_v27 = vld [vmem:[%s5331_s29 + $0x48] sm:$0xff]  ;;  %v266_v34 = vld [vmem:[%s5331_s29 + $0x40] sm:$0xff]  ;;  %v265_v38 = vld [vmem:[%s5331_s29 + $0x38] sm:$0xff] }
  0x20   : > { %4100 = vmatprep.subr.mxu1 %v317_v18  ;;  %4066 = vmatpush3.msra.mxu0 %v269_v19  ;;  %v299_v28 = vld [vmem:[%s5331_s29 + $0x148] sm:$0xff]  ;;  %v298_v35 = vld [vmem:[%s5331_s29 + $0x140] sm:$0xff]  ;;  %v297_v39 = vld [vmem:[%s5331_s29 + $0x138] sm:$0xff] }
  0x21   : > { %4101 = vmatpush3.msra.mxu1 %v301_v20  ;;  %4067 = vmatprep.subr.mxu0 %v284_v21  ;;  %v280_v40 = vld [vmem:[%s5331_s29 + $0xb0] sm:$0xff]  ;;  %v279_v46 = vld [vmem:[%s5331_s29 + $0xa8] sm:$0xff]  ;;  %v278_v50 = vld [vmem:[%s5331_s29 + $0xa0] sm:$0xff] }
  0x22   : > { %4102 = vmatprep.subr.mxu1 %v316_v22  ;;  %4068 = vmatpush3.msra.mxu0 %v268_v23  ;;  %v312_v41 = vld [vmem:[%s5331_s29 + $0x1b0] sm:$0xff]  ;;  %v311_v47 = vld [vmem:[%s5331_s29 + $0x1a8] sm:$0xff]  ;;  %v310_v51 = vld [vmem:[%s5331_s29 + $0x1a0] sm:$0xff] }
  0x23   : > { %4103 = vmatpush3.msra.mxu1 %v300_v24  ;;  %4069 = vmatprep.subr.mxu0 %v283_v25  ;;  %v264_v44 = vld [vmem:[%s5331_s29 + $0x30] sm:$0xff]  ;;  %v263_v48 = vld [vmem:[%s5331_s29 + $0x28] sm:$0xff]  ;;  %v262_v53 = vld [vmem:[%s5331_s29 + $0x20] sm:$0xff] }
  0x24   : > { %4104 = vmatprep.subr.mxu1 %v315_v26  ;;  %4070 = vmatpush3.msra.mxu0 %v267_v27  ;;  %v296_v45 = vld [vmem:[%s5331_s29 + $0x130] sm:$0xff]  ;;  %v295_v49 = vld [vmem:[%s5331_s29 + $0x128] sm:$0xff]  ;;  %v294_v54 = vld [vmem:[%s5331_s29 + $0x120] sm:$0xff] }
  0x25   : > { %4105 = vmatpush3.msra.mxu1 %v299_v28  ;;  %4071 = vmatprep.subr.mxu0 %v282_v29  ;;  %v242_v55 = vld [vmem:[%s5326_s25] sm:$0xff]  ;;  %v277_v56 = vld [vmem:[%s5331_s29 + $0x98] sm:$0xff]  ;;  %v276_v61 = vld [vmem:[%s5331_s29 + $0x90] sm:$0xff] }
  0x26   : > { %4106 = vmatprep.subr.mxu1 %v314_v30  ;;  %4072 = vmatpush3.msra.mxu0 %v266_v34  ;;  %v309_v57 = vld [vmem:[%s5331_s29 + $0x198] sm:$0xff]  ;;  %v1298_v58 = vcombine.high %v242_v55, %v242_v55  ;;  %v308_v62 = vld [vmem:[%s5331_s29 + $0x190] sm:$0xff]  ;;  %v1305_v63 = vrot.slane %v242_v55, %v5380_v52  ;;  %v275_v3 = vld [vmem:[%s5331_s29 + $0x88] sm:$0xff] }
  0x27   : > { %4107 = vmatpush3.msra.mxu1 %v298_v35  ;;  %4073 = vmatprep.subr.mxu0 %v281_v36  ;;  %v261_v59 = vld [vmem:[%s5331_s29 + $0x18] sm:$0xff]  ;;  %v260_v0 = vld [vmem:[%s5331_s29 + $0x10] sm:$0xff]  ;;  %v307_v4 = vld [vmem:[%s5331_s29 + $0x188] sm:$0xff] }
  0x28   : > { %4108 = vmatprep.subr.mxu1 %v313_v37  ;;  %4074 = vmatpush3.msra.mxu0 %v265_v38  ;;  %v293_v60 = vld [vmem:[%s5331_s29 + $0x118] sm:$0xff]  ;;  %v292_v1 = vld [vmem:[%s5331_s29 + $0x110] sm:$0xff]  ;;  %v1312_v2 = vrot.slane %v1298_v58, %v5380_v52  ;;  %v259_v5 = vld [vmem:[%s5331_s29 + $0x8] sm:$0xff]  ;;  %v1313_v9 = vcombine.high %v1305_v63, %v1305_v63 }
  0x29   : > { %4109 = vmatpush3.msra.mxu1 %v297_v39  ;;  %4075 = vmatprep.subr.mxu0 %v280_v40  ;;  %v291_v6 = vld [vmem:[%s5331_s29 + $0x108] sm:$0xff]  ;;  %v274_v7 = vld [vmem:[%s5331_s29 + $0x80] sm:$0xff]  ;;  %v353_v13 = vld [vmem:[%s5331_s29 + $0x2f8] sm:$0xff] }
  0x2a   : > { %4110 = vmatprep.subr.mxu1 %v312_v41  ;;  %4076 = vmatpush3.msra.mxu0 %v264_v44  ;;  %v306_v8 = vld [vmem:[%s5331_s29 + $0x180] sm:$0xff]  ;;  %v1314_v11 = vcombine.high %v1312_v2, %v1312_v2  ;;  %v385_v14 = vld [vmem:[%s5331_s29 + $0x3f8] sm:$0xff]  ;;  %v352_v17 = vld [vmem:[%s5331_s29 + $0x2f0] sm:$0xff] }
  0x2b   : > { %4111 = vmatpush3.msra.mxu1 %v296_v45  ;;  %4077 = vmatprep.subr.mxu0 %v279_v46  ;;  %v258_v10 = vld [vmem:[%s5331_s29] sm:$0xff]  ;;  %v337_v15 = vld [vmem:[%s5331_s29 + $0x278] sm:$0xff]  ;;  %v384_v18 = vld [vmem:[%s5331_s29 + $0x3f0] sm:$0xff] }
  0x2c   : > { %4112 = vmatprep.subr.mxu1 %v311_v47  ;;  %4078 = vmatpush3.msra.mxu0 %v263_v48  ;;  %v290_v12 = vld [vmem:[%s5331_s29 + $0x100] sm:$0xff]  ;;  %v369_v16 = vld [vmem:[%s5331_s29 + $0x378] sm:$0xff]  ;;  %v336_v19 = vld [vmem:[%s5331_s29 + $0x270] sm:$0xff] }
  0x2d   : > { %4113 = vmatpush3.msra.mxu1 %v295_v49  ;;  %4079 = vmatprep.subr.mxu0 %v278_v50  ;;  %v368_v20 = vld [vmem:[%s5331_s29 + $0x370] sm:$0xff]  ;;  %v351_v21 = vld [vmem:[%s5331_s29 + $0x2e8] sm:$0xff]  ;;  %v350_v25 = vld [vmem:[%s5331_s29 + $0x2e0] sm:$0xff] }
  0x2e   : > { %4114 = vmatprep.subr.mxu1 %v310_v51  ;;  %4080 = vmatpush3.msra.mxu0 %v262_v53  ;;  %v383_v22 = vld [vmem:[%s5331_s29 + $0x3e8] sm:$0xff]  ;;  %v382_v26 = vld [vmem:[%s5331_s29 + $0x3e0] sm:$0xff]  ;;  %v349_v29 = vld [vmem:[%s5331_s29 + $0x2d8] sm:$0xff] }
  0x2f   : > { %4115 = vmatpush3.msra.mxu1 %v294_v54  ;;  %4081 = vmatprep.subr.mxu0 %v277_v56  ;;  %v335_v23 = vld [vmem:[%s5331_s29 + $0x268] sm:$0xff]  ;;  %v334_v27 = vld [vmem:[%s5331_s29 + $0x260] sm:$0xff]  ;;  %v381_v30 = vld [vmem:[%s5331_s29 + $0x3d8] sm:$0xff] }
  0x30   : > { %4116 = vmatprep.subr.mxu1 %v309_v57  ;;  %4082 = vmatpush3.msra.mxu0 %v261_v59  ;;  %v367_v24 = vld [vmem:[%s5331_s29 + $0x368] sm:$0xff]  ;;  %v366_v28 = vld [vmem:[%s5331_s29 + $0x360] sm:$0xff]  ;;  %v333_v31 = vld [vmem:[%s5331_s29 + $0x258] sm:$0xff] }
  0x31   : > { %4117 = vmatpush3.msra.mxu1 %v293_v60  ;;  %4083 = vmatprep.subr.mxu0 %v276_v61  ;;  %v365_v32 = vld [vmem:[%s5331_s29 + $0x358] sm:$0xff]  ;;  %v348_v33 = vld [vmem:[%s5331_s29 + $0x2d0] sm:$0xff]  ;;  %v347_v37 = vld [vmem:[%s5331_s29 + $0x2c8] sm:$0xff] }
  0x32   : > { %4118 = vmatprep.subr.mxu1 %v308_v62  ;;  %4084 = vmatpush3.msra.mxu0 %v260_v0  ;;  %v380_v34 = vld [vmem:[%s5331_s29 + $0x3d0] sm:$0xff]  ;;  %v379_v38 = vld [vmem:[%s5331_s29 + $0x3c8] sm:$0xff]  ;;  %v346_v41 = vld [vmem:[%s5331_s29 + $0x2c0] sm:$0xff] }
  0x33   : > { %4119 = vmatpush3.msra.mxu1 %v292_v1  ;;  %4085 = vmatprep.subr.mxu0 %v275_v3  ;;  %v332_v35 = vld [vmem:[%s5331_s29 + $0x250] sm:$0xff]  ;;  %v331_v39 = vld [vmem:[%s5331_s29 + $0x248] sm:$0xff]  ;;  %v378_v42 = vld [vmem:[%s5331_s29 + $0x3c0] sm:$0xff] }
  0x34   : > { %4120 = vmatprep.subr.mxu1 %v307_v4  ;;  %4086 = vmatpush3.msra.mxu0 %v259_v5  ;;  %v364_v36 = vld [vmem:[%s5331_s29 + $0x350] sm:$0xff]  ;;  %v363_v40 = vld [vmem:[%s5331_s29 + $0x348] sm:$0xff]  ;;  %v330_v43 = vld [vmem:[%s5331_s29 + $0x240] sm:$0xff] }
  0x35   : > { %4121 = vmatpush3.msra.mxu1 %v291_v6  ;;  %4087 = vmatprep.subr.mxu0 %v274_v7  ;;  %v362_v44 = vld [vmem:[%s5331_s29 + $0x340] sm:$0xff]  ;;  %v345_v45 = vld [vmem:[%s5331_s29 + $0x2b8] sm:$0xff]  ;;  %v344_v49 = vld [vmem:[%s5331_s29 + $0x2b0] sm:$0xff] }
  0x36   : > { %4122 = vmatprep.subr.mxu1 %v306_v8  ;;  %4088 = vmatpush3.msra.mxu0 %v258_v10  ;;  %v377_v46 = vld [vmem:[%s5331_s29 + $0x3b8] sm:$0xff]  ;;  %v376_v50 = vld [vmem:[%s5331_s29 + $0x3b0] sm:$0xff]  ;;  %v343_v54 = vld [vmem:[%s5331_s29 + $0x2a8] sm:$0xff] }
  0x37   : > { %1698 = vmatprep.mubr.f32.mxu0 %v1313_v9  ;;  %4123 = vmatpush3.msra.mxu1 %v290_v12  ;;  %v329_v47 = vld [vmem:[%s5331_s29 + $0x238] sm:$0xff]  ;;  %v328_v51 = vld [vmem:[%s5331_s29 + $0x230] sm:$0xff]  ;;  %v375_v55 = vld [vmem:[%s5331_s29 + $0x3a8] sm:$0xff] }
  0x38   : > { %1768 = vmatprep.mubr.f32.mxu1 %v1314_v11  ;;  %1699 = vmatmul.mubr.f32.vlgmr.msra.gmra.mxu0 %v1305_v63  ;;  %v361_v48 = vld [vmem:[%s5331_s29 + $0x338] sm:$0xff]  ;;  %v360_v53 = vld [vmem:[%s5331_s29 + $0x330] sm:$0xff]  ;;  %v327_v56 = vld [vmem:[%s5331_s29 + $0x228] sm:$0xff] }
  0x39   : > { %1769 = vmatmul.mubr.f32.vlgmr.msra.gmra.mxu1 %v1312_v2  ;;  %4127 = vmatprep.subr.mxu0 %v353_v13  ;;  %v359_v57 = vld [vmem:[%s5331_s29 + $0x328] sm:$0xff]  ;;  %v342_v59 = vld [vmem:[%s5331_s29 + $0x2a0] sm:$0xff]  ;;  %v341_v63 = vld [vmem:[%s5331_s29 + $0x298] sm:$0xff] }
  0x3a   : > { %4162 = vmatprep.subr.mxu1 %v385_v14  ;;  %4128 = vmatpush3.msra.mxu0 %v337_v15  ;;  %v243_v58 = vld [vmem:[%s5326_s25 + $0x8] sm:$0xff]  ;;  %v374_v60 = vld [vmem:[%s5331_s29 + $0x3a0] sm:$0xff]  ;;  %v373_v0 = vld [vmem:[%s5331_s29 + $0x398] sm:$0xff] }
  0x3b   : > { %4163 = vmatpush3.msra.mxu1 %v369_v16  ;;  %4129 = vmatprep.subr.mxu0 %v352_v17  ;;  %v326_v61 = vld [vmem:[%s5331_s29 + $0x220] sm:$0xff]  ;;  %v1315_v1 = vcombine.high %v243_v58, %v243_v58  ;;  %v325_v2 = vld [vmem:[%s5331_s29 + $0x218] sm:$0xff]  ;;  %v340_v4 = vld [vmem:[%s5331_s29 + $0x290] sm:$0xff]  ;;  %v1322_v6 = vrot.slane %v243_v58, %v5380_v52 }
  0x3c   : > { %4164 = vmatprep.subr.mxu1 %v384_v18  ;;  %4130 = vmatpush3.msra.mxu0 %v336_v19  ;;  %v358_v62 = vld [vmem:[%s5331_s29 + $0x320] sm:$0xff]  ;;  %v357_v3 = vld [vmem:[%s5331_s29 + $0x318] sm:$0xff]  ;;  %v372_v5 = vld [vmem:[%s5331_s29 + $0x390] sm:$0xff] }
  0x3d   : > { %4165 = vmatpush3.msra.mxu1 %v368_v20  ;;  %4131 = vmatprep.subr.mxu0 %v351_v21  ;;  %v324_v7 = vld [vmem:[%s5331_s29 + $0x210] sm:$0xff]  ;;  %v339_v9 = vld [vmem:[%s5331_s29 + $0x288] sm:$0xff]  ;;  %v1329_v11 = vrot.slane %v1315_v1, %v5380_v52  ;;  %v338_v14 = vld [vmem:[%s5331_s29 + $0x280] sm:$0xff]  ;;  %v1330_v16 = vcombine.high %v1322_v6, %v1322_v6 }
  0x3e   : > { %4166 = vmatprep.subr.mxu1 %v383_v22  ;;  %4132 = vmatpush3.msra.mxu0 %v335_v23  ;;  %v356_v8 = vld [vmem:[%s5331_s29 + $0x310] sm:$0xff]  ;;  %v371_v10 = vld [vmem:[%s5331_s29 + $0x388] sm:$0xff]  ;;  %v370_v15 = vld [vmem:[%s5331_s29 + $0x380] sm:$0xff] }
  0x3f   : > { %4167 = vmatpush3.msra.mxu1 %v367_v24  ;;  %4133 = vmatprep.subr.mxu0 %v350_v25  ;;  %v323_v12 = vld [vmem:[%s5331_s29 + $0x208] sm:$0xff]  ;;  %v322_v17 = vld [vmem:[%s5331_s29 + $0x200] sm:$0xff]  ;;  %v1331_v19 = vcombine.high %v1329_v11, %v1329_v11  ;;  %v417_v20 = vld [vmem:[%s5331_s29 + $0x4f8] sm:$0xff] }
  0x40   : > { %4168 = vmatprep.subr.mxu1 %v382_v26  ;;  %4134 = vmatpush3.msra.mxu0 %v334_v27  ;;  %v355_v13 = vld [vmem:[%s5331_s29 + $0x308] sm:$0xff]  ;;  %v354_v18 = vld [vmem:[%s5331_s29 + $0x300] sm:$0xff]  ;;  %v449_v21 = vld [vmem:[%s5331_s29 + $0x5f8] sm:$0xff] }
  0x41   : > { %4169 = vmatpush3.msra.mxu1 %v366_v28  ;;  %4135 = vmatprep.subr.mxu0 %v349_v29  ;;  %v401_v22 = vld [vmem:[%s5331_s29 + $0x478] sm:$0xff]  ;;  %v416_v24 = vld [vmem:[%s5331_s29 + $0x4f0] sm:$0xff]  ;;  %v415_v28 = vld [vmem:[%s5331_s29 + $0x4e8] sm:$0xff] }
  0x42   : > { %4170 = vmatprep.subr.mxu1 %v381_v30  ;;  %4136 = vmatpush3.msra.mxu0 %v333_v31  ;;  %v433_v23 = vld [vmem:[%s5331_s29 + $0x578] sm:$0xff]  ;;  %v448_v25 = vld [vmem:[%s5331_s29 + $0x5f0] sm:$0xff]  ;;  %v447_v29 = vld [vmem:[%s5331_s29 + $0x5e8] sm:$0xff] }
  0x43   : > { %4171 = vmatpush3.msra.mxu1 %v365_v32  ;;  %4137 = vmatprep.subr.mxu0 %v348_v33  ;;  %v400_v26 = vld [vmem:[%s5331_s29 + $0x470] sm:$0xff]  ;;  %v399_v30 = vld [vmem:[%s5331_s29 + $0x468] sm:$0xff]  ;;  %v414_v32 = vld [vmem:[%s5331_s29 + $0x4e0] sm:$0xff] }
  0x44   : > { %4172 = vmatprep.subr.mxu1 %v380_v34  ;;  %4138 = vmatpush3.msra.mxu0 %v332_v35  ;;  %v432_v27 = vld [vmem:[%s5331_s29 + $0x570] sm:$0xff]  ;;  %v431_v31 = vld [vmem:[%s5331_s29 + $0x568] sm:$0xff]  ;;  %v446_v33 = vld [vmem:[%s5331_s29 + $0x5e0] sm:$0xff] }
  0x45   : > { %4173 = vmatpush3.msra.mxu1 %v364_v36  ;;  %4139 = vmatprep.subr.mxu0 %v347_v37  ;;  %v398_v34 = vld [vmem:[%s5331_s29 + $0x460] sm:$0xff]  ;;  %v413_v36 = vld [vmem:[%s5331_s29 + $0x4d8] sm:$0xff]  ;;  %v440_v58 = vld [vmem:[%s5331_s29 + $0x5b0] sm:$0xff] }
  0x46   : > { %4174 = vmatprep.subr.mxu1 %v379_v38  ;;  %4140 = vmatpush3.msra.mxu0 %v331_v39  ;;  %v430_v35 = vld [vmem:[%s5331_s29 + $0x560] sm:$0xff]  ;;  %v445_v37 = vld [vmem:[%s5331_s29 + $0x5d8] sm:$0xff]  ;;  %v244_v1 = vld [vmem:[%s5326_s25 + $0x10] sm:$0xff] }
  0x47   : > { %4175 = vmatpush3.msra.mxu1 %v363_v40  ;;  %4141 = vmatprep.subr.mxu0 %v346_v41  ;;  %v397_v38 = vld [vmem:[%s5331_s29 + $0x458] sm:$0xff]  ;;  %v412_v40 = vld [vmem:[%s5331_s29 + $0x4d0] sm:$0xff] }
  0x48   : > { %4176 = vmatprep.subr.mxu1 %v378_v42  ;;  %4142 = vmatpush3.msra.mxu0 %v330_v43  ;;  %v429_v39 = vld [vmem:[%s5331_s29 + $0x558] sm:$0xff]  ;;  %v444_v41 = vld [vmem:[%s5331_s29 + $0x5d0] sm:$0xff] }
  0x49   : > { %4177 = vmatpush3.msra.mxu1 %v362_v44  ;;  %4143 = vmatprep.subr.mxu0 %v345_v45  ;;  %v396_v42 = vld [vmem:[%s5331_s29 + $0x450] sm:$0xff]  ;;  %v411_v44 = vld [vmem:[%s5331_s29 + $0x4c8] sm:$0xff] }
  0x4a   : > { %4178 = vmatprep.subr.mxu1 %v377_v46  ;;  %4144 = vmatpush3.msra.mxu0 %v329_v47  ;;  %v428_v43 = vld [vmem:[%s5331_s29 + $0x550] sm:$0xff]  ;;  %v443_v45 = vld [vmem:[%s5331_s29 + $0x5c8] sm:$0xff] }
  0x4b   : > { %4179 = vmatpush3.msra.mxu1 %v361_v48  ;;  %4145 = vmatprep.subr.mxu0 %v344_v49  ;;  %v395_v46 = vld [vmem:[%s5331_s29 + $0x448] sm:$0xff]  ;;  %v410_v48 = vld [vmem:[%s5331_s29 + $0x4c0] sm:$0xff] }
  0x4c   : > { %4180 = vmatprep.subr.mxu1 %v376_v50  ;;  %4146 = vmatpush3.msra.mxu0 %v328_v51  ;;  %v427_v47 = vld [vmem:[%s5331_s29 + $0x548] sm:$0xff]  ;;  %v442_v49 = vld [vmem:[%s5331_s29 + $0x5c0] sm:$0xff] }
  0x4d   : > { %4181 = vmatpush3.msra.mxu1 %v360_v53  ;;  %4147 = vmatprep.subr.mxu0 %v343_v54  ;;  %v394_v50 = vld [vmem:[%s5331_s29 + $0x440] sm:$0xff]  ;;  %v409_v53 = vld [vmem:[%s5331_s29 + $0x4b8] sm:$0xff] }
  0x4e   : > { %4182 = vmatprep.subr.mxu1 %v375_v55  ;;  %4148 = vmatpush3.msra.mxu0 %v327_v56  ;;  %v426_v51 = vld [vmem:[%s5331_s29 + $0x540] sm:$0xff]  ;;  %v441_v54 = vld [vmem:[%s5331_s29 + $0x5b8] sm:$0xff] }
  0x4f   : > { %4183 = vmatpush3.msra.mxu1 %v359_v57  ;;  %4149 = vmatprep.subr.mxu0 %v342_v59  ;;  %v393_v55 = vld [vmem:[%s5331_s29 + $0x438] sm:$0xff]  ;;  %v408_v57 = vld [vmem:[%s5331_s29 + $0x4b0] sm:$0xff] }
  0x50   : > { %4184 = vmatprep.subr.mxu1 %v374_v60  ;;  %4150 = vmatpush3.msra.mxu0 %v326_v61  ;;  %v425_v56 = vld [vmem:[%s5331_s29 + $0x538] sm:$0xff]  ;;  %v392_v59 = vld [vmem:[%s5331_s29 + $0x430] sm:$0xff]  ;;  %v407_v61 = vld [vmem:[%s5331_s29 + $0x4a8] sm:$0xff] }
  0x51   : > { %4185 = vmatpush3.msra.mxu1 %v358_v62  ;;  %4151 = vmatprep.subr.mxu0 %v341_v63  ;;  %v424_v60 = vld [vmem:[%s5331_s29 + $0x530] sm:$0xff]  ;;  %v439_v62 = vld [vmem:[%s5331_s29 + $0x5a8] sm:$0xff] }
  0x52   : > { %4186 = vmatprep.subr.mxu1 %v373_v0  ;;  %4152 = vmatpush3.msra.mxu0 %v325_v2  ;;  %v391_v63 = vld [vmem:[%s5331_s29 + $0x428] sm:$0xff]  ;;  %v406_v2 = vld [vmem:[%s5331_s29 + $0x4a0] sm:$0xff] }
  0x53   : > { %4187 = vmatpush3.msra.mxu1 %v357_v3  ;;  %4153 = vmatprep.subr.mxu0 %v340_v4  ;;  %v423_v0 = vld [vmem:[%s5331_s29 + $0x528] sm:$0xff]  ;;  %v438_v3 = vld [vmem:[%s5331_s29 + $0x5a0] sm:$0xff] }
  0x54   : > { %4188 = vmatprep.subr.mxu1 %v372_v5  ;;  %4154 = vmatpush3.msra.mxu0 %v324_v7  ;;  %v390_v4 = vld [vmem:[%s5331_s29 + $0x420] sm:$0xff]  ;;  %v437_v7 = vld [vmem:[%s5331_s29 + $0x598] sm:$0xff] }
  0x55   : > { %4189 = vmatpush3.msra.mxu1 %v356_v8  ;;  %4155 = vmatprep.subr.mxu0 %v339_v9  ;;  %v422_v5 = vld [vmem:[%s5331_s29 + $0x520] sm:$0xff]  ;;  %v1332_v8 = vcombine.high %v244_v1, %v244_v1  ;;  %v389_v9 = vld [vmem:[%s5331_s29 + $0x418] sm:$0xff] }
  0x56   : > { %4190 = vmatprep.subr.mxu1 %v371_v10  ;;  %4156 = vmatpush3.msra.mxu0 %v323_v12  ;;  %v421_v10 = vld [vmem:[%s5331_s29 + $0x518] sm:$0xff]  ;;  %v436_v12 = vld [vmem:[%s5331_s29 + $0x590] sm:$0xff] }
  0x57   : > { %4191 = vmatpush3.msra.mxu1 %v355_v13  ;;  %4157 = vmatprep.subr.mxu0 %v338_v14  ;;  %v1339_v13 = vrot.slane %v244_v1, %v5380_v52  ;;  %v388_v14 = vld [vmem:[%s5331_s29 + $0x410] sm:$0xff] }
  0x58   : > { %4192 = vmatprep.subr.mxu1 %v370_v15  ;;  %4158 = vmatpush3.msra.mxu0 %v322_v17  ;;  %v420_v15 = vld [vmem:[%s5331_s29 + $0x510] sm:$0xff]  ;;  %v435_v17 = vld [vmem:[%s5331_s29 + $0x588] sm:$0xff] }
  0x59   : > { %1838 = vmatprep.mubr.f32.mxu0 %v1330_v16  ;;  %4193 = vmatpush3.msra.mxu1 %v354_v18  ;;  %v403_v16 = vld [vmem:[%s5331_s29 + $0x488] sm:$0xff]  ;;  %v1346_v18 = vrot.slane %v1332_v8, %v5380_v52  ;;  %v504_v1 = vld [vmem:[%s5331_s29 + $0x7b0] sm:$0xff]  ;;  %v245_v8 = vld [vmem:[%s5326_s25 + $0x18] sm:$0xff] }
  0x5a   : > { %1839 = vmatmul.mubr.f32.vlgmr.msra.gmra.mxu0 %v1322_v6  ;;  %1908 = vmatprep.mubr.f32.mxu1 %v1331_v19  ;;  %v405_v6 = vld [vmem:[%s5331_s29 + $0x498] sm:$0xff]  ;;  %v387_v19 = vld [vmem:[%s5331_s29 + $0x408] sm:$0xff] }
  0x5b   : > { %4197 = vmatprep.subr.mxu0 %v417_v20  ;;  %4232 = vmatprep.subr.mxu1 %v449_v21  ;;  %v419_v20 = vld [vmem:[%s5331_s29 + $0x508] sm:$0xff]  ;;  %v402_v21 = vld [vmem:[%s5331_s29 + $0x480] sm:$0xff] }
  0x5c   : > { %1909 = vmatmul.mubr.f32.vlgmr.msra.gmra.mxu1 %v1329_v11  ;;  %4198 = vmatpush3.msra.mxu0 %v401_v22  ;;  %v404_v11 = vld [vmem:[%s5331_s29 + $0x490] sm:$0xff]  ;;  %v434_v22 = vld [vmem:[%s5331_s29 + $0x580] sm:$0xff] }
  0x5d   : > { %4233 = vmatpush3.msra.mxu1 %v433_v23  ;;  %4199 = vmatprep.subr.mxu0 %v416_v24  ;;  %v1347_v23 = vcombine.high %v1339_v13, %v1339_v13  ;;  %v386_v24 = vld [vmem:[%s5331_s29 + $0x400] sm:$0xff] }
  0x5e   : > { %4234 = vmatprep.subr.mxu1 %v448_v25  ;;  %4200 = vmatpush3.msra.mxu0 %v400_v26  ;;  %v418_v25 = vld [vmem:[%s5331_s29 + $0x500] sm:$0xff]  ;;  %v1348_v26 = vcombine.high %v1346_v18, %v1346_v18 }
  0x5f   : > { %4235 = vmatpush3.msra.mxu1 %v432_v27  ;;  %4201 = vmatprep.subr.mxu0 %v415_v28  ;;  %v481_v27 = vld [vmem:[%s5331_s29 + $0x6f8] sm:$0xff] }
  0x60   : > { %4236 = vmatprep.subr.mxu1 %v447_v29  ;;  %4202 = vmatpush3.msra.mxu0 %v399_v30  ;;  %v513_v28 = vld [vmem:[%s5331_s29 + $0x7f8] sm:$0xff] }
  0x61   : > { %4237 = vmatpush3.msra.mxu1 %v431_v31  ;;  %4203 = vmatprep.subr.mxu0 %v414_v32  ;;  %v465_v29 = vld [vmem:[%s5331_s29 + $0x678] sm:$0xff]  ;;  %v480_v31 = vld [vmem:[%s5331_s29 + $0x6f0] sm:$0xff] }
  0x62   : > { %4238 = vmatprep.subr.mxu1 %v446_v33  ;;  %4204 = vmatpush3.msra.mxu0 %v398_v34  ;;  %v497_v30 = vld [vmem:[%s5331_s29 + $0x778] sm:$0xff]  ;;  %v512_v32 = vld [vmem:[%s5331_s29 + $0x7f0] sm:$0xff] }
  0x63   : > { %4239 = vmatpush3.msra.mxu1 %v430_v35  ;;  %4205 = vmatprep.subr.mxu0 %v413_v36  ;;  %v464_v33 = vld [vmem:[%s5331_s29 + $0x670] sm:$0xff]  ;;  %v479_v35 = vld [vmem:[%s5331_s29 + $0x6e8] sm:$0xff] }
  0x64   : > { %4240 = vmatprep.subr.mxu1 %v445_v37  ;;  %4206 = vmatpush3.msra.mxu0 %v397_v38  ;;  %v496_v34 = vld [vmem:[%s5331_s29 + $0x770] sm:$0xff]  ;;  %v511_v36 = vld [vmem:[%s5331_s29 + $0x7e8] sm:$0xff] }
  0x65   : > { %4241 = vmatpush3.msra.mxu1 %v429_v39  ;;  %4207 = vmatprep.subr.mxu0 %v412_v40  ;;  %v463_v37 = vld [vmem:[%s5331_s29 + $0x668] sm:$0xff]  ;;  %v478_v39 = vld [vmem:[%s5331_s29 + $0x6e0] sm:$0xff] }
  0x66   : > { %4242 = vmatprep.subr.mxu1 %v444_v41  ;;  %4208 = vmatpush3.msra.mxu0 %v396_v42  ;;  %v495_v38 = vld [vmem:[%s5331_s29 + $0x768] sm:$0xff]  ;;  %v510_v40 = vld [vmem:[%s5331_s29 + $0x7e0] sm:$0xff] }
  0x67   : > { %4243 = vmatpush3.msra.mxu1 %v428_v43  ;;  %4209 = vmatprep.subr.mxu0 %v411_v44  ;;  %v462_v41 = vld [vmem:[%s5331_s29 + $0x660] sm:$0xff]  ;;  %v477_v43 = vld [vmem:[%s5331_s29 + $0x6d8] sm:$0xff] }
  0x68   : > { %4244 = vmatprep.subr.mxu1 %v443_v45  ;;  %4210 = vmatpush3.msra.mxu0 %v395_v46  ;;  %v494_v42 = vld [vmem:[%s5331_s29 + $0x760] sm:$0xff]  ;;  %v509_v44 = vld [vmem:[%s5331_s29 + $0x7d8] sm:$0xff] }
  0x69   : > { %4245 = vmatpush3.msra.mxu1 %v427_v47  ;;  %4211 = vmatprep.subr.mxu0 %v410_v48  ;;  %v461_v45 = vld [vmem:[%s5331_s29 + $0x658] sm:$0xff]  ;;  %v476_v47 = vld [vmem:[%s5331_s29 + $0x6d0] sm:$0xff] }
  0x6a   : > { %4246 = vmatprep.subr.mxu1 %v442_v49  ;;  %4212 = vmatpush3.msra.mxu0 %v394_v50  ;;  %v493_v46 = vld [vmem:[%s5331_s29 + $0x758] sm:$0xff]  ;;  %v508_v48 = vld [vmem:[%s5331_s29 + $0x7d0] sm:$0xff] }
  0x6b   : > { %4247 = vmatpush3.msra.mxu1 %v426_v51  ;;  %4213 = vmatprep.subr.mxu0 %v409_v53  ;;  %v460_v49 = vld [vmem:[%s5331_s29 + $0x650] sm:$0xff]  ;;  %v475_v51 = vld [vmem:[%s5331_s29 + $0x6c8] sm:$0xff] }
  0x6c   : > { %4248 = vmatprep.subr.mxu1 %v441_v54  ;;  %4214 = vmatpush3.msra.mxu0 %v393_v55  ;;  %v492_v50 = vld [vmem:[%s5331_s29 + $0x750] sm:$0xff]  ;;  %v507_v53 = vld [vmem:[%s5331_s29 + $0x7c8] sm:$0xff] }
  0x6d   : > { %4249 = vmatpush3.msra.mxu1 %v425_v56  ;;  %4215 = vmatprep.subr.mxu0 %v408_v57  ;;  %v459_v54 = vld [vmem:[%s5331_s29 + $0x648] sm:$0xff]  ;;  %v474_v56 = vld [vmem:[%s5331_s29 + $0x6c0] sm:$0xff] }
  0x6e   : > { %4250 = vmatprep.subr.mxu1 %v440_v58  ;;  %4216 = vmatpush3.msra.mxu0 %v392_v59  ;;  %v491_v55 = vld [vmem:[%s5331_s29 + $0x748] sm:$0xff]  ;;  %v506_v57 = vld [vmem:[%s5331_s29 + $0x7c0] sm:$0xff] }
  0x6f   : > { %4251 = vmatpush3.msra.mxu1 %v424_v60  ;;  %4217 = vmatprep.subr.mxu0 %v407_v61  ;;  %v458_v58 = vld [vmem:[%s5331_s29 + $0x640] sm:$0xff]  ;;  %v473_v60 = vld [vmem:[%s5331_s29 + $0x6b8] sm:$0xff] }
  0x70   : > { %4252 = vmatprep.subr.mxu1 %v439_v62  ;;  %4218 = vmatpush3.msra.mxu0 %v391_v63  ;;  %v490_v59 = vld [vmem:[%s5331_s29 + $0x740] sm:$0xff]  ;;  %v505_v61 = vld [vmem:[%s5331_s29 + $0x7b8] sm:$0xff] }
  0x71   : > { %4253 = vmatpush3.msra.mxu1 %v423_v0  ;;  %4219 = vmatprep.subr.mxu0 %v406_v2  ;;  %v457_v62 = vld [vmem:[%s5331_s29 + $0x638] sm:$0xff]  ;;  %v472_v0 = vld [vmem:[%s5331_s29 + $0x6b0] sm:$0xff] }
  0x72   : > { %4254 = vmatprep.subr.mxu1 %v438_v3  ;;  %4220 = vmatpush3.msra.mxu0 %v390_v4  ;;  %v489_v63 = vld [vmem:[%s5331_s29 + $0x738] sm:$0xff]  ;;  %v456_v2 = vld [vmem:[%s5331_s29 + $0x630] sm:$0xff]  ;;  %v471_v4 = vld [vmem:[%s5331_s29 + $0x6a8] sm:$0xff] }
  0x73   : > { %4255 = vmatpush3.msra.mxu1 %v422_v5  ;;  %4221 = vmatprep.subr.mxu0 %v405_v6  ;;  %v488_v3 = vld [vmem:[%s5331_s29 + $0x730] sm:$0xff]  ;;  %v503_v5 = vld [vmem:[%s5331_s29 + $0x7a8] sm:$0xff] }
  0x74   : > { %4256 = vmatprep.subr.mxu1 %v437_v7  ;;  %4222 = vmatpush3.msra.mxu0 %v389_v9  ;;  %v455_v6 = vld [vmem:[%s5331_s29 + $0x628] sm:$0xff]  ;;  %v470_v9 = vld [vmem:[%s5331_s29 + $0x6a0] sm:$0xff] }
  0x75   : > { %4257 = vmatpush3.msra.mxu1 %v421_v10  ;;  %4223 = vmatprep.subr.mxu0 %v404_v11  ;;  %v487_v7 = vld [vmem:[%s5331_s29 + $0x728] sm:$0xff]  ;;  %v502_v10 = vld [vmem:[%s5331_s29 + $0x7a0] sm:$0xff] }
  0x76   : > { %4258 = vmatprep.subr.mxu1 %v436_v12  ;;  %4224 = vmatpush3.msra.mxu0 %v388_v14  ;;  %v454_v11 = vld [vmem:[%s5331_s29 + $0x620] sm:$0xff]  ;;  %v501_v14 = vld [vmem:[%s5331_s29 + $0x798] sm:$0xff] }
  0x77   : > { %4259 = vmatpush3.msra.mxu1 %v420_v15  ;;  %4225 = vmatprep.subr.mxu0 %v403_v16  ;;  %v486_v12 = vld [vmem:[%s5331_s29 + $0x720] sm:$0xff]  ;;  %v1349_v15 = vcombine.high %v245_v8, %v245_v8  ;;  %v453_v16 = vld [vmem:[%s5331_s29 + $0x618] sm:$0xff] }
  0x78   : > { %4260 = vmatprep.subr.mxu1 %v435_v17  ;;  %4226 = vmatpush3.msra.mxu0 %v387_v19  ;;  %v485_v17 = vld [vmem:[%s5331_s29 + $0x718] sm:$0xff]  ;;  %v500_v19 = vld [vmem:[%s5331_s29 + $0x790] sm:$0xff] }
  0x79   : > { %4261 = vmatpush3.msra.mxu1 %v419_v20  ;;  %4227 = vmatprep.subr.mxu0 %v402_v21  ;;  %v1356_v20 = vrot.slane %v245_v8, %v5380_v52  ;;  %v452_v21 = vld [vmem:[%s5331_s29 + $0x610] sm:$0xff] }
  0x7a   : > { %4262 = vmatprep.subr.mxu1 %v434_v22  ;;  %4228 = vmatpush3.msra.mxu0 %v386_v24  ;;  %v484_v22 = vld [vmem:[%s5331_s29 + $0x710] sm:$0xff]  ;;  %v499_v24 = vld [vmem:[%s5331_s29 + $0x788] sm:$0xff] }
  0x7b   : > { %1978 = vmatprep.mubr.f32.mxu0 %v1347_v23  ;;  %4263 = vmatpush3.msra.mxu1 %v418_v25  ;;  %v467_v23 = vld [vmem:[%s5331_s29 + $0x688] sm:$0xff]  ;;  %v1363_v25 = vrot.slane %v1349_v15, %v5380_v52  ;;  %v568_v8 = vld [vmem:[%s5331_s29 + $0x9b0] sm:$0xff]  ;;  %v246_v15 = vld [vmem:[%s5326_s25 + $0x20] sm:$0xff] }
  0x7c   : > { %1979 = vmatmul.mubr.f32.vlgmr.msra.gmra.mxu0 %v1339_v13  ;;  %2048 = vmatprep.mubr.f32.mxu1 %v1348_v26  ;;  %v469_v13 = vld [vmem:[%s5331_s29 + $0x698] sm:$0xff]  ;;  %v451_v26 = vld [vmem:[%s5331_s29 + $0x608] sm:$0xff] }
  0x7d   : > { %4267 = vmatprep.subr.mxu0 %v481_v27  ;;  %4302 = vmatprep.subr.mxu1 %v513_v28  ;;  %v483_v27 = vld [vmem:[%s5331_s29 + $0x708] sm:$0xff]  ;;  %v466_v28 = vld [vmem:[%s5331_s29 + $0x680] sm:$0xff] }
  0x7e   : > { %2049 = vmatmul.mubr.f32.vlgmr.msra.gmra.mxu1 %v1346_v18  ;;  %4268 = vmatpush3.msra.mxu0 %v465_v29  ;;  %v468_v18 = vld [vmem:[%s5331_s29 + $0x690] sm:$0xff]  ;;  %v498_v29 = vld [vmem:[%s5331_s29 + $0x780] sm:$0xff] }
  0x7f   : > { %4303 = vmatpush3.msra.mxu1 %v497_v30  ;;  %4269 = vmatprep.subr.mxu0 %v480_v31  ;;  %v1364_v30 = vcombine.high %v1356_v20, %v1356_v20  ;;  %v450_v31 = vld [vmem:[%s5331_s29 + $0x600] sm:$0xff] }
  0x80   : > { %4304 = vmatprep.subr.mxu1 %v512_v32  ;;  %4270 = vmatpush3.msra.mxu0 %v464_v33  ;;  %v482_v32 = vld [vmem:[%s5331_s29 + $0x700] sm:$0xff]  ;;  %v1365_v33 = vcombine.high %v1363_v25, %v1363_v25 }
  0x81   : > { %4305 = vmatpush3.msra.mxu1 %v496_v34  ;;  %4271 = vmatprep.subr.mxu0 %v479_v35  ;;  %v545_v34 = vld [vmem:[%s5331_s29 + $0x8f8] sm:$0xff] }
  0x82   : > { %4306 = vmatprep.subr.mxu1 %v511_v36  ;;  %4272 = vmatpush3.msra.mxu0 %v463_v37  ;;  %v577_v35 = vld [vmem:[%s5331_s29 + $0x9f8] sm:$0xff] }
  0x83   : > { %4307 = vmatpush3.msra.mxu1 %v495_v38  ;;  %4273 = vmatprep.subr.mxu0 %v478_v39  ;;  %v529_v36 = vld [vmem:[%s5331_s29 + $0x878] sm:$0xff]  ;;  %v544_v38 = vld [vmem:[%s5331_s29 + $0x8f0] sm:$0xff] }
  0x84   : > { %4308 = vmatprep.subr.mxu1 %v510_v40  ;;  %4274 = vmatpush3.msra.mxu0 %v462_v41  ;;  %v561_v37 = vld [vmem:[%s5331_s29 + $0x978] sm:$0xff]  ;;  %v576_v39 = vld [vmem:[%s5331_s29 + $0x9f0] sm:$0xff] }
  0x85   : > { %4309 = vmatpush3.msra.mxu1 %v494_v42  ;;  %4275 = vmatprep.subr.mxu0 %v477_v43  ;;  %v528_v40 = vld [vmem:[%s5331_s29 + $0x870] sm:$0xff]  ;;  %v543_v42 = vld [vmem:[%s5331_s29 + $0x8e8] sm:$0xff] }
  0x86   : > { %4310 = vmatprep.subr.mxu1 %v509_v44  ;;  %4276 = vmatpush3.msra.mxu0 %v461_v45  ;;  %v560_v41 = vld [vmem:[%s5331_s29 + $0x970] sm:$0xff]  ;;  %v575_v43 = vld [vmem:[%s5331_s29 + $0x9e8] sm:$0xff] }
  0x87   : > { %4311 = vmatpush3.msra.mxu1 %v493_v46  ;;  %4277 = vmatprep.subr.mxu0 %v476_v47  ;;  %v527_v44 = vld [vmem:[%s5331_s29 + $0x868] sm:$0xff]  ;;  %v542_v46 = vld [vmem:[%s5331_s29 + $0x8e0] sm:$0xff] }
  0x88   : > { %4312 = vmatprep.subr.mxu1 %v508_v48  ;;  %4278 = vmatpush3.msra.mxu0 %v460_v49  ;;  %v559_v45 = vld [vmem:[%s5331_s29 + $0x968] sm:$0xff]  ;;  %v574_v47 = vld [vmem:[%s5331_s29 + $0x9e0] sm:$0xff] }
  0x89   : > { %4313 = vmatpush3.msra.mxu1 %v492_v50  ;;  %4279 = vmatprep.subr.mxu0 %v475_v51  ;;  %v526_v48 = vld [vmem:[%s5331_s29 + $0x860] sm:$0xff]  ;;  %v541_v50 = vld [vmem:[%s5331_s29 + $0x8d8] sm:$0xff] }
  0x8a   : > { %4314 = vmatprep.subr.mxu1 %v507_v53  ;;  %4280 = vmatpush3.msra.mxu0 %v459_v54  ;;  %v558_v49 = vld [vmem:[%s5331_s29 + $0x960] sm:$0xff]  ;;  %v573_v51 = vld [vmem:[%s5331_s29 + $0x9d8] sm:$0xff] }
  0x8b   : > { %4315 = vmatpush3.msra.mxu1 %v491_v55  ;;  %4281 = vmatprep.subr.mxu0 %v474_v56  ;;  %v525_v53 = vld [vmem:[%s5331_s29 + $0x858] sm:$0xff]  ;;  %v540_v55 = vld [vmem:[%s5331_s29 + $0x8d0] sm:$0xff] }
  0x8c   : > { %4316 = vmatprep.subr.mxu1 %v506_v57  ;;  %4282 = vmatpush3.msra.mxu0 %v458_v58  ;;  %v557_v54 = vld [vmem:[%s5331_s29 + $0x958] sm:$0xff]  ;;  %v572_v56 = vld [vmem:[%s5331_s29 + $0x9d0] sm:$0xff] }
  0x8d   : > { %4317 = vmatpush3.msra.mxu1 %v490_v59  ;;  %4283 = vmatprep.subr.mxu0 %v473_v60  ;;  %v524_v57 = vld [vmem:[%s5331_s29 + $0x850] sm:$0xff]  ;;  %v539_v59 = vld [vmem:[%s5331_s29 + $0x8c8] sm:$0xff] }
  0x8e   : > { %4318 = vmatprep.subr.mxu1 %v505_v61  ;;  %4284 = vmatpush3.msra.mxu0 %v457_v62  ;;  %v556_v58 = vld [vmem:[%s5331_s29 + $0x950] sm:$0xff]  ;;  %v571_v60 = vld [vmem:[%s5331_s29 + $0x9c8] sm:$0xff] }
  0x8f   : > { %4319 = vmatpush3.msra.mxu1 %v489_v63  ;;  %4285 = vmatprep.subr.mxu0 %v472_v0  ;;  %v523_v61 = vld [vmem:[%s5331_s29 + $0x848] sm:$0xff]  ;;  %v538_v63 = vld [vmem:[%s5331_s29 + $0x8c0] sm:$0xff] }
  0x90   : > { %4320 = vmatprep.subr.mxu1 %v504_v1  ;;  %4286 = vmatpush3.msra.mxu0 %v456_v2  ;;  %v555_v62 = vld [vmem:[%s5331_s29 + $0x948] sm:$0xff]  ;;  %v570_v0 = vld [vmem:[%s5331_s29 + $0x9c0] sm:$0xff] }
  0x91   : > { %4321 = vmatpush3.msra.mxu1 %v488_v3  ;;  %4287 = vmatprep.subr.mxu0 %v471_v4  ;;  %v522_v1 = vld [vmem:[%s5331_s29 + $0x840] sm:$0xff]  ;;  %v537_v3 = vld [vmem:[%s5331_s29 + $0x8b8] sm:$0xff] }
  0x92   : > { %4322 = vmatprep.subr.mxu1 %v503_v5  ;;  %4288 = vmatpush3.msra.mxu0 %v455_v6  ;;  %v554_v2 = vld [vmem:[%s5331_s29 + $0x940] sm:$0xff]  ;;  %v569_v4 = vld [vmem:[%s5331_s29 + $0x9b8] sm:$0xff] }
  0x93   : > { %4323 = vmatpush3.msra.mxu1 %v487_v7  ;;  %4289 = vmatprep.subr.mxu0 %v470_v9  ;;  %v521_v5 = vld [vmem:[%s5331_s29 + $0x838] sm:$0xff]  ;;  %v536_v7 = vld [vmem:[%s5331_s29 + $0x8b0] sm:$0xff] }
  0x94   : > { %4324 = vmatprep.subr.mxu1 %v502_v10  ;;  %4290 = vmatpush3.msra.mxu0 %v454_v11  ;;  %v553_v6 = vld [vmem:[%s5331_s29 + $0x938] sm:$0xff]  ;;  %v520_v9 = vld [vmem:[%s5331_s29 + $0x830] sm:$0xff]  ;;  %v535_v11 = vld [vmem:[%s5331_s29 + $0x8a8] sm:$0xff] }
  0x95   : > { %4325 = vmatpush3.msra.mxu1 %v486_v12  ;;  %4291 = vmatprep.subr.mxu0 %v469_v13  ;;  %v552_v10 = vld [vmem:[%s5331_s29 + $0x930] sm:$0xff]  ;;  %v567_v12 = vld [vmem:[%s5331_s29 + $0x9a8] sm:$0xff] }
  0x96   : > { %4326 = vmatprep.subr.mxu1 %v501_v14  ;;  %4292 = vmatpush3.msra.mxu0 %v453_v16  ;;  %v519_v13 = vld [vmem:[%s5331_s29 + $0x828] sm:$0xff]  ;;  %v534_v16 = vld [vmem:[%s5331_s29 + $0x8a0] sm:$0xff] }
  0x97   : > { %4327 = vmatpush3.msra.mxu1 %v485_v17  ;;  %4293 = vmatprep.subr.mxu0 %v468_v18  ;;  %v551_v14 = vld [vmem:[%s5331_s29 + $0x928] sm:$0xff]  ;;  %v566_v17 = vld [vmem:[%s5331_s29 + $0x9a0] sm:$0xff] }
  0x98   : > { %4328 = vmatprep.subr.mxu1 %v500_v19  ;;  %4294 = vmatpush3.msra.mxu0 %v452_v21  ;;  %v518_v18 = vld [vmem:[%s5331_s29 + $0x820] sm:$0xff]  ;;  %v565_v21 = vld [vmem:[%s5331_s29 + $0x998] sm:$0xff] }
  0x99   : > { %4329 = vmatpush3.msra.mxu1 %v484_v22  ;;  %4295 = vmatprep.subr.mxu0 %v467_v23  ;;  %v550_v19 = vld [vmem:[%s5331_s29 + $0x920] sm:$0xff]  ;;  %v1366_v22 = vcombine.high %v246_v15, %v246_v15  ;;  %v517_v23 = vld [vmem:[%s5331_s29 + $0x818] sm:$0xff] }
  0x9a   : > { %4330 = vmatprep.subr.mxu1 %v499_v24  ;;  %4296 = vmatpush3.msra.mxu0 %v451_v26  ;;  %v549_v24 = vld [vmem:[%s5331_s29 + $0x918] sm:$0xff]  ;;  %v564_v26 = vld [vmem:[%s5331_s29 + $0x990] sm:$0xff] }
  0x9b   : > { %4331 = vmatpush3.msra.mxu1 %v483_v27  ;;  %4297 = vmatprep.subr.mxu0 %v466_v28  ;;  %v1373_v27 = vrot.slane %v246_v15, %v5380_v52  ;;  %v516_v28 = vld [vmem:[%s5331_s29 + $0x810] sm:$0xff] }
  0x9c   : > { %4332 = vmatprep.subr.mxu1 %v498_v29  ;;  %4298 = vmatpush3.msra.mxu0 %v450_v31  ;;  %v548_v29 = vld [vmem:[%s5331_s29 + $0x910] sm:$0xff]  ;;  %v563_v31 = vld [vmem:[%s5331_s29 + $0x988] sm:$0xff] }
  0x9d   : > { %2118 = vmatprep.mubr.f32.mxu0 %v1364_v30  ;;  %4333 = vmatpush3.msra.mxu1 %v482_v32  ;;  %v531_v30 = vld [vmem:[%s5331_s29 + $0x888] sm:$0xff]  ;;  %v1380_v32 = vrot.slane %v1366_v22, %v5380_v52  ;;  %v632_v15 = vld [vmem:[%s5331_s29 + $0xbb0] sm:$0xff] }
  0x9e   : > { %2119 = vmatmul.mubr.f32.vlgmr.msra.gmra.mxu0 %v1356_v20  ;;  %2188 = vmatprep.mubr.f32.mxu1 %v1365_v33  ;;  %v533_v20 = vld [vmem:[%s5331_s29 + $0x898] sm:$0xff]  ;;  %v515_v33 = vld [vmem:[%s5331_s29 + $0x808] sm:$0xff] }
  0x9f   : > { %4337 = vmatprep.subr.mxu0 %v545_v34  ;;  %4372 = vmatprep.subr.mxu1 %v577_v35  ;;  %v547_v34 = vld [vmem:[%s5331_s29 + $0x908] sm:$0xff]  ;;  %v530_v35 = vld [vmem:[%s5331_s29 + $0x880] sm:$0xff] }
  0xa0   : > { %2189 = vmatmul.mubr.f32.vlgmr.msra.gmra.mxu1 %v1363_v25  ;;  %4338 = vmatpush3.msra.mxu0 %v529_v36  ;;  %v532_v25 = vld [vmem:[%s5331_s29 + $0x890] sm:$0xff]  ;;  %v562_v36 = vld [vmem:[%s5331_s29 + $0x980] sm:$0xff]  ;;  %v247_v22 = vld [vmem:[%s5326_s25 + $0x28] sm:$0xff] }
  0xa1   : > { %4373 = vmatpush3.msra.mxu1 %v561_v37  ;;  %4339 = vmatprep.subr.mxu0 %v544_v38  ;;  %v1381_v37 = vcombine.high %v1373_v27, %v1373_v27  ;;  %v514_v38 = vld [vmem:[%s5331_s29 + $0x800] sm:$0xff] }
  0xa2   : > { %4374 = vmatprep.subr.mxu1 %v576_v39  ;;  %4340 = vmatpush3.msra.mxu0 %v528_v40  ;;  %v546_v39 = vld [vmem:[%s5331_s29 + $0x900] sm:$0xff]  ;;  %v1382_v40 = vcombine.high %v1380_v32, %v1380_v32 }
  0xa3   : > { %4375 = vmatpush3.msra.mxu1 %v560_v41  ;;  %4341 = vmatprep.subr.mxu0 %v543_v42  ;;  %v609_v41 = vld [vmem:[%s5331_s29 + $0xaf8] sm:$0xff] }
  0xa4   : > { %4376 = vmatprep.subr.mxu1 %v575_v43  ;;  %4342 = vmatpush3.msra.mxu0 %v527_v44  ;;  %v641_v42 = vld [vmem:[%s5331_s29 + $0xbf8] sm:$0xff] }
  0xa5   : > { %4377 = vmatpush3.msra.mxu1 %v559_v45  ;;  %4343 = vmatprep.subr.mxu0 %v542_v46  ;;  %v593_v43 = vld [vmem:[%s5331_s29 + $0xa78] sm:$0xff]  ;;  %v608_v45 = vld [vmem:[%s5331_s29 + $0xaf0] sm:$0xff] }
  0xa6   : > { %4378 = vmatprep.subr.mxu1 %v574_v47  ;;  %4344 = vmatpush3.msra.mxu0 %v526_v48  ;;  %v625_v44 = vld [vmem:[%s5331_s29 + $0xb78] sm:$0xff]  ;;  %v640_v46 = vld [vmem:[%s5331_s29 + $0xbf0] sm:$0xff] }
  0xa7   : > { %4379 = vmatpush3.msra.mxu1 %v558_v49  ;;  %4345 = vmatprep.subr.mxu0 %v541_v50  ;;  %v592_v47 = vld [vmem:[%s5331_s29 + $0xa70] sm:$0xff]  ;;  %v607_v49 = vld [vmem:[%s5331_s29 + $0xae8] sm:$0xff] }
  0xa8   : > { %4380 = vmatprep.subr.mxu1 %v573_v51  ;;  %4346 = vmatpush3.msra.mxu0 %v525_v53  ;;  %v624_v48 = vld [vmem:[%s5331_s29 + $0xb70] sm:$0xff]  ;;  %v639_v50 = vld [vmem:[%s5331_s29 + $0xbe8] sm:$0xff] }
  0xa9   : > { %4381 = vmatpush3.msra.mxu1 %v557_v54  ;;  %4347 = vmatprep.subr.mxu0 %v540_v55  ;;  %v591_v51 = vld [vmem:[%s5331_s29 + $0xa68] sm:$0xff]  ;;  %v606_v54 = vld [vmem:[%s5331_s29 + $0xae0] sm:$0xff] }
  0xaa   : > { %4382 = vmatprep.subr.mxu1 %v572_v56  ;;  %4348 = vmatpush3.msra.mxu0 %v524_v57  ;;  %v623_v53 = vld [vmem:[%s5331_s29 + $0xb68] sm:$0xff]  ;;  %v638_v55 = vld [vmem:[%s5331_s29 + $0xbe0] sm:$0xff] }
  0xab   : > { %4383 = vmatpush3.msra.mxu1 %v556_v58  ;;  %4349 = vmatprep.subr.mxu0 %v539_v59  ;;  %v590_v56 = vld [vmem:[%s5331_s29 + $0xa60] sm:$0xff]  ;;  %v605_v58 = vld [vmem:[%s5331_s29 + $0xad8] sm:$0xff] }
  0xac   : > { %4384 = vmatprep.subr.mxu1 %v571_v60  ;;  %4350 = vmatpush3.msra.mxu0 %v523_v61  ;;  %v622_v57 = vld [vmem:[%s5331_s29 + $0xb60] sm:$0xff]  ;;  %v637_v59 = vld [vmem:[%s5331_s29 + $0xbd8] sm:$0xff] }
  0xad   : > { %4385 = vmatpush3.msra.mxu1 %v555_v62  ;;  %4351 = vmatprep.subr.mxu0 %v538_v63  ;;  %v589_v60 = vld [vmem:[%s5331_s29 + $0xa58] sm:$0xff]  ;;  %v604_v62 = vld [vmem:[%s5331_s29 + $0xad0] sm:$0xff] }
  0xae   : > { %4386 = vmatprep.subr.mxu1 %v570_v0  ;;  %4352 = vmatpush3.msra.mxu0 %v522_v1  ;;  %v621_v61 = vld [vmem:[%s5331_s29 + $0xb58] sm:$0xff]  ;;  %v636_v63 = vld [vmem:[%s5331_s29 + $0xbd0] sm:$0xff] }
  0xaf   : > { %4387 = vmatpush3.msra.mxu1 %v554_v2  ;;  %4353 = vmatprep.subr.mxu0 %v537_v3  ;;  %v588_v0 = vld [vmem:[%s5331_s29 + $0xa50] sm:$0xff]  ;;  %v603_v2 = vld [vmem:[%s5331_s29 + $0xac8] sm:$0xff] }
  0xb0   : > { %4388 = vmatprep.subr.mxu1 %v569_v4  ;;  %4354 = vmatpush3.msra.mxu0 %v521_v5  ;;  %v620_v1 = vld [vmem:[%s5331_s29 + $0xb50] sm:$0xff]  ;;  %v635_v3 = vld [vmem:[%s5331_s29 + $0xbc8] sm:$0xff] }
  0xb1   : > { %4389 = vmatpush3.msra.mxu1 %v553_v6  ;;  %4355 = vmatprep.subr.mxu0 %v536_v7  ;;  %v587_v4 = vld [vmem:[%s5331_s29 + $0xa48] sm:$0xff]  ;;  %v602_v6 = vld [vmem:[%s5331_s29 + $0xac0] sm:$0xff] }
  0xb2   : > { %4390 = vmatprep.subr.mxu1 %v568_v8  ;;  %4356 = vmatpush3.msra.mxu0 %v520_v9  ;;  %v619_v5 = vld [vmem:[%s5331_s29 + $0xb48] sm:$0xff]  ;;  %v634_v7 = vld [vmem:[%s5331_s29 + $0xbc0] sm:$0xff] }
  0xb3   : > { %4391 = vmatpush3.msra.mxu1 %v552_v10  ;;  %4357 = vmatprep.subr.mxu0 %v535_v11  ;;  %v586_v8 = vld [vmem:[%s5331_s29 + $0xa40] sm:$0xff]  ;;  %v601_v10 = vld [vmem:[%s5331_s29 + $0xab8] sm:$0xff] }
  0xb4   : > { %4392 = vmatprep.subr.mxu1 %v567_v12  ;;  %4358 = vmatpush3.msra.mxu0 %v519_v13  ;;  %v618_v9 = vld [vmem:[%s5331_s29 + $0xb40] sm:$0xff]  ;;  %v633_v11 = vld [vmem:[%s5331_s29 + $0xbb8] sm:$0xff] }
  0xb5   : > { %4393 = vmatpush3.msra.mxu1 %v551_v14  ;;  %4359 = vmatprep.subr.mxu0 %v534_v16  ;;  %v585_v12 = vld [vmem:[%s5331_s29 + $0xa38] sm:$0xff]  ;;  %v600_v14 = vld [vmem:[%s5331_s29 + $0xab0] sm:$0xff] }
  0xb6   : > { %4394 = vmatprep.subr.mxu1 %v566_v17  ;;  %4360 = vmatpush3.msra.mxu0 %v518_v18  ;;  %v617_v13 = vld [vmem:[%s5331_s29 + $0xb38] sm:$0xff]  ;;  %v584_v16 = vld [vmem:[%s5331_s29 + $0xa30] sm:$0xff]  ;;  %v599_v18 = vld [vmem:[%s5331_s29 + $0xaa8] sm:$0xff] }
  0xb7   : > { %4395 = vmatpush3.msra.mxu1 %v550_v19  ;;  %4361 = vmatprep.subr.mxu0 %v533_v20  ;;  %v616_v17 = vld [vmem:[%s5331_s29 + $0xb30] sm:$0xff]  ;;  %v631_v19 = vld [vmem:[%s5331_s29 + $0xba8] sm:$0xff] }
  0xb8   : > { %4396 = vmatprep.subr.mxu1 %v565_v21  ;;  %4362 = vmatpush3.msra.mxu0 %v517_v23  ;;  %v583_v20 = vld [vmem:[%s5331_s29 + $0xa28] sm:$0xff]  ;;  %v598_v23 = vld [vmem:[%s5331_s29 + $0xaa0] sm:$0xff] }
  0xb9   : > { %4397 = vmatpush3.msra.mxu1 %v549_v24  ;;  %4363 = vmatprep.subr.mxu0 %v532_v25  ;;  %v615_v21 = vld [vmem:[%s5331_s29 + $0xb28] sm:$0xff]  ;;  %v630_v24 = vld [vmem:[%s5331_s29 + $0xba0] sm:$0xff] }
  0xba   : > { %4398 = vmatprep.subr.mxu1 %v564_v26  ;;  %4364 = vmatpush3.msra.mxu0 %v516_v28  ;;  %v582_v25 = vld [vmem:[%s5331_s29 + $0xa20] sm:$0xff]  ;;  %v629_v28 = vld [vmem:[%s5331_s29 + $0xb98] sm:$0xff] }
  0xbb   : > { %4399 = vmatpush3.msra.mxu1 %v548_v29  ;;  %4365 = vmatprep.subr.mxu0 %v531_v30  ;;  %v614_v26 = vld [vmem:[%s5331_s29 + $0xb20] sm:$0xff]  ;;  %v1383_v29 = vcombine.high %v247_v22, %v247_v22  ;;  %v581_v30 = vld [vmem:[%s5331_s29 + $0xa18] sm:$0xff] }
  0xbc   : > { %4400 = vmatprep.subr.mxu1 %v563_v31  ;;  %4366 = vmatpush3.msra.mxu0 %v515_v33  ;;  %v613_v31 = vld [vmem:[%s5331_s29 + $0xb18] sm:$0xff]  ;;  %v628_v33 = vld [vmem:[%s5331_s29 + $0xb90] sm:$0xff] }
  0xbd   : > { %4401 = vmatpush3.msra.mxu1 %v547_v34  ;;  %4367 = vmatprep.subr.mxu0 %v530_v35  ;;  %v1390_v34 = vrot.slane %v247_v22, %v5380_v52  ;;  %v580_v35 = vld [vmem:[%s5331_s29 + $0xa10] sm:$0xff] }
  0xbe   : > { %4402 = vmatprep.subr.mxu1 %v562_v36  ;;  %4368 = vmatpush3.msra.mxu0 %v514_v38  ;;  %v612_v36 = vld [vmem:[%s5331_s29 + $0xb10] sm:$0xff]  ;;  %v627_v38 = vld [vmem:[%s5331_s29 + $0xb88] sm:$0xff] }
  0xbf   : > { %2258 = vmatprep.mubr.f32.mxu0 %v1381_v37  ;;  %4403 = vmatpush3.msra.mxu1 %v546_v39  ;;  %v595_v37 = vld [vmem:[%s5331_s29 + $0xa88] sm:$0xff]  ;;  %v1397_v39 = vrot.slane %v1383_v29, %v5380_v52  ;;  %v696_v22 = vld [vmem:[%s5331_s29 + $0xdb0] sm:$0xff] }
  0xc0   : > { %2259 = vmatmul.mubr.f32.vlgmr.msra.gmra.mxu0 %v1373_v27  ;;  %2328 = vmatprep.mubr.f32.mxu1 %v1382_v40  ;;  %v597_v27 = vld [vmem:[%s5331_s29 + $0xa98] sm:$0xff]  ;;  %v579_v40 = vld [vmem:[%s5331_s29 + $0xa08] sm:$0xff]  ;;  %v248_v29 = vld [vmem:[%s5326_s25 + $0x30] sm:$0xff] }
  0xc1   : > { %4407 = vmatprep.subr.mxu0 %v609_v41  ;;  %4442 = vmatprep.subr.mxu1 %v641_v42  ;;  %v611_v41 = vld [vmem:[%s5331_s29 + $0xb08] sm:$0xff]  ;;  %v594_v42 = vld [vmem:[%s5331_s29 + $0xa80] sm:$0xff] }
  0xc2   : > { %2329 = vmatmul.mubr.f32.vlgmr.msra.gmra.mxu1 %v1380_v32  ;;  %4408 = vmatpush3.msra.mxu0 %v593_v43  ;;  %v596_v32 = vld [vmem:[%s5331_s29 + $0xa90] sm:$0xff]  ;;  %v626_v43 = vld [vmem:[%s5331_s29 + $0xb80] sm:$0xff] }
  0xc3   : > { %4443 = vmatpush3.msra.mxu1 %v625_v44  ;;  %4409 = vmatprep.subr.mxu0 %v608_v45  ;;  %v1398_v44 = vcombine.high %v1390_v34, %v1390_v34  ;;  %v578_v45 = vld [vmem:[%s5331_s29 + $0xa00] sm:$0xff] }
  0xc4   : > { %4444 = vmatprep.subr.mxu1 %v640_v46  ;;  %4410 = vmatpush3.msra.mxu0 %v592_v47  ;;  %v610_v46 = vld [vmem:[%s5331_s29 + $0xb00] sm:$0xff]  ;;  %v1399_v47 = vcombine.high %v1397_v39, %v1397_v39 }
  0xc5   : > { %4445 = vmatpush3.msra.mxu1 %v624_v48  ;;  %4411 = vmatprep.subr.mxu0 %v607_v49  ;;  %v673_v48 = vld [vmem:[%s5331_s29 + $0xcf8] sm:$0xff] }
  0xc6   : > { %4446 = vmatprep.subr.mxu1 %v639_v50  ;;  %4412 = vmatpush3.msra.mxu0 %v591_v51  ;;  %v705_v49 = vld [vmem:[%s5331_s29 + $0xdf8] sm:$0xff] }
  0xc7   : > { %4447 = vmatpush3.msra.mxu1 %v623_v53  ;;  %4413 = vmatprep.subr.mxu0 %v606_v54  ;;  %v657_v50 = vld [vmem:[%s5331_s29 + $0xc78] sm:$0xff]  ;;  %v672_v53 = vld [vmem:[%s5331_s29 + $0xcf0] sm:$0xff] }
  0xc8   : > { %4448 = vmatprep.subr.mxu1 %v638_v55  ;;  %4414 = vmatpush3.msra.mxu0 %v590_v56  ;;  %v689_v51 = vld [vmem:[%s5331_s29 + $0xd78] sm:$0xff]  ;;  %v704_v54 = vld [vmem:[%s5331_s29 + $0xdf0] sm:$0xff] }
  0xc9   : > { %4449 = vmatpush3.msra.mxu1 %v622_v57  ;;  %4415 = vmatprep.subr.mxu0 %v605_v58  ;;  %v656_v55 = vld [vmem:[%s5331_s29 + $0xc70] sm:$0xff]  ;;  %v671_v57 = vld [vmem:[%s5331_s29 + $0xce8] sm:$0xff] }
  0xca   : > { %4450 = vmatprep.subr.mxu1 %v637_v59  ;;  %4416 = vmatpush3.msra.mxu0 %v589_v60  ;;  %v688_v56 = vld [vmem:[%s5331_s29 + $0xd70] sm:$0xff]  ;;  %v703_v58 = vld [vmem:[%s5331_s29 + $0xde8] sm:$0xff] }
  0xcb   : > { %4451 = vmatpush3.msra.mxu1 %v621_v61  ;;  %4417 = vmatprep.subr.mxu0 %v604_v62  ;;  %v655_v59 = vld [vmem:[%s5331_s29 + $0xc68] sm:$0xff]  ;;  %v670_v61 = vld [vmem:[%s5331_s29 + $0xce0] sm:$0xff] }
  0xcc   : > { %4452 = vmatprep.subr.mxu1 %v636_v63  ;;  %4418 = vmatpush3.msra.mxu0 %v588_v0  ;;  %v687_v60 = vld [vmem:[%s5331_s29 + $0xd68] sm:$0xff]  ;;  %v702_v62 = vld [vmem:[%s5331_s29 + $0xde0] sm:$0xff] }
  0xcd   : > { %4453 = vmatpush3.msra.mxu1 %v620_v1  ;;  %4419 = vmatprep.subr.mxu0 %v603_v2  ;;  %v654_v63 = vld [vmem:[%s5331_s29 + $0xc60] sm:$0xff]  ;;  %v669_v1 = vld [vmem:[%s5331_s29 + $0xcd8] sm:$0xff] }
  0xce   : > { %4454 = vmatprep.subr.mxu1 %v635_v3  ;;  %4420 = vmatpush3.msra.mxu0 %v587_v4  ;;  %v686_v0 = vld [vmem:[%s5331_s29 + $0xd60] sm:$0xff]  ;;  %v701_v2 = vld [vmem:[%s5331_s29 + $0xdd8] sm:$0xff] }
  0xcf   : > { %4455 = vmatpush3.msra.mxu1 %v619_v5  ;;  %4421 = vmatprep.subr.mxu0 %v602_v6  ;;  %v653_v3 = vld [vmem:[%s5331_s29 + $0xc58] sm:$0xff]  ;;  %v668_v5 = vld [vmem:[%s5331_s29 + $0xcd0] sm:$0xff] }
  0xd0   : > { %4456 = vmatprep.subr.mxu1 %v634_v7  ;;  %4422 = vmatpush3.msra.mxu0 %v586_v8  ;;  %v685_v4 = vld [vmem:[%s5331_s29 + $0xd58] sm:$0xff]  ;;  %v700_v6 = vld [vmem:[%s5331_s29 + $0xdd0] sm:$0xff] }
  0xd1   : > { %4457 = vmatpush3.msra.mxu1 %v618_v9  ;;  %4423 = vmatprep.subr.mxu0 %v601_v10  ;;  %v652_v7 = vld [vmem:[%s5331_s29 + $0xc50] sm:$0xff]  ;;  %v667_v9 = vld [vmem:[%s5331_s29 + $0xcc8] sm:$0xff] }
  0xd2   : > { %4458 = vmatprep.subr.mxu1 %v633_v11  ;;  %4424 = vmatpush3.msra.mxu0 %v585_v12  ;;  %v684_v8 = vld [vmem:[%s5331_s29 + $0xd50] sm:$0xff]  ;;  %v699_v10 = vld [vmem:[%s5331_s29 + $0xdc8] sm:$0xff] }
  0xd3   : > { %4459 = vmatpush3.msra.mxu1 %v617_v13  ;;  %4425 = vmatprep.subr.mxu0 %v600_v14  ;;  %v651_v11 = vld [vmem:[%s5331_s29 + $0xc48] sm:$0xff]  ;;  %v666_v13 = vld [vmem:[%s5331_s29 + $0xcc0] sm:$0xff] }
  0xd4   : > { %4460 = vmatprep.subr.mxu1 %v632_v15  ;;  %4426 = vmatpush3.msra.mxu0 %v584_v16  ;;  %v683_v12 = vld [vmem:[%s5331_s29 + $0xd48] sm:$0xff]  ;;  %v698_v14 = vld [vmem:[%s5331_s29 + $0xdc0] sm:$0xff] }
  0xd5   : > { %4461 = vmatpush3.msra.mxu1 %v616_v17  ;;  %4427 = vmatprep.subr.mxu0 %v599_v18  ;;  %v650_v15 = vld [vmem:[%s5331_s29 + $0xc40] sm:$0xff]  ;;  %v665_v17 = vld [vmem:[%s5331_s29 + $0xcb8] sm:$0xff] }
  0xd6   : > { %4462 = vmatprep.subr.mxu1 %v631_v19  ;;  %4428 = vmatpush3.msra.mxu0 %v583_v20  ;;  %v682_v16 = vld [vmem:[%s5331_s29 + $0xd40] sm:$0xff]  ;;  %v697_v18 = vld [vmem:[%s5331_s29 + $0xdb8] sm:$0xff] }
  0xd7   : > { %4463 = vmatpush3.msra.mxu1 %v615_v21  ;;  %4429 = vmatprep.subr.mxu0 %v598_v23  ;;  %v649_v19 = vld [vmem:[%s5331_s29 + $0xc38] sm:$0xff]  ;;  %v664_v21 = vld [vmem:[%s5331_s29 + $0xcb0] sm:$0xff] }
  0xd8   : > { %4464 = vmatprep.subr.mxu1 %v630_v24  ;;  %4430 = vmatpush3.msra.mxu0 %v582_v25  ;;  %v681_v20 = vld [vmem:[%s5331_s29 + $0xd38] sm:$0xff]  ;;  %v648_v23 = vld [vmem:[%s5331_s29 + $0xc30] sm:$0xff]  ;;  %v663_v25 = vld [vmem:[%s5331_s29 + $0xca8] sm:$0xff] }
  0xd9   : > { %4465 = vmatpush3.msra.mxu1 %v614_v26  ;;  %4431 = vmatprep.subr.mxu0 %v597_v27  ;;  %v680_v24 = vld [vmem:[%s5331_s29 + $0xd30] sm:$0xff]  ;;  %v695_v26 = vld [vmem:[%s5331_s29 + $0xda8] sm:$0xff] }
  0xda   : > { %4466 = vmatprep.subr.mxu1 %v629_v28  ;;  %4432 = vmatpush3.msra.mxu0 %v581_v30  ;;  %v647_v27 = vld [vmem:[%s5331_s29 + $0xc28] sm:$0xff]  ;;  %v662_v30 = vld [vmem:[%s5331_s29 + $0xca0] sm:$0xff] }
  0xdb   : > { %4467 = vmatpush3.msra.mxu1 %v613_v31  ;;  %4433 = vmatprep.subr.mxu0 %v596_v32  ;;  %v679_v28 = vld [vmem:[%s5331_s29 + $0xd28] sm:$0xff]  ;;  %v694_v31 = vld [vmem:[%s5331_s29 + $0xda0] sm:$0xff] }
  0xdc   : > { %4468 = vmatprep.subr.mxu1 %v628_v33  ;;  %4434 = vmatpush3.msra.mxu0 %v580_v35  ;;  %v646_v32 = vld [vmem:[%s5331_s29 + $0xc20] sm:$0xff]  ;;  %v693_v35 = vld [vmem:[%s5331_s29 + $0xd98] sm:$0xff] }
  0xdd   : > { %4469 = vmatpush3.msra.mxu1 %v612_v36  ;;  %4435 = vmatprep.subr.mxu0 %v595_v37  ;;  %v678_v33 = vld [vmem:[%s5331_s29 + $0xd20] sm:$0xff]  ;;  %v1400_v36 = vcombine.high %v248_v29, %v248_v29  ;;  %v645_v37 = vld [vmem:[%s5331_s29 + $0xc18] sm:$0xff] }
  0xde   : > { %4470 = vmatprep.subr.mxu1 %v627_v38  ;;  %4436 = vmatpush3.msra.mxu0 %v579_v40  ;;  %v677_v38 = vld [vmem:[%s5331_s29 + $0xd18] sm:$0xff]  ;;  %v692_v40 = vld [vmem:[%s5331_s29 + $0xd90] sm:$0xff] }
  0xdf   : > { %4471 = vmatpush3.msra.mxu1 %v611_v41  ;;  %4437 = vmatprep.subr.mxu0 %v594_v42  ;;  %v1407_v41 = vrot.slane %v248_v29, %v5380_v52  ;;  %v644_v42 = vld [vmem:[%s5331_s29 + $0xc10] sm:$0xff] }
  0xe0   : > { %4472 = vmatprep.subr.mxu1 %v626_v43  ;;  %4438 = vmatpush3.msra.mxu0 %v578_v45  ;;  %v676_v43 = vld [vmem:[%s5331_s29 + $0xd10] sm:$0xff]  ;;  %v691_v45 = vld [vmem:[%s5331_s29 + $0xd88] sm:$0xff] }
  0xe1   : > { %2398 = vmatprep.mubr.f32.mxu0 %v1398_v44  ;;  %4473 = vmatpush3.msra.mxu1 %v610_v46  ;;  %v659_v44 = vld [vmem:[%s5331_s29 + $0xc88] sm:$0xff]  ;;  %v1414_v46 = vrot.slane %v1400_v36, %v5380_v52  ;;  %v760_v29 = vld [vmem:[%s5331_s29 + $0xfb0] sm:$0xff]  ;;  %v249_v36 = vld [vmem:[%s5326_s25 + $0x38] sm:$0xff] }
  0xe2   : > { %2399 = vmatmul.mubr.f32.vlgmr.msra.gmra.mxu0 %v1390_v34  ;;  %2468 = vmatprep.mubr.f32.mxu1 %v1399_v47  ;;  %v661_v34 = vld [vmem:[%s5331_s29 + $0xc98] sm:$0xff]  ;;  %v643_v47 = vld [vmem:[%s5331_s29 + $0xc08] sm:$0xff] }
  0xe3   : > { %4477 = vmatprep.subr.mxu0 %v673_v48  ;;  %4512 = vmatprep.subr.mxu1 %v705_v49  ;;  %v675_v48 = vld [vmem:[%s5331_s29 + $0xd08] sm:$0xff]  ;;  %v658_v49 = vld [vmem:[%s5331_s29 + $0xc80] sm:$0xff] }
  0xe4   : > { %2469 = vmatmul.mubr.f32.vlgmr.msra.gmra.mxu1 %v1397_v39  ;;  %4478 = vmatpush3.msra.mxu0 %v657_v50  ;;  %v660_v39 = vld [vmem:[%s5331_s29 + $0xc90] sm:$0xff]  ;;  %v690_v50 = vld [vmem:[%s5331_s29 + $0xd80] sm:$0xff] }
  0xe5   : > { %4513 = vmatpush3.msra.mxu1 %v689_v51  ;;  %4479 = vmatprep.subr.mxu0 %v672_v53  ;;  %v1415_v51 = vcombine.high %v1407_v41, %v1407_v41  ;;  %v642_v53 = vld [vmem:[%s5331_s29 + $0xc00] sm:$0xff] }
  0xe6   : > { %4514 = vmatprep.subr.mxu1 %v704_v54  ;;  %4480 = vmatpush3.msra.mxu0 %v656_v55  ;;  %v674_v54 = vld [vmem:[%s5331_s29 + $0xd00] sm:$0xff]  ;;  %v1416_v55 = vcombine.high %v1414_v46, %v1414_v46 }
  0xe7   : > { %4515 = vmatpush3.msra.mxu1 %v688_v56  ;;  %4481 = vmatprep.subr.mxu0 %v671_v57  ;;  %v737_v56 = vld [vmem:[%s5331_s29 + $0xef8] sm:$0xff] }
  0xe8   : > { %4516 = vmatprep.subr.mxu1 %v703_v58  ;;  %4482 = vmatpush3.msra.mxu0 %v655_v59  ;;  %v769_v57 = vld [vmem:[%s5331_s29 + $0xff8] sm:$0xff] }
  0xe9   : > { %4517 = vmatpush3.msra.mxu1 %v687_v60  ;;  %4483 = vmatprep.subr.mxu0 %v670_v61  ;;  %v721_v58 = vld [vmem:[%s5331_s29 + $0xe78] sm:$0xff]  ;;  %v736_v60 = vld [vmem:[%s5331_s29 + $0xef0] sm:$0xff] }
  0xea   : > { %4518 = vmatprep.subr.mxu1 %v702_v62  ;;  %4484 = vmatpush3.msra.mxu0 %v654_v63  ;;  %v753_v59 = vld [vmem:[%s5331_s29 + $0xf78] sm:$0xff]  ;;  %v768_v61 = vld [vmem:[%s5331_s29 + $0xff0] sm:$0xff] }
  0xeb   : > { %4519 = vmatpush3.msra.mxu1 %v686_v0  ;;  %4485 = vmatprep.subr.mxu0 %v669_v1  ;;  %v720_v62 = vld [vmem:[%s5331_s29 + $0xe70] sm:$0xff]  ;;  %v735_v0 = vld [vmem:[%s5331_s29 + $0xee8] sm:$0xff] }
  0xec   : > { %4520 = vmatprep.subr.mxu1 %v701_v2  ;;  %4486 = vmatpush3.msra.mxu0 %v653_v3  ;;  %v752_v63 = vld [vmem:[%s5331_s29 + $0xf70] sm:$0xff]  ;;  %v767_v1 = vld [vmem:[%s5331_s29 + $0xfe8] sm:$0xff] }
  0xed   : > { %4521 = vmatpush3.msra.mxu1 %v685_v4  ;;  %4487 = vmatprep.subr.mxu0 %v668_v5  ;;  %v719_v2 = vld [vmem:[%s5331_s29 + $0xe68] sm:$0xff]  ;;  %v734_v4 = vld [vmem:[%s5331_s29 + $0xee0] sm:$0xff] }
  0xee   : > { %4522 = vmatprep.subr.mxu1 %v700_v6  ;;  %4488 = vmatpush3.msra.mxu0 %v652_v7  ;;  %v751_v3 = vld [vmem:[%s5331_s29 + $0xf68] sm:$0xff]  ;;  %v766_v5 = vld [vmem:[%s5331_s29 + $0xfe0] sm:$0xff] }
  0xef   : > { %4523 = vmatpush3.msra.mxu1 %v684_v8  ;;  %4489 = vmatprep.subr.mxu0 %v667_v9  ;;  %v718_v6 = vld [vmem:[%s5331_s29 + $0xe60] sm:$0xff]  ;;  %v733_v8 = vld [vmem:[%s5331_s29 + $0xed8] sm:$0xff] }
  0xf0   : > { %4524 = vmatprep.subr.mxu1 %v699_v10  ;;  %4490 = vmatpush3.msra.mxu0 %v651_v11  ;;  %v750_v7 = vld [vmem:[%s5331_s29 + $0xf60] sm:$0xff]  ;;  %v765_v9 = vld [vmem:[%s5331_s29 + $0xfd8] sm:$0xff] }
  0xf1   : > { %4525 = vmatpush3.msra.mxu1 %v683_v12  ;;  %4491 = vmatprep.subr.mxu0 %v666_v13  ;;  %v717_v10 = vld [vmem:[%s5331_s29 + $0xe58] sm:$0xff]  ;;  %v732_v12 = vld [vmem:[%s5331_s29 + $0xed0] sm:$0xff] }
  0xf2   : > { %4526 = vmatprep.subr.mxu1 %v698_v14  ;;  %4492 = vmatpush3.msra.mxu0 %v650_v15  ;;  %v749_v11 = vld [vmem:[%s5331_s29 + $0xf58] sm:$0xff]  ;;  %v764_v13 = vld [vmem:[%s5331_s29 + $0xfd0] sm:$0xff] }
  0xf3   : > { %4527 = vmatpush3.msra.mxu1 %v682_v16  ;;  %4493 = vmatprep.subr.mxu0 %v665_v17  ;;  %v716_v14 = vld [vmem:[%s5331_s29 + $0xe50] sm:$0xff]  ;;  %v731_v16 = vld [vmem:[%s5331_s29 + $0xec8] sm:$0xff] }
  0xf4   : > { %4528 = vmatprep.subr.mxu1 %v697_v18  ;;  %4494 = vmatpush3.msra.mxu0 %v649_v19  ;;  %v748_v15 = vld [vmem:[%s5331_s29 + $0xf50] sm:$0xff]  ;;  %v763_v17 = vld [vmem:[%s5331_s29 + $0xfc8] sm:$0xff] }
  0xf5   : > { %4529 = vmatpush3.msra.mxu1 %v681_v20  ;;  %4495 = vmatprep.subr.mxu0 %v664_v21  ;;  %v715_v18 = vld [vmem:[%s5331_s29 + $0xe48] sm:$0xff]  ;;  %v730_v20 = vld [vmem:[%s5331_s29 + $0xec0] sm:$0xff] }
  0xf6   : > { %4530 = vmatprep.subr.mxu1 %v696_v22  ;;  %4496 = vmatpush3.msra.mxu0 %v648_v23  ;;  %v747_v19 = vld [vmem:[%s5331_s29 + $0xf48] sm:$0xff]  ;;  %v762_v21 = vld [vmem:[%s5331_s29 + $0xfc0] sm:$0xff] }
  0xf7   : > { %4531 = vmatpush3.msra.mxu1 %v680_v24  ;;  %4497 = vmatprep.subr.mxu0 %v663_v25  ;;  %v714_v22 = vld [vmem:[%s5331_s29 + $0xe40] sm:$0xff]  ;;  %v729_v24 = vld [vmem:[%s5331_s29 + $0xeb8] sm:$0xff] }
  0xf8   : > { %4532 = vmatprep.subr.mxu1 %v695_v26  ;;  %4498 = vmatpush3.msra.mxu0 %v647_v27  ;;  %v746_v23 = vld [vmem:[%s5331_s29 + $0xf40] sm:$0xff]  ;;  %v761_v25 = vld [vmem:[%s5331_s29 + $0xfb8] sm:$0xff] }
  0xf9   : > { %4533 = vmatpush3.msra.mxu1 %v679_v28  ;;  %4499 = vmatprep.subr.mxu0 %v662_v30  ;;  %v713_v26 = vld [vmem:[%s5331_s29 + $0xe38] sm:$0xff]  ;;  %v728_v28 = vld [vmem:[%s5331_s29 + $0xeb0] sm:$0xff] }
  0xfa   : > { %4534 = vmatprep.subr.mxu1 %v694_v31  ;;  %4500 = vmatpush3.msra.mxu0 %v646_v32  ;;  %v745_v27 = vld [vmem:[%s5331_s29 + $0xf38] sm:$0xff]  ;;  %v712_v30 = vld [vmem:[%s5331_s29 + $0xe30] sm:$0xff]  ;;  %v727_v32 = vld [vmem:[%s5331_s29 + $0xea8] sm:$0xff] }
  0xfb   : > { %4535 = vmatpush3.msra.mxu1 %v678_v33  ;;  %4501 = vmatprep.subr.mxu0 %v661_v34  ;;  %v744_v31 = vld [vmem:[%s5331_s29 + $0xf30] sm:$0xff]  ;;  %v759_v33 = vld [vmem:[%s5331_s29 + $0xfa8] sm:$0xff] }
  0xfc   : > { %4536 = vmatprep.subr.mxu1 %v693_v35  ;;  %4502 = vmatpush3.msra.mxu0 %v645_v37  ;;  %v711_v34 = vld [vmem:[%s5331_s29 + $0xe28] sm:$0xff]  ;;  %v726_v37 = vld [vmem:[%s5331_s29 + $0xea0] sm:$0xff] }
  0xfd   : > { %4537 = vmatpush3.msra.mxu1 %v677_v38  ;;  %4503 = vmatprep.subr.mxu0 %v660_v39  ;;  %v743_v35 = vld [vmem:[%s5331_s29 + $0xf28] sm:$0xff]  ;;  %v758_v38 = vld [vmem:[%s5331_s29 + $0xfa0] sm:$0xff] }
  0xfe   : > { %4538 = vmatprep.subr.mxu1 %v692_v40  ;;  %4504 = vmatpush3.msra.mxu0 %v644_v42  ;;  %v710_v39 = vld [vmem:[%s5331_s29 + $0xe20] sm:$0xff]  ;;  %v757_v42 = vld [vmem:[%s5331_s29 + $0xf98] sm:$0xff] }
  0xff   : > { %4539 = vmatpush3.msra.mxu1 %v676_v43  ;;  %4505 = vmatprep.subr.mxu0 %v659_v44  ;;  %v742_v40 = vld [vmem:[%s5331_s29 + $0xf20] sm:$0xff]  ;;  %v1417_v43 = vcombine.high %v249_v36, %v249_v36  ;;  %v709_v44 = vld [vmem:[%s5331_s29 + $0xe18] sm:$0xff] }
 0x100   : > { %4540 = vmatprep.subr.mxu1 %v691_v45  ;;  %4506 = vmatpush3.msra.mxu0 %v643_v47  ;;  %v741_v45 = vld [vmem:[%s5331_s29 + $0xf18] sm:$0xff]  ;;  %v756_v47 = vld [vmem:[%s5331_s29 + $0xf90] sm:$0xff] }
 0x101   : > { %4541 = vmatpush3.msra.mxu1 %v675_v48  ;;  %4507 = vmatprep.subr.mxu0 %v658_v49  ;;  %v1424_v48 = vrot.slane %v249_v36, %v5380_v52  ;;  %v708_v49 = vld [vmem:[%s5331_s29 + $0xe10] sm:$0xff] }
 0x102   : > { %4542 = vmatprep.subr.mxu1 %v690_v50  ;;  %4508 = vmatpush3.msra.mxu0 %v642_v53  ;;  %v740_v50 = vld [vmem:[%s5331_s29 + $0xf10] sm:$0xff]  ;;  %v755_v53 = vld [vmem:[%s5331_s29 + $0xf88] sm:$0xff] }
 0x103   : > { %2538 = vmatprep.mubr.f32.mxu0 %v1415_v51  ;;  %4543 = vmatpush3.msra.mxu1 %v674_v54  ;;  %v723_v51 = vld [vmem:[%s5331_s29 + $0xe88] sm:$0xff]  ;;  %v1431_v54 = vrot.slane %v1417_v43, %v5380_v52  ;;  %v824_v36 = vld [vmem:[%s5331_s29 + $0x11b0] sm:$0xff]  ;;  %v250_v43 = vld [vmem:[%s5326_s25 + $0x40] sm:$0xff] }
 0x104   : > { %2539 = vmatmul.mubr.f32.vlgmr.msra.gmra.mxu0 %v1407_v41  ;;  %2608 = vmatprep.mubr.f32.mxu1 %v1416_v55  ;;  %v725_v41 = vld [vmem:[%s5331_s29 + $0xe98] sm:$0xff]  ;;  %v707_v55 = vld [vmem:[%s5331_s29 + $0xe08] sm:$0xff] }
 0x105   : > { %4547 = vmatprep.subr.mxu0 %v737_v56  ;;  %4582 = vmatprep.subr.mxu1 %v769_v57  ;;  %v739_v56 = vld [vmem:[%s5331_s29 + $0xf08] sm:$0xff]  ;;  %v722_v57 = vld [vmem:[%s5331_s29 + $0xe80] sm:$0xff] }
 0x106   : > { %2609 = vmatmul.mubr.f32.vlgmr.msra.gmra.mxu1 %v1414_v46  ;;  %4548 = vmatpush3.msra.mxu0 %v721_v58  ;;  %v724_v46 = vld [vmem:[%s5331_s29 + $0xe90] sm:$0xff]  ;;  %v754_v58 = vld [vmem:[%s5331_s29 + $0xf80] sm:$0xff] }
 0x107   : > { %4583 = vmatpush3.msra.mxu1 %v753_v59  ;;  %4549 = vmatprep.subr.mxu0 %v736_v60  ;;  %v1432_v59 = vcombine.high %v1424_v48, %v1424_v48  ;;  %v706_v60 = vld [vmem:[%s5331_s29 + $0xe00] sm:$0xff] }
 0x108   : > { %4584 = vmatprep.subr.mxu1 %v768_v61  ;;  %4550 = vmatpush3.msra.mxu0 %v720_v62  ;;  %v738_v61 = vld [vmem:[%s5331_s29 + $0xf00] sm:$0xff]  ;;  %v1433_v62 = vcombine.high %v1431_v54, %v1431_v54 }
 0x109   : > { %4585 = vmatpush3.msra.mxu1 %v752_v63  ;;  %4551 = vmatprep.subr.mxu0 %v735_v0  ;;  %v801_v63 = vld [vmem:[%s5331_s29 + $0x10f8] sm:$0xff] }
 0x10a   : > { %4586 = vmatprep.subr.mxu1 %v767_v1  ;;  %4552 = vmatpush3.msra.mxu0 %v719_v2  ;;  %v833_v0 = vld [vmem:[%s5331_s29 + $0x11f8] sm:$0xff] }
 0x10b   : > { %4587 = vmatpush3.msra.mxu1 %v751_v3  ;;  %4553 = vmatprep.subr.mxu0 %v734_v4  ;;  %v785_v1 = vld [vmem:[%s5331_s29 + $0x1078] sm:$0xff]  ;;  %v800_v3 = vld [vmem:[%s5331_s29 + $0x10f0] sm:$0xff] }
 0x10c   : > { %4588 = vmatprep.subr.mxu1 %v766_v5  ;;  %4554 = vmatpush3.msra.mxu0 %v718_v6  ;;  %v817_v2 = vld [vmem:[%s5331_s29 + $0x1178] sm:$0xff]  ;;  %v832_v4 = vld [vmem:[%s5331_s29 + $0x11f0] sm:$0xff] }
 0x10d   : > { %4589 = vmatpush3.msra.mxu1 %v750_v7  ;;  %4555 = vmatprep.subr.mxu0 %v733_v8  ;;  %v784_v5 = vld [vmem:[%s5331_s29 + $0x1070] sm:$0xff]  ;;  %v799_v7 = vld [vmem:[%s5331_s29 + $0x10e8] sm:$0xff] }
 0x10e   : > { %4590 = vmatprep.subr.mxu1 %v765_v9  ;;  %4556 = vmatpush3.msra.mxu0 %v717_v10  ;;  %v816_v6 = vld [vmem:[%s5331_s29 + $0x1170] sm:$0xff]  ;;  %v831_v8 = vld [vmem:[%s5331_s29 + $0x11e8] sm:$0xff] }
 0x10f   : > { %4591 = vmatpush3.msra.mxu1 %v749_v11  ;;  %4557 = vmatprep.subr.mxu0 %v732_v12  ;;  %v783_v9 = vld [vmem:[%s5331_s29 + $0x1068] sm:$0xff]  ;;  %v798_v11 = vld [vmem:[%s5331_s29 + $0x10e0] sm:$0xff] }
 0x110   : > { %4592 = vmatprep.subr.mxu1 %v764_v13  ;;  %4558 = vmatpush3.msra.mxu0 %v716_v14  ;;  %v815_v10 = vld [vmem:[%s5331_s29 + $0x1168] sm:$0xff]  ;;  %v830_v12 = vld [vmem:[%s5331_s29 + $0x11e0] sm:$0xff] }
 0x111   : > { %4593 = vmatpush3.msra.mxu1 %v748_v15  ;;  %4559 = vmatprep.subr.mxu0 %v731_v16  ;;  %v782_v13 = vld [vmem:[%s5331_s29 + $0x1060] sm:$0xff]  ;;  %v797_v15 = vld [vmem:[%s5331_s29 + $0x10d8] sm:$0xff] }
 0x112   : > { %4594 = vmatprep.subr.mxu1 %v763_v17  ;;  %4560 = vmatpush3.msra.mxu0 %v715_v18  ;;  %v814_v14 = vld [vmem:[%s5331_s29 + $0x1160] sm:$0xff]  ;;  %v829_v16 = vld [vmem:[%s5331_s29 + $0x11d8] sm:$0xff] }
 0x113   : > { %4595 = vmatpush3.msra.mxu1 %v747_v19  ;;  %4561 = vmatprep.subr.mxu0 %v730_v20  ;;  %v781_v17 = vld [vmem:[%s5331_s29 + $0x1058] sm:$0xff]  ;;  %v796_v19 = vld [vmem:[%s5331_s29 + $0x10d0] sm:$0xff] }
 0x114   : > { %4596 = vmatprep.subr.mxu1 %v762_v21  ;;  %4562 = vmatpush3.msra.mxu0 %v714_v22  ;;  %v813_v18 = vld [vmem:[%s5331_s29 + $0x1158] sm:$0xff]  ;;  %v828_v20 = vld [vmem:[%s5331_s29 + $0x11d0] sm:$0xff] }
 0x115   : > { %4597 = vmatpush3.msra.mxu1 %v746_v23  ;;  %4563 = vmatprep.subr.mxu0 %v729_v24  ;;  %v780_v21 = vld [vmem:[%s5331_s29 + $0x1050] sm:$0xff]  ;;  %v795_v23 = vld [vmem:[%s5331_s29 + $0x10c8] sm:$0xff] }
 0x116   : > { %4598 = vmatprep.subr.mxu1 %v761_v25  ;;  %4564 = vmatpush3.msra.mxu0 %v713_v26  ;;  %v812_v22 = vld [vmem:[%s5331_s29 + $0x1150] sm:$0xff]  ;;  %v827_v24 = vld [vmem:[%s5331_s29 + $0x11c8] sm:$0xff] }
 0x117   : > { %4599 = vmatpush3.msra.mxu1 %v745_v27  ;;  %4565 = vmatprep.subr.mxu0 %v728_v28  ;;  %v779_v25 = vld [vmem:[%s5331_s29 + $0x1048] sm:$0xff]  ;;  %v794_v27 = vld [vmem:[%s5331_s29 + $0x10c0] sm:$0xff] }
 0x118   : > { %4600 = vmatprep.subr.mxu1 %v760_v29  ;;  %4566 = vmatpush3.msra.mxu0 %v712_v30  ;;  %v811_v26 = vld [vmem:[%s5331_s29 + $0x1148] sm:$0xff]  ;;  %v826_v28 = vld [vmem:[%s5331_s29 + $0x11c0] sm:$0xff] }
 0x119   : > { %4601 = vmatpush3.msra.mxu1 %v744_v31  ;;  %4567 = vmatprep.subr.mxu0 %v727_v32  ;;  %v778_v29 = vld [vmem:[%s5331_s29 + $0x1040] sm:$0xff]  ;;  %v793_v31 = vld [vmem:[%s5331_s29 + $0x10b8] sm:$0xff] }
 0x11a   : > { %4602 = vmatprep.subr.mxu1 %v759_v33  ;;  %4568 = vmatpush3.msra.mxu0 %v711_v34  ;;  %v810_v30 = vld [vmem:[%s5331_s29 + $0x1140] sm:$0xff]  ;;  %v825_v32 = vld [vmem:[%s5331_s29 + $0x11b8] sm:$0xff] }
 0x11b   : > { %4603 = vmatpush3.msra.mxu1 %v743_v35  ;;  %4569 = vmatprep.subr.mxu0 %v726_v37  ;;  %v777_v33 = vld [vmem:[%s5331_s29 + $0x1038] sm:$0xff]  ;;  %v792_v35 = vld [vmem:[%s5331_s29 + $0x10b0] sm:$0xff] }
 0x11c   : > { %4604 = vmatprep.subr.mxu1 %v758_v38  ;;  %4570 = vmatpush3.msra.mxu0 %v710_v39  ;;  %v809_v34 = vld [vmem:[%s5331_s29 + $0x1138] sm:$0xff]  ;;  %v776_v37 = vld [vmem:[%s5331_s29 + $0x1030] sm:$0xff]  ;;  %v791_v39 = vld [vmem:[%s5331_s29 + $0x10a8] sm:$0xff] }
 0x11d   : > { %4605 = vmatpush3.msra.mxu1 %v742_v40  ;;  %4571 = vmatprep.subr.mxu0 %v725_v41  ;;  %v808_v38 = vld [vmem:[%s5331_s29 + $0x1130] sm:$0xff]  ;;  %v823_v40 = vld [vmem:[%s5331_s29 + $0x11a8] sm:$0xff] }
 0x11e   : > { %4606 = vmatprep.subr.mxu1 %v757_v42  ;;  %4572 = vmatpush3.msra.mxu0 %v709_v44  ;;  %v775_v41 = vld [vmem:[%s5331_s29 + $0x1028] sm:$0xff]  ;;  %v790_v44 = vld [vmem:[%s5331_s29 + $0x10a0] sm:$0xff] }
 0x11f   : > { %4607 = vmatpush3.msra.mxu1 %v741_v45  ;;  %4573 = vmatprep.subr.mxu0 %v724_v46  ;;  %v807_v42 = vld [vmem:[%s5331_s29 + $0x1128] sm:$0xff]  ;;  %v822_v45 = vld [vmem:[%s5331_s29 + $0x11a0] sm:$0xff] }
 0x120   : > { %4608 = vmatprep.subr.mxu1 %v756_v47  ;;  %4574 = vmatpush3.msra.mxu0 %v708_v49  ;;  %v774_v46 = vld [vmem:[%s5331_s29 + $0x1020] sm:$0xff]  ;;  %v821_v49 = vld [vmem:[%s5331_s29 + $0x1198] sm:$0xff] }
 0x121   : > { %4609 = vmatpush3.msra.mxu1 %v740_v50  ;;  %4575 = vmatprep.subr.mxu0 %v723_v51  ;;  %v806_v47 = vld [vmem:[%s5331_s29 + $0x1120] sm:$0xff]  ;;  %v1434_v50 = vcombine.high %v250_v43, %v250_v43  ;;  %v773_v51 = vld [vmem:[%s5331_s29 + $0x1018] sm:$0xff] }
 0x122   : > { %4610 = vmatprep.subr.mxu1 %v755_v53  ;;  %4576 = vmatpush3.msra.mxu0 %v707_v55  ;;  %v805_v53 = vld [vmem:[%s5331_s29 + $0x1118] sm:$0xff]  ;;  %v820_v55 = vld [vmem:[%s5331_s29 + $0x1190] sm:$0xff] }
 0x123   : > { %4611 = vmatpush3.msra.mxu1 %v739_v56  ;;  %4577 = vmatprep.subr.mxu0 %v722_v57  ;;  %v1441_v56 = vrot.slane %v250_v43, %v5380_v52  ;;  %v772_v57 = vld [vmem:[%s5331_s29 + $0x1010] sm:$0xff] }
 0x124   : > { %4612 = vmatprep.subr.mxu1 %v754_v58  ;;  %4578 = vmatpush3.msra.mxu0 %v706_v60  ;;  %v804_v58 = vld [vmem:[%s5331_s29 + $0x1110] sm:$0xff]  ;;  %v819_v60 = vld [vmem:[%s5331_s29 + $0x1188] sm:$0xff] }
 0x125   : > { %2678 = vmatprep.mubr.f32.mxu0 %v1432_v59  ;;  %4613 = vmatpush3.msra.mxu1 %v738_v61  ;;  %v787_v59 = vld [vmem:[%s5331_s29 + $0x1088] sm:$0xff]  ;;  %v1448_v61 = vrot.slane %v1434_v50, %v5380_v52  ;;  %v888_v43 = vld [vmem:[%s5331_s29 + $0x13b0] sm:$0xff] }
 0x126   : > { %2679 = vmatmul.mubr.f32.vlgmr.msra.gmra.mxu0 %v1424_v48  ;;  %2748 = vmatprep.mubr.f32.mxu1 %v1433_v62  ;;  %v789_v48 = vld [vmem:[%s5331_s29 + $0x1098] sm:$0xff]  ;;  %v771_v62 = vld [vmem:[%s5331_s29 + $0x1008] sm:$0xff] }
 0x127   : > { %4617 = vmatprep.subr.mxu0 %v801_v63  ;;  %4652 = vmatprep.subr.mxu1 %v833_v0  ;;  %v803_v63 = vld [vmem:[%s5331_s29 + $0x1108] sm:$0xff]  ;;  %v786_v0 = vld [vmem:[%s5331_s29 + $0x1080] sm:$0xff] }
 0x128   : > { %2749 = vmatmul.mubr.f32.vlgmr.msra.gmra.mxu1 %v1431_v54  ;;  %4618 = vmatpush3.msra.mxu0 %v785_v1  ;;  %v788_v54 = vld [vmem:[%s5331_s29 + $0x1090] sm:$0xff]  ;;  %v818_v1 = vld [vmem:[%s5331_s29 + $0x1180] sm:$0xff]  ;;  %v251_v50 = vld [vmem:[%s5326_s25 + $0x48] sm:$0xff] }
 0x129   : > { %4653 = vmatpush3.msra.mxu1 %v817_v2  ;;  %4619 = vmatprep.subr.mxu0 %v800_v3  ;;  %v1449_v2 = vcombine.high %v1441_v56, %v1441_v56  ;;  %v770_v3 = vld [vmem:[%s5331_s29 + $0x1000] sm:$0xff] }
 0x12a   : > { %4654 = vmatprep.subr.mxu1 %v832_v4  ;;  %4620 = vmatpush3.msra.mxu0 %v784_v5  ;;  %v802_v4 = vld [vmem:[%s5331_s29 + $0x1100] sm:$0xff]  ;;  %v1450_v5 = vcombine.high %v1448_v61, %v1448_v61 }
 0x12b   : > { %4655 = vmatpush3.msra.mxu1 %v816_v6  ;;  %4621 = vmatprep.subr.mxu0 %v799_v7  ;;  %v865_v6 = vld [vmem:[%s5331_s29 + $0x12f8] sm:$0xff] }
 0x12c   : > { %4656 = vmatprep.subr.mxu1 %v831_v8  ;;  %4622 = vmatpush3.msra.mxu0 %v783_v9  ;;  %v897_v7 = vld [vmem:[%s5331_s29 + $0x13f8] sm:$0xff] }
 0x12d   : > { %4657 = vmatpush3.msra.mxu1 %v815_v10  ;;  %4623 = vmatprep.subr.mxu0 %v798_v11  ;;  %v849_v8 = vld [vmem:[%s5331_s29 + $0x1278] sm:$0xff]  ;;  %v864_v10 = vld [vmem:[%s5331_s29 + $0x12f0] sm:$0xff] }
 0x12e   : > { %4658 = vmatprep.subr.mxu1 %v830_v12  ;;  %4624 = vmatpush3.msra.mxu0 %v782_v13  ;;  %v881_v9 = vld [vmem:[%s5331_s29 + $0x1378] sm:$0xff]  ;;  %v896_v11 = vld [vmem:[%s5331_s29 + $0x13f0] sm:$0xff] }
 0x12f   : > { %4659 = vmatpush3.msra.mxu1 %v814_v14  ;;  %4625 = vmatprep.subr.mxu0 %v797_v15  ;;  %v848_v12 = vld [vmem:[%s5331_s29 + $0x1270] sm:$0xff]  ;;  %v863_v14 = vld [vmem:[%s5331_s29 + $0x12e8] sm:$0xff] }
 0x130   : > { %4660 = vmatprep.subr.mxu1 %v829_v16  ;;  %4626 = vmatpush3.msra.mxu0 %v781_v17  ;;  %v880_v13 = vld [vmem:[%s5331_s29 + $0x1370] sm:$0xff]  ;;  %v895_v15 = vld [vmem:[%s5331_s29 + $0x13e8] sm:$0xff] }
 0x131   : > { %4661 = vmatpush3.msra.mxu1 %v813_v18  ;;  %4627 = vmatprep.subr.mxu0 %v796_v19  ;;  %v847_v16 = vld [vmem:[%s5331_s29 + $0x1268] sm:$0xff]  ;;  %v862_v18 = vld [vmem:[%s5331_s29 + $0x12e0] sm:$0xff] }
 0x132   : > { %4662 = vmatprep.subr.mxu1 %v828_v20  ;;  %4628 = vmatpush3.msra.mxu0 %v780_v21  ;;  %v879_v17 = vld [vmem:[%s5331_s29 + $0x1368] sm:$0xff]  ;;  %v894_v19 = vld [vmem:[%s5331_s29 + $0x13e0] sm:$0xff] }
 0x133   : > { %4663 = vmatpush3.msra.mxu1 %v812_v22  ;;  %4629 = vmatprep.subr.mxu0 %v795_v23  ;;  %v846_v20 = vld [vmem:[%s5331_s29 + $0x1260] sm:$0xff]  ;;  %v861_v22 = vld [vmem:[%s5331_s29 + $0x12d8] sm:$0xff] }
 0x134   : > { %4664 = vmatprep.subr.mxu1 %v827_v24  ;;  %4630 = vmatpush3.msra.mxu0 %v779_v25  ;;  %v878_v21 = vld [vmem:[%s5331_s29 + $0x1360] sm:$0xff]  ;;  %v893_v23 = vld [vmem:[%s5331_s29 + $0x13d8] sm:$0xff] }
 0x135   : > { %4665 = vmatpush3.msra.mxu1 %v811_v26  ;;  %4631 = vmatprep.subr.mxu0 %v794_v27  ;;  %v845_v24 = vld [vmem:[%s5331_s29 + $0x1258] sm:$0xff]  ;;  %v860_v26 = vld [vmem:[%s5331_s29 + $0x12d0] sm:$0xff] }
 0x136   : > { %4666 = vmatprep.subr.mxu1 %v826_v28  ;;  %4632 = vmatpush3.msra.mxu0 %v778_v29  ;;  %v877_v25 = vld [vmem:[%s5331_s29 + $0x1358] sm:$0xff]  ;;  %v892_v27 = vld [vmem:[%s5331_s29 + $0x13d0] sm:$0xff] }
 0x137   : > { %4667 = vmatpush3.msra.mxu1 %v810_v30  ;;  %4633 = vmatprep.subr.mxu0 %v793_v31  ;;  %v844_v28 = vld [vmem:[%s5331_s29 + $0x1250] sm:$0xff]  ;;  %v859_v30 = vld [vmem:[%s5331_s29 + $0x12c8] sm:$0xff] }
 0x138   : > { %4668 = vmatprep.subr.mxu1 %v825_v32  ;;  %4634 = vmatpush3.msra.mxu0 %v777_v33  ;;  %v876_v29 = vld [vmem:[%s5331_s29 + $0x1350] sm:$0xff]  ;;  %v891_v31 = vld [vmem:[%s5331_s29 + $0x13c8] sm:$0xff] }
 0x139   : > { %4669 = vmatpush3.msra.mxu1 %v809_v34  ;;  %4635 = vmatprep.subr.mxu0 %v792_v35  ;;  %v843_v32 = vld [vmem:[%s5331_s29 + $0x1248] sm:$0xff]  ;;  %v858_v34 = vld [vmem:[%s5331_s29 + $0x12c0] sm:$0xff] }
 0x13a   : > { %4670 = vmatprep.subr.mxu1 %v824_v36  ;;  %4636 = vmatpush3.msra.mxu0 %v776_v37  ;;  %v875_v33 = vld [vmem:[%s5331_s29 + $0x1348] sm:$0xff]  ;;  %v890_v35 = vld [vmem:[%s5331_s29 + $0x13c0] sm:$0xff] }
 0x13b   : > { %4671 = vmatpush3.msra.mxu1 %v808_v38  ;;  %4637 = vmatprep.subr.mxu0 %v791_v39  ;;  %v842_v36 = vld [vmem:[%s5331_s29 + $0x1240] sm:$0xff]  ;;  %v857_v38 = vld [vmem:[%s5331_s29 + $0x12b8] sm:$0xff] }
 0x13c   : > { %4672 = vmatprep.subr.mxu1 %v823_v40  ;;  %4638 = vmatpush3.msra.mxu0 %v775_v41  ;;  %v874_v37 = vld [vmem:[%s5331_s29 + $0x1340] sm:$0xff]  ;;  %v889_v39 = vld [vmem:[%s5331_s29 + $0x13b8] sm:$0xff] }
 0x13d   : > { %4673 = vmatpush3.msra.mxu1 %v807_v42  ;;  %4639 = vmatprep.subr.mxu0 %v790_v44  ;;  %v841_v40 = vld [vmem:[%s5331_s29 + $0x1238] sm:$0xff]  ;;  %v856_v42 = vld [vmem:[%s5331_s29 + $0x12b0] sm:$0xff] }
 0x13e   : > { %4674 = vmatprep.subr.mxu1 %v822_v45  ;;  %4640 = vmatpush3.msra.mxu0 %v774_v46  ;;  %v873_v41 = vld [vmem:[%s5331_s29 + $0x1338] sm:$0xff]  ;;  %v840_v44 = vld [vmem:[%s5331_s29 + $0x1230] sm:$0xff]  ;;  %v855_v46 = vld [vmem:[%s5331_s29 + $0x12a8] sm:$0xff] }
 0x13f   : > { %4675 = vmatpush3.msra.mxu1 %v806_v47  ;;  %4641 = vmatprep.subr.mxu0 %v789_v48  ;;  %v872_v45 = vld [vmem:[%s5331_s29 + $0x1330] sm:$0xff]  ;;  %v887_v47 = vld [vmem:[%s5331_s29 + $0x13a8] sm:$0xff] }
 0x140   : > { %4676 = vmatprep.subr.mxu1 %v821_v49  ;;  %4642 = vmatpush3.msra.mxu0 %v773_v51  ;;  %v839_v48 = vld [vmem:[%s5331_s29 + $0x1228] sm:$0xff]  ;;  %v854_v51 = vld [vmem:[%s5331_s29 + $0x12a0] sm:$0xff] }
 0x141   : > { %4677 = vmatpush3.msra.mxu1 %v805_v53  ;;  %4643 = vmatprep.subr.mxu0 %v788_v54  ;;  %v871_v49 = vld [vmem:[%s5331_s29 + $0x1328] sm:$0xff]  ;;  %v886_v53 = vld [vmem:[%s5331_s29 + $0x13a0] sm:$0xff] }
 0x142   : > { %4678 = vmatprep.subr.mxu1 %v820_v55  ;;  %4644 = vmatpush3.msra.mxu0 %v772_v57  ;;  %v838_v54 = vld [vmem:[%s5331_s29 + $0x1220] sm:$0xff]  ;;  %v885_v57 = vld [vmem:[%s5331_s29 + $0x1398] sm:$0xff] }
 0x143   : > { %4679 = vmatpush3.msra.mxu1 %v804_v58  ;;  %4645 = vmatprep.subr.mxu0 %v787_v59  ;;  %v870_v55 = vld [vmem:[%s5331_s29 + $0x1320] sm:$0xff]  ;;  %v1451_v58 = vcombine.high %v251_v50, %v251_v50  ;;  %v837_v59 = vld [vmem:[%s5331_s29 + $0x1218] sm:$0xff] }
 0x144   : > { %4680 = vmatprep.subr.mxu1 %v819_v60  ;;  %4646 = vmatpush3.msra.mxu0 %v771_v62  ;;  %v869_v60 = vld [vmem:[%s5331_s29 + $0x1318] sm:$0xff]  ;;  %v884_v62 = vld [vmem:[%s5331_s29 + $0x1390] sm:$0xff] }
 0x145   : > { %4681 = vmatpush3.msra.mxu1 %v803_v63  ;;  %4647 = vmatprep.subr.mxu0 %v786_v0  ;;  %v1458_v63 = vrot.slane %v251_v50, %v5380_v52  ;;  %v836_v0 = vld [vmem:[%s5331_s29 + $0x1210] sm:$0xff] }
 0x146   : > { %4682 = vmatprep.subr.mxu1 %v818_v1  ;;  %4648 = vmatpush3.msra.mxu0 %v770_v3  ;;  %v868_v1 = vld [vmem:[%s5331_s29 + $0x1310] sm:$0xff]  ;;  %v883_v3 = vld [vmem:[%s5331_s29 + $0x1388] sm:$0xff] }
 0x147   : > { %2818 = vmatprep.mubr.f32.mxu0 %v1449_v2  ;;  %4683 = vmatpush3.msra.mxu1 %v802_v4  ;;  %v851_v2 = vld [vmem:[%s5331_s29 + $0x1288] sm:$0xff]  ;;  %v1465_v4 = vrot.slane %v1451_v58, %v5380_v52  ;;  %v952_v50 = vld [vmem:[%s5331_s29 + $0x15b0] sm:$0xff] }
 0x148   : > { %2819 = vmatmul.mubr.f32.vlgmr.msra.gmra.mxu0 %v1441_v56  ;;  %2888 = vmatprep.mubr.f32.mxu1 %v1450_v5  ;;  %v853_v56 = vld [vmem:[%s5331_s29 + $0x1298] sm:$0xff]  ;;  %v835_v5 = vld [vmem:[%s5331_s29 + $0x1208] sm:$0xff]  ;;  %v252_v58 = vld [vmem:[%s5326_s25 + $0x50] sm:$0xff] }
 0x149   : > { %4687 = vmatprep.subr.mxu0 %v865_v6  ;;  %4722 = vmatprep.subr.mxu1 %v897_v7  ;;  %v867_v6 = vld [vmem:[%s5331_s29 + $0x1308] sm:$0xff]  ;;  %v850_v7 = vld [vmem:[%s5331_s29 + $0x1280] sm:$0xff] }
 0x14a   : > { %2889 = vmatmul.mubr.f32.vlgmr.msra.gmra.mxu1 %v1448_v61  ;;  %4688 = vmatpush3.msra.mxu0 %v849_v8  ;;  %v852_v61 = vld [vmem:[%s5331_s29 + $0x1290] sm:$0xff]  ;;  %v882_v8 = vld [vmem:[%s5331_s29 + $0x1380] sm:$0xff] }
 0x14b   : > { %4723 = vmatpush3.msra.mxu1 %v881_v9  ;;  %4689 = vmatprep.subr.mxu0 %v864_v10  ;;  %v1466_v9 = vcombine.high %v1458_v63, %v1458_v63  ;;  %v834_v10 = vld [vmem:[%s5331_s29 + $0x1200] sm:$0xff] }
 0x14c   : > { %4724 = vmatprep.subr.mxu1 %v896_v11  ;;  %4690 = vmatpush3.msra.mxu0 %v848_v12  ;;  %v866_v11 = vld [vmem:[%s5331_s29 + $0x1300] sm:$0xff]  ;;  %v1467_v12 = vcombine.high %v1465_v4, %v1465_v4 }
 0x14d   : > { %4725 = vmatpush3.msra.mxu1 %v880_v13  ;;  %4691 = vmatprep.subr.mxu0 %v863_v14  ;;  %v929_v13 = vld [vmem:[%s5331_s29 + $0x14f8] sm:$0xff] }
 0x14e   : > { %4726 = vmatprep.subr.mxu1 %v895_v15  ;;  %4692 = vmatpush3.msra.mxu0 %v847_v16  ;;  %v961_v14 = vld [vmem:[%s5331_s29 + $0x15f8] sm:$0xff] }
 0x14f   : > { %4727 = vmatpush3.msra.mxu1 %v879_v17  ;;  %4693 = vmatprep.subr.mxu0 %v862_v18  ;;  %v913_v15 = vld [vmem:[%s5331_s29 + $0x1478] sm:$0xff]  ;;  %v928_v17 = vld [vmem:[%s5331_s29 + $0x14f0] sm:$0xff] }
 0x150   : > { %4728 = vmatprep.subr.mxu1 %v894_v19  ;;  %4694 = vmatpush3.msra.mxu0 %v846_v20  ;;  %v945_v16 = vld [vmem:[%s5331_s29 + $0x1578] sm:$0xff]  ;;  %v960_v18 = vld [vmem:[%s5331_s29 + $0x15f0] sm:$0xff] }
 0x151   : > { %4729 = vmatpush3.msra.mxu1 %v878_v21  ;;  %4695 = vmatprep.subr.mxu0 %v861_v22  ;;  %v912_v19 = vld [vmem:[%s5331_s29 + $0x1470] sm:$0xff]  ;;  %v927_v21 = vld [vmem:[%s5331_s29 + $0x14e8] sm:$0xff] }
 0x152   : > { %4730 = vmatprep.subr.mxu1 %v893_v23  ;;  %4696 = vmatpush3.msra.mxu0 %v845_v24  ;;  %v944_v20 = vld [vmem:[%s5331_s29 + $0x1570] sm:$0xff]  ;;  %v959_v22 = vld [vmem:[%s5331_s29 + $0x15e8] sm:$0xff] }
 0x153   : > { %4731 = vmatpush3.msra.mxu1 %v877_v25  ;;  %4697 = vmatprep.subr.mxu0 %v860_v26  ;;  %v911_v23 = vld [vmem:[%s5331_s29 + $0x1468] sm:$0xff]  ;;  %v926_v25 = vld [vmem:[%s5331_s29 + $0x14e0] sm:$0xff] }
 0x154   : > { %4732 = vmatprep.subr.mxu1 %v892_v27  ;;  %4698 = vmatpush3.msra.mxu0 %v844_v28  ;;  %v943_v24 = vld [vmem:[%s5331_s29 + $0x1568] sm:$0xff]  ;;  %v958_v26 = vld [vmem:[%s5331_s29 + $0x15e0] sm:$0xff] }
 0x155   : > { %4733 = vmatpush3.msra.mxu1 %v876_v29  ;;  %4699 = vmatprep.subr.mxu0 %v859_v30  ;;  %v910_v27 = vld [vmem:[%s5331_s29 + $0x1460] sm:$0xff]  ;;  %v925_v29 = vld [vmem:[%s5331_s29 + $0x14d8] sm:$0xff] }
 0x156   : > { %4734 = vmatprep.subr.mxu1 %v891_v31  ;;  %4700 = vmatpush3.msra.mxu0 %v843_v32  ;;  %v942_v28 = vld [vmem:[%s5331_s29 + $0x1560] sm:$0xff]  ;;  %v957_v30 = vld [vmem:[%s5331_s29 + $0x15d8] sm:$0xff] }
 0x157   : > { %4735 = vmatpush3.msra.mxu1 %v875_v33  ;;  %4701 = vmatprep.subr.mxu0 %v858_v34  ;;  %v909_v31 = vld [vmem:[%s5331_s29 + $0x1458] sm:$0xff]  ;;  %v924_v33 = vld [vmem:[%s5331_s29 + $0x14d0] sm:$0xff] }
 0x158   : > { %4736 = vmatprep.subr.mxu1 %v890_v35  ;;  %4702 = vmatpush3.msra.mxu0 %v842_v36  ;;  %v941_v32 = vld [vmem:[%s5331_s29 + $0x1558] sm:$0xff]  ;;  %v956_v34 = vld [vmem:[%s5331_s29 + $0x15d0] sm:$0xff] }
 0x159   : > { %4737 = vmatpush3.msra.mxu1 %v874_v37  ;;  %4703 = vmatprep.subr.mxu0 %v857_v38  ;;  %v908_v35 = vld [vmem:[%s5331_s29 + $0x1450] sm:$0xff]  ;;  %v923_v37 = vld [vmem:[%s5331_s29 + $0x14c8] sm:$0xff] }
 0x15a   : > { %4738 = vmatprep.subr.mxu1 %v889_v39  ;;  %4704 = vmatpush3.msra.mxu0 %v841_v40  ;;  %v940_v36 = vld [vmem:[%s5331_s29 + $0x1550] sm:$0xff]  ;;  %v955_v38 = vld [vmem:[%s5331_s29 + $0x15c8] sm:$0xff] }
 0x15b   : > { %4739 = vmatpush3.msra.mxu1 %v873_v41  ;;  %4705 = vmatprep.subr.mxu0 %v856_v42  ;;  %v907_v39 = vld [vmem:[%s5331_s29 + $0x1448] sm:$0xff]  ;;  %v922_v41 = vld [vmem:[%s5331_s29 + $0x14c0] sm:$0xff] }
 0x15c   : > { %4740 = vmatprep.subr.mxu1 %v888_v43  ;;  %4706 = vmatpush3.msra.mxu0 %v840_v44  ;;  %v939_v40 = vld [vmem:[%s5331_s29 + $0x1548] sm:$0xff]  ;;  %v954_v42 = vld [vmem:[%s5331_s29 + $0x15c0] sm:$0xff] }
 0x15d   : > { %4741 = vmatpush3.msra.mxu1 %v872_v45  ;;  %4707 = vmatprep.subr.mxu0 %v855_v46  ;;  %v906_v43 = vld [vmem:[%s5331_s29 + $0x1440] sm:$0xff]  ;;  %v921_v45 = vld [vmem:[%s5331_s29 + $0x14b8] sm:$0xff] }
 0x15e   : > { %4742 = vmatprep.subr.mxu1 %v887_v47  ;;  %4708 = vmatpush3.msra.mxu0 %v839_v48  ;;  %v938_v44 = vld [vmem:[%s5331_s29 + $0x1540] sm:$0xff]  ;;  %v953_v46 = vld [vmem:[%s5331_s29 + $0x15b8] sm:$0xff] }
 0x15f   : > { %4743 = vmatpush3.msra.mxu1 %v871_v49  ;;  %4709 = vmatprep.subr.mxu0 %v854_v51  ;;  %v905_v47 = vld [vmem:[%s5331_s29 + $0x1438] sm:$0xff]  ;;  %v920_v49 = vld [vmem:[%s5331_s29 + $0x14b0] sm:$0xff] }
 0x160   : > { %4744 = vmatprep.subr.mxu1 %v886_v53  ;;  %4710 = vmatpush3.msra.mxu0 %v838_v54  ;;  %v937_v48 = vld [vmem:[%s5331_s29 + $0x1538] sm:$0xff]  ;;  %v904_v51 = vld [vmem:[%s5331_s29 + $0x1430] sm:$0xff]  ;;  %v919_v54 = vld [vmem:[%s5331_s29 + $0x14a8] sm:$0xff] }
 0x161   : > { %4745 = vmatpush3.msra.mxu1 %v870_v55  ;;  %4711 = vmatprep.subr.mxu0 %v853_v56  ;;  %v936_v53 = vld [vmem:[%s5331_s29 + $0x1530] sm:$0xff]  ;;  %v951_v55 = vld [vmem:[%s5331_s29 + $0x15a8] sm:$0xff] }
 0x162   : > { %4746 = vmatprep.subr.mxu1 %v885_v57  ;;  %4712 = vmatpush3.msra.mxu0 %v837_v59  ;;  %v903_v56 = vld [vmem:[%s5331_s29 + $0x1428] sm:$0xff]  ;;  %v918_v59 = vld [vmem:[%s5331_s29 + $0x14a0] sm:$0xff] }
 0x163   : > { %4747 = vmatpush3.msra.mxu1 %v869_v60  ;;  %4713 = vmatprep.subr.mxu0 %v852_v61  ;;  %v935_v57 = vld [vmem:[%s5331_s29 + $0x1528] sm:$0xff]  ;;  %v950_v60 = vld [vmem:[%s5331_s29 + $0x15a0] sm:$0xff] }
 0x164   : > { %4748 = vmatprep.subr.mxu1 %v884_v62  ;;  %4714 = vmatpush3.msra.mxu0 %v836_v0  ;;  %v902_v61 = vld [vmem:[%s5331_s29 + $0x1420] sm:$0xff]  ;;  %v949_v0 = vld [vmem:[%s5331_s29 + $0x1598] sm:$0xff] }
 0x165   : > { %4749 = vmatpush3.msra.mxu1 %v868_v1  ;;  %4715 = vmatprep.subr.mxu0 %v851_v2  ;;  %v934_v62 = vld [vmem:[%s5331_s29 + $0x1520] sm:$0xff]  ;;  %v1468_v1 = vcombine.high %v252_v58, %v252_v58  ;;  %v901_v2 = vld [vmem:[%s5331_s29 + $0x1418] sm:$0xff] }
 0x166   : > { %4750 = vmatprep.subr.mxu1 %v883_v3  ;;  %4716 = vmatpush3.msra.mxu0 %v835_v5  ;;  %v933_v3 = vld [vmem:[%s5331_s29 + $0x1518] sm:$0xff]  ;;  %v948_v5 = vld [vmem:[%s5331_s29 + $0x1590] sm:$0xff] }
 0x167   : > { %4751 = vmatpush3.msra.mxu1 %v867_v6  ;;  %4717 = vmatprep.subr.mxu0 %v850_v7  ;;  %v1475_v6 = vrot.slane %v252_v58, %v5380_v52  ;;  %v900_v7 = vld [vmem:[%s5331_s29 + $0x1410] sm:$0xff] }
 0x168   : > { %4752 = vmatprep.subr.mxu1 %v882_v8  ;;  %4718 = vmatpush3.msra.mxu0 %v834_v10  ;;  %v932_v8 = vld [vmem:[%s5331_s29 + $0x1510] sm:$0xff]  ;;  %v947_v10 = vld [vmem:[%s5331_s29 + $0x1588] sm:$0xff] }
 0x169   : > { %2958 = vmatprep.mubr.f32.mxu0 %v1466_v9  ;;  %4753 = vmatpush3.msra.mxu1 %v866_v11  ;;  %v915_v9 = vld [vmem:[%s5331_s29 + $0x1488] sm:$0xff]  ;;  %v1482_v11 = vrot.slane %v1468_v1, %v5380_v52  ;;  %v1016_v58 = vld [vmem:[%s5331_s29 + $0x17b0] sm:$0xff]  ;;  %v253_v1 = vld [vmem:[%s5326_s25 + $0x58] sm:$0xff] }
 0x16a   : > { %2959 = vmatmul.mubr.f32.vlgmr.msra.gmra.mxu0 %v1458_v63  ;;  %3028 = vmatprep.mubr.f32.mxu1 %v1467_v12  ;;  %v917_v63 = vld [vmem:[%s5331_s29 + $0x1498] sm:$0xff]  ;;  %v899_v12 = vld [vmem:[%s5331_s29 + $0x1408] sm:$0xff] }
 0x16b   : > { %4757 = vmatprep.subr.mxu0 %v929_v13  ;;  %4792 = vmatprep.subr.mxu1 %v961_v14  ;;  %v931_v13 = vld [vmem:[%s5331_s29 + $0x1508] sm:$0xff]  ;;  %v914_v14 = vld [vmem:[%s5331_s29 + $0x1480] sm:$0xff] }
 0x16c   : > { %3029 = vmatmul.mubr.f32.vlgmr.msra.gmra.mxu1 %v1465_v4  ;;  %4758 = vmatpush3.msra.mxu0 %v913_v15  ;;  %v916_v4 = vld [vmem:[%s5331_s29 + $0x1490] sm:$0xff]  ;;  %v946_v15 = vld [vmem:[%s5331_s29 + $0x1580] sm:$0xff] }
 0x16d   : > { %4793 = vmatpush3.msra.mxu1 %v945_v16  ;;  %4759 = vmatprep.subr.mxu0 %v928_v17  ;;  %v1483_v16 = vcombine.high %v1475_v6, %v1475_v6  ;;  %v898_v17 = vld [vmem:[%s5331_s29 + $0x1400] sm:$0xff] }
 0x16e   : > { %4794 = vmatprep.subr.mxu1 %v960_v18  ;;  %4760 = vmatpush3.msra.mxu0 %v912_v19  ;;  %v930_v18 = vld [vmem:[%s5331_s29 + $0x1500] sm:$0xff]  ;;  %v1484_v19 = vcombine.high %v1482_v11, %v1482_v11 }
 0x16f   : > { %4795 = vmatpush3.msra.mxu1 %v944_v20  ;;  %4761 = vmatprep.subr.mxu0 %v927_v21  ;;  %v993_v20 = vld [vmem:[%s5331_s29 + $0x16f8] sm:$0xff] }
 0x170   : > { %4796 = vmatprep.subr.mxu1 %v959_v22  ;;  %4762 = vmatpush3.msra.mxu0 %v911_v23  ;;  %v1025_v21 = vld [vmem:[%s5331_s29 + $0x17f8] sm:$0xff] }
 0x171   : > { %4797 = vmatpush3.msra.mxu1 %v943_v24  ;;  %4763 = vmatprep.subr.mxu0 %v926_v25  ;;  %v977_v22 = vld [vmem:[%s5331_s29 + $0x1678] sm:$0xff]  ;;  %v992_v24 = vld [vmem:[%s5331_s29 + $0x16f0] sm:$0xff] }
 0x172   : > { %4798 = vmatprep.subr.mxu1 %v958_v26  ;;  %4764 = vmatpush3.msra.mxu0 %v910_v27  ;;  %v1009_v23 = vld [vmem:[%s5331_s29 + $0x1778] sm:$0xff]  ;;  %v1024_v25 = vld [vmem:[%s5331_s29 + $0x17f0] sm:$0xff] }
 0x173   : > { %4799 = vmatpush3.msra.mxu1 %v942_v28  ;;  %4765 = vmatprep.subr.mxu0 %v925_v29  ;;  %v976_v26 = vld [vmem:[%s5331_s29 + $0x1670] sm:$0xff]  ;;  %v991_v28 = vld [vmem:[%s5331_s29 + $0x16e8] sm:$0xff] }
 0x174   : > { %4800 = vmatprep.subr.mxu1 %v957_v30  ;;  %4766 = vmatpush3.msra.mxu0 %v909_v31  ;;  %v1008_v27 = vld [vmem:[%s5331_s29 + $0x1770] sm:$0xff]  ;;  %v1023_v29 = vld [vmem:[%s5331_s29 + $0x17e8] sm:$0xff] }
 0x175   : > { %4801 = vmatpush3.msra.mxu1 %v941_v32  ;;  %4767 = vmatprep.subr.mxu0 %v924_v33  ;;  %v975_v30 = vld [vmem:[%s5331_s29 + $0x1668] sm:$0xff]  ;;  %v990_v32 = vld [vmem:[%s5331_s29 + $0x16e0] sm:$0xff] }
 0x176   : > { %4802 = vmatprep.subr.mxu1 %v956_v34  ;;  %4768 = vmatpush3.msra.mxu0 %v908_v35  ;;  %v1007_v31 = vld [vmem:[%s5331_s29 + $0x1768] sm:$0xff]  ;;  %v1022_v33 = vld [vmem:[%s5331_s29 + $0x17e0] sm:$0xff] }
 0x177   : > { %4803 = vmatpush3.msra.mxu1 %v940_v36  ;;  %4769 = vmatprep.subr.mxu0 %v923_v37  ;;  %v974_v34 = vld [vmem:[%s5331_s29 + $0x1660] sm:$0xff]  ;;  %v989_v36 = vld [vmem:[%s5331_s29 + $0x16d8] sm:$0xff] }
 0x178   : > { %4804 = vmatprep.subr.mxu1 %v955_v38  ;;  %4770 = vmatpush3.msra.mxu0 %v907_v39  ;;  %v1006_v35 = vld [vmem:[%s5331_s29 + $0x1760] sm:$0xff]  ;;  %v1021_v37 = vld [vmem:[%s5331_s29 + $0x17d8] sm:$0xff] }
 0x179   : > { %4805 = vmatpush3.msra.mxu1 %v939_v40  ;;  %4771 = vmatprep.subr.mxu0 %v922_v41  ;;  %v973_v38 = vld [vmem:[%s5331_s29 + $0x1658] sm:$0xff]  ;;  %v988_v40 = vld [vmem:[%s5331_s29 + $0x16d0] sm:$0xff] }
 0x17a   : > { %4806 = vmatprep.subr.mxu1 %v954_v42  ;;  %4772 = vmatpush3.msra.mxu0 %v906_v43  ;;  %v1005_v39 = vld [vmem:[%s5331_s29 + $0x1758] sm:$0xff]  ;;  %v1020_v41 = vld [vmem:[%s5331_s29 + $0x17d0] sm:$0xff] }
 0x17b   : > { %4807 = vmatpush3.msra.mxu1 %v938_v44  ;;  %4773 = vmatprep.subr.mxu0 %v921_v45  ;;  %v972_v42 = vld [vmem:[%s5331_s29 + $0x1650] sm:$0xff]  ;;  %v987_v44 = vld [vmem:[%s5331_s29 + $0x16c8] sm:$0xff] }
 0x17c   : > { %4808 = vmatprep.subr.mxu1 %v953_v46  ;;  %4774 = vmatpush3.msra.mxu0 %v905_v47  ;;  %v1004_v43 = vld [vmem:[%s5331_s29 + $0x1750] sm:$0xff]  ;;  %v1019_v45 = vld [vmem:[%s5331_s29 + $0x17c8] sm:$0xff] }
 0x17d   : > { %4809 = vmatpush3.msra.mxu1 %v937_v48  ;;  %4775 = vmatprep.subr.mxu0 %v920_v49  ;;  %v971_v46 = vld [vmem:[%s5331_s29 + $0x1648] sm:$0xff]  ;;  %v986_v48 = vld [vmem:[%s5331_s29 + $0x16c0] sm:$0xff] }
 0x17e   : > { %4810 = vmatprep.subr.mxu1 %v952_v50  ;;  %4776 = vmatpush3.msra.mxu0 %v904_v51  ;;  %v1003_v47 = vld [vmem:[%s5331_s29 + $0x1748] sm:$0xff]  ;;  %v1018_v49 = vld [vmem:[%s5331_s29 + $0x17c0] sm:$0xff] }
 0x17f   : > { %4811 = vmatpush3.msra.mxu1 %v936_v53  ;;  %4777 = vmatprep.subr.mxu0 %v919_v54  ;;  %v970_v50 = vld [vmem:[%s5331_s29 + $0x1640] sm:$0xff]  ;;  %v985_v53 = vld [vmem:[%s5331_s29 + $0x16b8] sm:$0xff] }
 0x180   : > { %4812 = vmatprep.subr.mxu1 %v951_v55  ;;  %4778 = vmatpush3.msra.mxu0 %v903_v56  ;;  %v1002_v51 = vld [vmem:[%s5331_s29 + $0x1740] sm:$0xff]  ;;  %v1017_v54 = vld [vmem:[%s5331_s29 + $0x17b8] sm:$0xff] }
 0x181   : > { %4813 = vmatpush3.msra.mxu1 %v935_v57  ;;  %4779 = vmatprep.subr.mxu0 %v918_v59  ;;  %v969_v55 = vld [vmem:[%s5331_s29 + $0x1638] sm:$0xff]  ;;  %v984_v57 = vld [vmem:[%s5331_s29 + $0x16b0] sm:$0xff] }
 0x182   : > { %4814 = vmatprep.subr.mxu1 %v950_v60  ;;  %4780 = vmatpush3.msra.mxu0 %v902_v61  ;;  %v1001_v56 = vld [vmem:[%s5331_s29 + $0x1738] sm:$0xff]  ;;  %v968_v59 = vld [vmem:[%s5331_s29 + $0x1630] sm:$0xff]  ;;  %v983_v61 = vld [vmem:[%s5331_s29 + $0x16a8] sm:$0xff] }
 0x183   : > { %4815 = vmatpush3.msra.mxu1 %v934_v62  ;;  %4781 = vmatprep.subr.mxu0 %v917_v63  ;;  %v1000_v60 = vld [vmem:[%s5331_s29 + $0x1730] sm:$0xff]  ;;  %v1015_v62 = vld [vmem:[%s5331_s29 + $0x17a8] sm:$0xff] }
 0x184   : > { %4816 = vmatprep.subr.mxu1 %v949_v0  ;;  %4782 = vmatpush3.msra.mxu0 %v901_v2  ;;  %v967_v63 = vld [vmem:[%s5331_s29 + $0x1628] sm:$0xff]  ;;  %v982_v2 = vld [vmem:[%s5331_s29 + $0x16a0] sm:$0xff] }
 0x185   : > { %4817 = vmatpush3.msra.mxu1 %v933_v3  ;;  %4783 = vmatprep.subr.mxu0 %v916_v4  ;;  %v999_v0 = vld [vmem:[%s5331_s29 + $0x1728] sm:$0xff]  ;;  %v1014_v3 = vld [vmem:[%s5331_s29 + $0x17a0] sm:$0xff] }
 0x186   : > { %4818 = vmatprep.subr.mxu1 %v948_v5  ;;  %4784 = vmatpush3.msra.mxu0 %v900_v7  ;;  %v966_v4 = vld [vmem:[%s5331_s29 + $0x1620] sm:$0xff]  ;;  %v1013_v7 = vld [vmem:[%s5331_s29 + $0x1798] sm:$0xff] }
 0x187   : > { %4819 = vmatpush3.msra.mxu1 %v932_v8  ;;  %4785 = vmatprep.subr.mxu0 %v915_v9  ;;  %v998_v5 = vld [vmem:[%s5331_s29 + $0x1720] sm:$0xff]  ;;  %v1485_v8 = vcombine.high %v253_v1, %v253_v1  ;;  %v965_v9 = vld [vmem:[%s5331_s29 + $0x1618] sm:$0xff] }
 0x188   : > { %4820 = vmatprep.subr.mxu1 %v947_v10  ;;  %4786 = vmatpush3.msra.mxu0 %v899_v12  ;;  %v997_v10 = vld [vmem:[%s5331_s29 + $0x1718] sm:$0xff]  ;;  %v1012_v12 = vld [vmem:[%s5331_s29 + $0x1790] sm:$0xff] }
 0x189   : > { %4821 = vmatpush3.msra.mxu1 %v931_v13  ;;  %4787 = vmatprep.subr.mxu0 %v914_v14  ;;  %v1492_v13 = vrot.slane %v253_v1, %v5380_v52  ;;  %v964_v14 = vld [vmem:[%s5331_s29 + $0x1610] sm:$0xff] }
 0x18a   : > { %4822 = vmatprep.subr.mxu1 %v946_v15  ;;  %4788 = vmatpush3.msra.mxu0 %v898_v17  ;;  %v996_v15 = vld [vmem:[%s5331_s29 + $0x1710] sm:$0xff]  ;;  %v1011_v17 = vld [vmem:[%s5331_s29 + $0x1788] sm:$0xff] }
 0x18b   : > { %3098 = vmatprep.mubr.f32.mxu0 %v1483_v16  ;;  %4823 = vmatpush3.msra.mxu1 %v930_v18  ;;  %v979_v16 = vld [vmem:[%s5331_s29 + $0x1688] sm:$0xff]  ;;  %v1499_v18 = vrot.slane %v1485_v8, %v5380_v52  ;;  %v1080_v1 = vld [vmem:[%s5331_s29 + $0x19b0] sm:$0xff]  ;;  %v254_v8 = vld [vmem:[%s5326_s25 + $0x60] sm:$0xff] }
 0x18c   : > { %3099 = vmatmul.mubr.f32.vlgmr.msra.gmra.mxu0 %v1475_v6  ;;  %3168 = vmatprep.mubr.f32.mxu1 %v1484_v19  ;;  %v981_v6 = vld [vmem:[%s5331_s29 + $0x1698] sm:$0xff]  ;;  %v963_v19 = vld [vmem:[%s5331_s29 + $0x1608] sm:$0xff] }
 0x18d   : > { %4827 = vmatprep.subr.mxu0 %v993_v20  ;;  %4862 = vmatprep.subr.mxu1 %v1025_v21  ;;  %v995_v20 = vld [vmem:[%s5331_s29 + $0x1708] sm:$0xff]  ;;  %v978_v21 = vld [vmem:[%s5331_s29 + $0x1680] sm:$0xff] }
 0x18e   : > { %3169 = vmatmul.mubr.f32.vlgmr.msra.gmra.mxu1 %v1482_v11  ;;  %4828 = vmatpush3.msra.mxu0 %v977_v22  ;;  %v980_v11 = vld [vmem:[%s5331_s29 + $0x1690] sm:$0xff]  ;;  %v1010_v22 = vld [vmem:[%s5331_s29 + $0x1780] sm:$0xff] }
 0x18f   : > { %4863 = vmatpush3.msra.mxu1 %v1009_v23  ;;  %4829 = vmatprep.subr.mxu0 %v992_v24  ;;  %v1500_v23 = vcombine.high %v1492_v13, %v1492_v13  ;;  %v962_v24 = vld [vmem:[%s5331_s29 + $0x1600] sm:$0xff] }
 0x190   : > { %4864 = vmatprep.subr.mxu1 %v1024_v25  ;;  %4830 = vmatpush3.msra.mxu0 %v976_v26  ;;  %v994_v25 = vld [vmem:[%s5331_s29 + $0x1700] sm:$0xff]  ;;  %v1501_v26 = vcombine.high %v1499_v18, %v1499_v18 }
 0x191   : > { %4865 = vmatpush3.msra.mxu1 %v1008_v27  ;;  %4831 = vmatprep.subr.mxu0 %v991_v28  ;;  %v1057_v27 = vld [vmem:[%s5331_s29 + $0x18f8] sm:$0xff] }
 0x192   : > { %4866 = vmatprep.subr.mxu1 %v1023_v29  ;;  %4832 = vmatpush3.msra.mxu0 %v975_v30  ;;  %v1089_v28 = vld [vmem:[%s5331_s29 + $0x19f8] sm:$0xff] }
 0x193   : > { %4867 = vmatpush3.msra.mxu1 %v1007_v31  ;;  %4833 = vmatprep.subr.mxu0 %v990_v32  ;;  %v1041_v29 = vld [vmem:[%s5331_s29 + $0x1878] sm:$0xff]  ;;  %v1056_v31 = vld [vmem:[%s5331_s29 + $0x18f0] sm:$0xff] }
 0x194   : > { %4868 = vmatprep.subr.mxu1 %v1022_v33  ;;  %4834 = vmatpush3.msra.mxu0 %v974_v34  ;;  %v1073_v30 = vld [vmem:[%s5331_s29 + $0x1978] sm:$0xff]  ;;  %v1088_v32 = vld [vmem:[%s5331_s29 + $0x19f0] sm:$0xff] }
 0x195   : > { %4869 = vmatpush3.msra.mxu1 %v1006_v35  ;;  %4835 = vmatprep.subr.mxu0 %v989_v36  ;;  %v1040_v33 = vld [vmem:[%s5331_s29 + $0x1870] sm:$0xff]  ;;  %v1055_v35 = vld [vmem:[%s5331_s29 + $0x18e8] sm:$0xff] }
 0x196   : > { %4870 = vmatprep.subr.mxu1 %v1021_v37  ;;  %4836 = vmatpush3.msra.mxu0 %v973_v38  ;;  %v1072_v34 = vld [vmem:[%s5331_s29 + $0x1970] sm:$0xff]  ;;  %v1087_v36 = vld [vmem:[%s5331_s29 + $0x19e8] sm:$0xff] }
 0x197   : > { %4871 = vmatpush3.msra.mxu1 %v1005_v39  ;;  %4837 = vmatprep.subr.mxu0 %v988_v40  ;;  %v1039_v37 = vld [vmem:[%s5331_s29 + $0x1868] sm:$0xff]  ;;  %v1054_v39 = vld [vmem:[%s5331_s29 + $0x18e0] sm:$0xff] }
 0x198   : > { %4872 = vmatprep.subr.mxu1 %v1020_v41  ;;  %4838 = vmatpush3.msra.mxu0 %v972_v42  ;;  %v1071_v38 = vld [vmem:[%s5331_s29 + $0x1968] sm:$0xff]  ;;  %v1086_v40 = vld [vmem:[%s5331_s29 + $0x19e0] sm:$0xff] }
 0x199   : > { %4873 = vmatpush3.msra.mxu1 %v1004_v43  ;;  %4839 = vmatprep.subr.mxu0 %v987_v44  ;;  %v1038_v41 = vld [vmem:[%s5331_s29 + $0x1860] sm:$0xff]  ;;  %v1053_v43 = vld [vmem:[%s5331_s29 + $0x18d8] sm:$0xff] }
 0x19a   : > { %4874 = vmatprep.subr.mxu1 %v1019_v45  ;;  %4840 = vmatpush3.msra.mxu0 %v971_v46  ;;  %v1070_v42 = vld [vmem:[%s5331_s29 + $0x1960] sm:$0xff]  ;;  %v1085_v44 = vld [vmem:[%s5331_s29 + $0x19d8] sm:$0xff] }
 0x19b   : > { %4875 = vmatpush3.msra.mxu1 %v1003_v47  ;;  %4841 = vmatprep.subr.mxu0 %v986_v48  ;;  %v1037_v45 = vld [vmem:[%s5331_s29 + $0x1858] sm:$0xff]  ;;  %v1052_v47 = vld [vmem:[%s5331_s29 + $0x18d0] sm:$0xff] }
 0x19c   : > { %4876 = vmatprep.subr.mxu1 %v1018_v49  ;;  %4842 = vmatpush3.msra.mxu0 %v970_v50  ;;  %v1069_v46 = vld [vmem:[%s5331_s29 + $0x1958] sm:$0xff]  ;;  %v1084_v48 = vld [vmem:[%s5331_s29 + $0x19d0] sm:$0xff] }
 0x19d   : > { %4877 = vmatpush3.msra.mxu1 %v1002_v51  ;;  %4843 = vmatprep.subr.mxu0 %v985_v53  ;;  %v1036_v49 = vld [vmem:[%s5331_s29 + $0x1850] sm:$0xff]  ;;  %v1051_v51 = vld [vmem:[%s5331_s29 + $0x18c8] sm:$0xff] }
 0x19e   : > { %4878 = vmatprep.subr.mxu1 %v1017_v54  ;;  %4844 = vmatpush3.msra.mxu0 %v969_v55  ;;  %v1068_v50 = vld [vmem:[%s5331_s29 + $0x1950] sm:$0xff]  ;;  %v1083_v53 = vld [vmem:[%s5331_s29 + $0x19c8] sm:$0xff] }
 0x19f   : > { %4879 = vmatpush3.msra.mxu1 %v1001_v56  ;;  %4845 = vmatprep.subr.mxu0 %v984_v57  ;;  %v1035_v54 = vld [vmem:[%s5331_s29 + $0x1848] sm:$0xff]  ;;  %v1050_v56 = vld [vmem:[%s5331_s29 + $0x18c0] sm:$0xff] }
 0x1a0   : > { %4880 = vmatprep.subr.mxu1 %v1016_v58  ;;  %4846 = vmatpush3.msra.mxu0 %v968_v59  ;;  %v1067_v55 = vld [vmem:[%s5331_s29 + $0x1948] sm:$0xff]  ;;  %v1082_v57 = vld [vmem:[%s5331_s29 + $0x19c0] sm:$0xff] }
 0x1a1   : > { %4881 = vmatpush3.msra.mxu1 %v1000_v60  ;;  %4847 = vmatprep.subr.mxu0 %v983_v61  ;;  %v1034_v58 = vld [vmem:[%s5331_s29 + $0x1840] sm:$0xff]  ;;  %v1049_v60 = vld [vmem:[%s5331_s29 + $0x18b8] sm:$0xff] }
 0x1a2   : > { %4882 = vmatprep.subr.mxu1 %v1015_v62  ;;  %4848 = vmatpush3.msra.mxu0 %v967_v63  ;;  %v1066_v59 = vld [vmem:[%s5331_s29 + $0x1940] sm:$0xff]  ;;  %v1081_v61 = vld [vmem:[%s5331_s29 + $0x19b8] sm:$0xff] }
 0x1a3   : > { %4883 = vmatpush3.msra.mxu1 %v999_v0  ;;  %4849 = vmatprep.subr.mxu0 %v982_v2  ;;  %v1033_v62 = vld [vmem:[%s5331_s29 + $0x1838] sm:$0xff]  ;;  %v1048_v0 = vld [vmem:[%s5331_s29 + $0x18b0] sm:$0xff] }
 0x1a4   : > { %4884 = vmatprep.subr.mxu1 %v1014_v3  ;;  %4850 = vmatpush3.msra.mxu0 %v966_v4  ;;  %v1065_v63 = vld [vmem:[%s5331_s29 + $0x1938] sm:$0xff]  ;;  %v1032_v2 = vld [vmem:[%s5331_s29 + $0x1830] sm:$0xff]  ;;  %v1047_v4 = vld [vmem:[%s5331_s29 + $0x18a8] sm:$0xff] }
 0x1a5   : > { %4885 = vmatpush3.msra.mxu1 %v998_v5  ;;  %4851 = vmatprep.subr.mxu0 %v981_v6  ;;  %v1064_v3 = vld [vmem:[%s5331_s29 + $0x1930] sm:$0xff]  ;;  %v1079_v5 = vld [vmem:[%s5331_s29 + $0x19a8] sm:$0xff] }
 0x1a6   : > { %4886 = vmatprep.subr.mxu1 %v1013_v7  ;;  %4852 = vmatpush3.msra.mxu0 %v965_v9  ;;  %v1031_v6 = vld [vmem:[%s5331_s29 + $0x1828] sm:$0xff]  ;;  %v1046_v9 = vld [vmem:[%s5331_s29 + $0x18a0] sm:$0xff] }
 0x1a7   : > { %4887 = vmatpush3.msra.mxu1 %v997_v10  ;;  %4853 = vmatprep.subr.mxu0 %v980_v11  ;;  %v1063_v7 = vld [vmem:[%s5331_s29 + $0x1928] sm:$0xff]  ;;  %v1078_v10 = vld [vmem:[%s5331_s29 + $0x19a0] sm:$0xff] }
 0x1a8   : > { %4888 = vmatprep.subr.mxu1 %v1012_v12  ;;  %4854 = vmatpush3.msra.mxu0 %v964_v14  ;;  %v1030_v11 = vld [vmem:[%s5331_s29 + $0x1820] sm:$0xff]  ;;  %v1077_v14 = vld [vmem:[%s5331_s29 + $0x1998] sm:$0xff] }
 0x1a9   : > { %4889 = vmatpush3.msra.mxu1 %v996_v15  ;;  %4855 = vmatprep.subr.mxu0 %v979_v16  ;;  %v1062_v12 = vld [vmem:[%s5331_s29 + $0x1920] sm:$0xff]  ;;  %v1502_v15 = vcombine.high %v254_v8, %v254_v8  ;;  %v1029_v16 = vld [vmem:[%s5331_s29 + $0x1818] sm:$0xff] }
 0x1aa   : > { %4890 = vmatprep.subr.mxu1 %v1011_v17  ;;  %4856 = vmatpush3.msra.mxu0 %v963_v19  ;;  %v1061_v17 = vld [vmem:[%s5331_s29 + $0x1918] sm:$0xff]  ;;  %v1076_v19 = vld [vmem:[%s5331_s29 + $0x1990] sm:$0xff] }
 0x1ab   : > { %4891 = vmatpush3.msra.mxu1 %v995_v20  ;;  %4857 = vmatprep.subr.mxu0 %v978_v21  ;;  %v1509_v20 = vrot.slane %v254_v8, %v5380_v52  ;;  %v1028_v21 = vld [vmem:[%s5331_s29 + $0x1810] sm:$0xff] }
 0x1ac   : > { %4892 = vmatprep.subr.mxu1 %v1010_v22  ;;  %4858 = vmatpush3.msra.mxu0 %v962_v24  ;;  %v1060_v22 = vld [vmem:[%s5331_s29 + $0x1910] sm:$0xff]  ;;  %v1075_v24 = vld [vmem:[%s5331_s29 + $0x1988] sm:$0xff] }
 0x1ad   : > { %3238 = vmatprep.mubr.f32.mxu0 %v1500_v23  ;;  %4893 = vmatpush3.msra.mxu1 %v994_v25  ;;  %v1043_v23 = vld [vmem:[%s5331_s29 + $0x1888] sm:$0xff]  ;;  %v1516_v25 = vrot.slane %v1502_v15, %v5380_v52  ;;  %v1144_v8 = vld [vmem:[%s5331_s29 + $0x1bb0] sm:$0xff] }
 0x1ae   : > { %3239 = vmatmul.mubr.f32.vlgmr.msra.gmra.mxu0 %v1492_v13  ;;  %3308 = vmatprep.mubr.f32.mxu1 %v1501_v26  ;;  %v1045_v13 = vld [vmem:[%s5331_s29 + $0x1898] sm:$0xff]  ;;  %v1027_v26 = vld [vmem:[%s5331_s29 + $0x1808] sm:$0xff] }
 0x1af   : > { %4897 = vmatprep.subr.mxu0 %v1057_v27  ;;  %4932 = vmatprep.subr.mxu1 %v1089_v28  ;;  %v1059_v27 = vld [vmem:[%s5331_s29 + $0x1908] sm:$0xff]  ;;  %v1042_v28 = vld [vmem:[%s5331_s29 + $0x1880] sm:$0xff] }
 0x1b0   : > { %3309 = vmatmul.mubr.f32.vlgmr.msra.gmra.mxu1 %v1499_v18  ;;  %4898 = vmatpush3.msra.mxu0 %v1041_v29  ;;  %v1044_v18 = vld [vmem:[%s5331_s29 + $0x1890] sm:$0xff]  ;;  %v1074_v29 = vld [vmem:[%s5331_s29 + $0x1980] sm:$0xff]  ;;  %v255_v15 = vld [vmem:[%s5326_s25 + $0x68] sm:$0xff] }
 0x1b1   : > { %4933 = vmatpush3.msra.mxu1 %v1073_v30  ;;  %4899 = vmatprep.subr.mxu0 %v1056_v31  ;;  %v1517_v30 = vcombine.high %v1509_v20, %v1509_v20  ;;  %v1026_v31 = vld [vmem:[%s5331_s29 + $0x1800] sm:$0xff] }
 0x1b2   : > { %4934 = vmatprep.subr.mxu1 %v1088_v32  ;;  %4900 = vmatpush3.msra.mxu0 %v1040_v33  ;;  %v1058_v32 = vld [vmem:[%s5331_s29 + $0x1900] sm:$0xff]  ;;  %v1518_v33 = vcombine.high %v1516_v25, %v1516_v25 }
 0x1b3   : > { %4935 = vmatpush3.msra.mxu1 %v1072_v34  ;;  %4901 = vmatprep.subr.mxu0 %v1055_v35  ;;  %v1121_v34 = vld [vmem:[%s5331_s29 + $0x1af8] sm:$0xff] }
 0x1b4   : > { %4936 = vmatprep.subr.mxu1 %v1087_v36  ;;  %4902 = vmatpush3.msra.mxu0 %v1039_v37  ;;  %v1153_v35 = vld [vmem:[%s5331_s29 + $0x1bf8] sm:$0xff] }
 0x1b5   : > { %4937 = vmatpush3.msra.mxu1 %v1071_v38  ;;  %4903 = vmatprep.subr.mxu0 %v1054_v39  ;;  %v1105_v36 = vld [vmem:[%s5331_s29 + $0x1a78] sm:$0xff]  ;;  %v1120_v38 = vld [vmem:[%s5331_s29 + $0x1af0] sm:$0xff] }
 0x1b6   : > { %4938 = vmatprep.subr.mxu1 %v1086_v40  ;;  %4904 = vmatpush3.msra.mxu0 %v1038_v41  ;;  %v1137_v37 = vld [vmem:[%s5331_s29 + $0x1b78] sm:$0xff]  ;;  %v1152_v39 = vld [vmem:[%s5331_s29 + $0x1bf0] sm:$0xff] }
 0x1b7   : > { %4939 = vmatpush3.msra.mxu1 %v1070_v42  ;;  %4905 = vmatprep.subr.mxu0 %v1053_v43  ;;  %v1104_v40 = vld [vmem:[%s5331_s29 + $0x1a70] sm:$0xff]  ;;  %v1119_v42 = vld [vmem:[%s5331_s29 + $0x1ae8] sm:$0xff] }
 0x1b8   : > { %4940 = vmatprep.subr.mxu1 %v1085_v44  ;;  %4906 = vmatpush3.msra.mxu0 %v1037_v45  ;;  %v1136_v41 = vld [vmem:[%s5331_s29 + $0x1b70] sm:$0xff]  ;;  %v1151_v43 = vld [vmem:[%s5331_s29 + $0x1be8] sm:$0xff] }
 0x1b9   : > { %4941 = vmatpush3.msra.mxu1 %v1069_v46  ;;  %4907 = vmatprep.subr.mxu0 %v1052_v47  ;;  %v1103_v44 = vld [vmem:[%s5331_s29 + $0x1a68] sm:$0xff]  ;;  %v1118_v46 = vld [vmem:[%s5331_s29 + $0x1ae0] sm:$0xff] }
 0x1ba   : > { %4942 = vmatprep.subr.mxu1 %v1084_v48  ;;  %4908 = vmatpush3.msra.mxu0 %v1036_v49  ;;  %v1135_v45 = vld [vmem:[%s5331_s29 + $0x1b68] sm:$0xff]  ;;  %v1150_v47 = vld [vmem:[%s5331_s29 + $0x1be0] sm:$0xff] }
 0x1bb   : > { %4943 = vmatpush3.msra.mxu1 %v1068_v50  ;;  %4909 = vmatprep.subr.mxu0 %v1051_v51  ;;  %v1102_v48 = vld [vmem:[%s5331_s29 + $0x1a60] sm:$0xff]  ;;  %v1117_v50 = vld [vmem:[%s5331_s29 + $0x1ad8] sm:$0xff] }
 0x1bc   : > { %4944 = vmatprep.subr.mxu1 %v1083_v53  ;;  %4910 = vmatpush3.msra.mxu0 %v1035_v54  ;;  %v1134_v49 = vld [vmem:[%s5331_s29 + $0x1b60] sm:$0xff]  ;;  %v1149_v51 = vld [vmem:[%s5331_s29 + $0x1bd8] sm:$0xff] }
 0x1bd   : > { %4945 = vmatpush3.msra.mxu1 %v1067_v55  ;;  %4911 = vmatprep.subr.mxu0 %v1050_v56  ;;  %v1101_v53 = vld [vmem:[%s5331_s29 + $0x1a58] sm:$0xff]  ;;  %v1116_v55 = vld [vmem:[%s5331_s29 + $0x1ad0] sm:$0xff] }
 0x1be   : > { %4946 = vmatprep.subr.mxu1 %v1082_v57  ;;  %4912 = vmatpush3.msra.mxu0 %v1034_v58  ;;  %v1133_v54 = vld [vmem:[%s5331_s29 + $0x1b58] sm:$0xff]  ;;  %v1148_v56 = vld [vmem:[%s5331_s29 + $0x1bd0] sm:$0xff] }
 0x1bf   : > { %4947 = vmatpush3.msra.mxu1 %v1066_v59  ;;  %4913 = vmatprep.subr.mxu0 %v1049_v60  ;;  %v1100_v57 = vld [vmem:[%s5331_s29 + $0x1a50] sm:$0xff]  ;;  %v1115_v59 = vld [vmem:[%s5331_s29 + $0x1ac8] sm:$0xff] }
 0x1c0   : > { %4948 = vmatprep.subr.mxu1 %v1081_v61  ;;  %4914 = vmatpush3.msra.mxu0 %v1033_v62  ;;  %v1132_v58 = vld [vmem:[%s5331_s29 + $0x1b50] sm:$0xff]  ;;  %v1147_v60 = vld [vmem:[%s5331_s29 + $0x1bc8] sm:$0xff] }
 0x1c1   : > { %4949 = vmatpush3.msra.mxu1 %v1065_v63  ;;  %4915 = vmatprep.subr.mxu0 %v1048_v0  ;;  %v1099_v61 = vld [vmem:[%s5331_s29 + $0x1a48] sm:$0xff]  ;;  %v1114_v63 = vld [vmem:[%s5331_s29 + $0x1ac0] sm:$0xff] }
 0x1c2   : > { %4950 = vmatprep.subr.mxu1 %v1080_v1  ;;  %4916 = vmatpush3.msra.mxu0 %v1032_v2  ;;  %v1131_v62 = vld [vmem:[%s5331_s29 + $0x1b48] sm:$0xff]  ;;  %v1146_v0 = vld [vmem:[%s5331_s29 + $0x1bc0] sm:$0xff] }
 0x1c3   : > { %4951 = vmatpush3.msra.mxu1 %v1064_v3  ;;  %4917 = vmatprep.subr.mxu0 %v1047_v4  ;;  %v1098_v1 = vld [vmem:[%s5331_s29 + $0x1a40] sm:$0xff]  ;;  %v1113_v3 = vld [vmem:[%s5331_s29 + $0x1ab8] sm:$0xff] }
 0x1c4   : > { %4952 = vmatprep.subr.mxu1 %v1079_v5  ;;  %4918 = vmatpush3.msra.mxu0 %v1031_v6  ;;  %v1130_v2 = vld [vmem:[%s5331_s29 + $0x1b40] sm:$0xff]  ;;  %v1145_v4 = vld [vmem:[%s5331_s29 + $0x1bb8] sm:$0xff] }
 0x1c5   : > { %4953 = vmatpush3.msra.mxu1 %v1063_v7  ;;  %4919 = vmatprep.subr.mxu0 %v1046_v9  ;;  %v1097_v5 = vld [vmem:[%s5331_s29 + $0x1a38] sm:$0xff]  ;;  %v1112_v7 = vld [vmem:[%s5331_s29 + $0x1ab0] sm:$0xff] }
 0x1c6   : > { %4954 = vmatprep.subr.mxu1 %v1078_v10  ;;  %4920 = vmatpush3.msra.mxu0 %v1030_v11  ;;  %v1129_v6 = vld [vmem:[%s5331_s29 + $0x1b38] sm:$0xff]  ;;  %v1096_v9 = vld [vmem:[%s5331_s29 + $0x1a30] sm:$0xff]  ;;  %v1111_v11 = vld [vmem:[%s5331_s29 + $0x1aa8] sm:$0xff] }
 0x1c7   : > { %4955 = vmatpush3.msra.mxu1 %v1062_v12  ;;  %4921 = vmatprep.subr.mxu0 %v1045_v13  ;;  %v1128_v10 = vld [vmem:[%s5331_s29 + $0x1b30] sm:$0xff]  ;;  %v1143_v12 = vld [vmem:[%s5331_s29 + $0x1ba8] sm:$0xff] }
 0x1c8   : > { %4956 = vmatprep.subr.mxu1 %v1077_v14  ;;  %4922 = vmatpush3.msra.mxu0 %v1029_v16  ;;  %v1095_v13 = vld [vmem:[%s5331_s29 + $0x1a28] sm:$0xff]  ;;  %v1110_v16 = vld [vmem:[%s5331_s29 + $0x1aa0] sm:$0xff] }
 0x1c9   : > { %4957 = vmatpush3.msra.mxu1 %v1061_v17  ;;  %4923 = vmatprep.subr.mxu0 %v1044_v18  ;;  %v1127_v14 = vld [vmem:[%s5331_s29 + $0x1b28] sm:$0xff]  ;;  %v1142_v17 = vld [vmem:[%s5331_s29 + $0x1ba0] sm:$0xff] }
 0x1ca   : > { %4958 = vmatprep.subr.mxu1 %v1076_v19  ;;  %4924 = vmatpush3.msra.mxu0 %v1028_v21  ;;  %v1094_v18 = vld [vmem:[%s5331_s29 + $0x1a20] sm:$0xff]  ;;  %v1141_v21 = vld [vmem:[%s5331_s29 + $0x1b98] sm:$0xff] }
 0x1cb   : > { %4959 = vmatpush3.msra.mxu1 %v1060_v22  ;;  %4925 = vmatprep.subr.mxu0 %v1043_v23  ;;  %v1126_v19 = vld [vmem:[%s5331_s29 + $0x1b20] sm:$0xff]  ;;  %v1519_v22 = vcombine.high %v255_v15, %v255_v15  ;;  %v1093_v23 = vld [vmem:[%s5331_s29 + $0x1a18] sm:$0xff] }
 0x1cc   : > { %4960 = vmatprep.subr.mxu1 %v1075_v24  ;;  %4926 = vmatpush3.msra.mxu0 %v1027_v26  ;;  %v1125_v24 = vld [vmem:[%s5331_s29 + $0x1b18] sm:$0xff]  ;;  %v1140_v26 = vld [vmem:[%s5331_s29 + $0x1b90] sm:$0xff] }
 0x1cd   : > { %4961 = vmatpush3.msra.mxu1 %v1059_v27  ;;  %4927 = vmatprep.subr.mxu0 %v1042_v28  ;;  %v1526_v27 = vrot.slane %v255_v15, %v5380_v52  ;;  %v1092_v28 = vld [vmem:[%s5331_s29 + $0x1a10] sm:$0xff] }
 0x1ce   : > { %4962 = vmatprep.subr.mxu1 %v1074_v29  ;;  %4928 = vmatpush3.msra.mxu0 %v1026_v31  ;;  %v1124_v29 = vld [vmem:[%s5331_s29 + $0x1b10] sm:$0xff]  ;;  %v1139_v31 = vld [vmem:[%s5331_s29 + $0x1b88] sm:$0xff] }
 0x1cf   : > { %3378 = vmatprep.mubr.f32.mxu0 %v1517_v30  ;;  %4963 = vmatpush3.msra.mxu1 %v1058_v32  ;;  %v1107_v30 = vld [vmem:[%s5331_s29 + $0x1a88] sm:$0xff]  ;;  %v1533_v32 = vrot.slane %v1519_v22, %v5380_v52  ;;  %v1208_v15 = vld [vmem:[%s5331_s29 + $0x1db0] sm:$0xff] }
 0x1d0   : > { %3379 = vmatmul.mubr.f32.vlgmr.msra.gmra.mxu0 %v1509_v20  ;;  %3448 = vmatprep.mubr.f32.mxu1 %v1518_v33  ;;  %v1109_v20 = vld [vmem:[%s5331_s29 + $0x1a98] sm:$0xff]  ;;  %v1091_v33 = vld [vmem:[%s5331_s29 + $0x1a08] sm:$0xff]  ;;  %v256_v22 = vld [vmem:[%s5326_s25 + $0x70] sm:$0xff] }
 0x1d1   : > { %4967 = vmatprep.subr.mxu0 %v1121_v34  ;;  %5002 = vmatprep.subr.mxu1 %v1153_v35  ;;  %v1123_v34 = vld [vmem:[%s5331_s29 + $0x1b08] sm:$0xff]  ;;  %v1106_v35 = vld [vmem:[%s5331_s29 + $0x1a80] sm:$0xff] }
 0x1d2   : > { %3449 = vmatmul.mubr.f32.vlgmr.msra.gmra.mxu1 %v1516_v25  ;;  %4968 = vmatpush3.msra.mxu0 %v1105_v36  ;;  %v1108_v25 = vld [vmem:[%s5331_s29 + $0x1a90] sm:$0xff]  ;;  %v1138_v36 = vld [vmem:[%s5331_s29 + $0x1b80] sm:$0xff] }
 0x1d3   : > { %5003 = vmatpush3.msra.mxu1 %v1137_v37  ;;  %4969 = vmatprep.subr.mxu0 %v1120_v38  ;;  %v1534_v37 = vcombine.high %v1526_v27, %v1526_v27  ;;  %v1090_v38 = vld [vmem:[%s5331_s29 + $0x1a00] sm:$0xff] }
 0x1d4   : > { %5004 = vmatprep.subr.mxu1 %v1152_v39  ;;  %4970 = vmatpush3.msra.mxu0 %v1104_v40  ;;  %v1122_v39 = vld [vmem:[%s5331_s29 + $0x1b00] sm:$0xff]  ;;  %v1535_v40 = vcombine.high %v1533_v32, %v1533_v32 }
 0x1d5   : > { %5005 = vmatpush3.msra.mxu1 %v1136_v41  ;;  %4971 = vmatprep.subr.mxu0 %v1119_v42  ;;  %v1185_v41 = vld [vmem:[%s5331_s29 + $0x1cf8] sm:$0xff] }
 0x1d6   : > { %5006 = vmatprep.subr.mxu1 %v1151_v43  ;;  %4972 = vmatpush3.msra.mxu0 %v1103_v44  ;;  %v1217_v42 = vld [vmem:[%s5331_s29 + $0x1df8] sm:$0xff] }
 0x1d7   : > { %5007 = vmatpush3.msra.mxu1 %v1135_v45  ;;  %4973 = vmatprep.subr.mxu0 %v1118_v46  ;;  %v1169_v43 = vld [vmem:[%s5331_s29 + $0x1c78] sm:$0xff]  ;;  %v1184_v45 = vld [vmem:[%s5331_s29 + $0x1cf0] sm:$0xff] }
 0x1d8   : > { %5008 = vmatprep.subr.mxu1 %v1150_v47  ;;  %4974 = vmatpush3.msra.mxu0 %v1102_v48  ;;  %v1201_v44 = vld [vmem:[%s5331_s29 + $0x1d78] sm:$0xff]  ;;  %v1216_v46 = vld [vmem:[%s5331_s29 + $0x1df0] sm:$0xff] }
 0x1d9   : > { %5009 = vmatpush3.msra.mxu1 %v1134_v49  ;;  %4975 = vmatprep.subr.mxu0 %v1117_v50  ;;  %v1168_v47 = vld [vmem:[%s5331_s29 + $0x1c70] sm:$0xff]  ;;  %v1183_v49 = vld [vmem:[%s5331_s29 + $0x1ce8] sm:$0xff] }
 0x1da   : > { %5010 = vmatprep.subr.mxu1 %v1149_v51  ;;  %4976 = vmatpush3.msra.mxu0 %v1101_v53  ;;  %v1200_v48 = vld [vmem:[%s5331_s29 + $0x1d70] sm:$0xff]  ;;  %v1215_v50 = vld [vmem:[%s5331_s29 + $0x1de8] sm:$0xff] }
 0x1db   : > { %5011 = vmatpush3.msra.mxu1 %v1133_v54  ;;  %4977 = vmatprep.subr.mxu0 %v1116_v55  ;;  %v1167_v51 = vld [vmem:[%s5331_s29 + $0x1c68] sm:$0xff]  ;;  %v1182_v54 = vld [vmem:[%s5331_s29 + $0x1ce0] sm:$0xff] }
 0x1dc   : > { %5012 = vmatprep.subr.mxu1 %v1148_v56  ;;  %4978 = vmatpush3.msra.mxu0 %v1100_v57  ;;  %v1199_v53 = vld [vmem:[%s5331_s29 + $0x1d68] sm:$0xff]  ;;  %v1214_v55 = vld [vmem:[%s5331_s29 + $0x1de0] sm:$0xff] }
 0x1dd   : > { %5013 = vmatpush3.msra.mxu1 %v1132_v58  ;;  %4979 = vmatprep.subr.mxu0 %v1115_v59  ;;  %v1166_v56 = vld [vmem:[%s5331_s29 + $0x1c60] sm:$0xff]  ;;  %v1181_v58 = vld [vmem:[%s5331_s29 + $0x1cd8] sm:$0xff] }
 0x1de   : > { %5014 = vmatprep.subr.mxu1 %v1147_v60  ;;  %4980 = vmatpush3.msra.mxu0 %v1099_v61  ;;  %v1198_v57 = vld [vmem:[%s5331_s29 + $0x1d60] sm:$0xff]  ;;  %v1213_v59 = vld [vmem:[%s5331_s29 + $0x1dd8] sm:$0xff] }
 0x1df   : > { %5015 = vmatpush3.msra.mxu1 %v1131_v62  ;;  %4981 = vmatprep.subr.mxu0 %v1114_v63  ;;  %v1165_v60 = vld [vmem:[%s5331_s29 + $0x1c58] sm:$0xff]  ;;  %v1180_v62 = vld [vmem:[%s5331_s29 + $0x1cd0] sm:$0xff] }
 0x1e0   : > { %5016 = vmatprep.subr.mxu1 %v1146_v0  ;;  %4982 = vmatpush3.msra.mxu0 %v1098_v1  ;;  %v1197_v61 = vld [vmem:[%s5331_s29 + $0x1d58] sm:$0xff]  ;;  %v1212_v63 = vld [vmem:[%s5331_s29 + $0x1dd0] sm:$0xff] }
 0x1e1   : > { %5017 = vmatpush3.msra.mxu1 %v1130_v2  ;;  %4983 = vmatprep.subr.mxu0 %v1113_v3  ;;  %v1164_v0 = vld [vmem:[%s5331_s29 + $0x1c50] sm:$0xff]  ;;  %v1179_v2 = vld [vmem:[%s5331_s29 + $0x1cc8] sm:$0xff] }
 0x1e2   : > { %5018 = vmatprep.subr.mxu1 %v1145_v4  ;;  %4984 = vmatpush3.msra.mxu0 %v1097_v5  ;;  %v1196_v1 = vld [vmem:[%s5331_s29 + $0x1d50] sm:$0xff]  ;;  %v1211_v3 = vld [vmem:[%s5331_s29 + $0x1dc8] sm:$0xff] }
 0x1e3   : > { %5019 = vmatpush3.msra.mxu1 %v1129_v6  ;;  %4985 = vmatprep.subr.mxu0 %v1112_v7  ;;  %v1163_v4 = vld [vmem:[%s5331_s29 + $0x1c48] sm:$0xff]  ;;  %v1178_v6 = vld [vmem:[%s5331_s29 + $0x1cc0] sm:$0xff] }
 0x1e4   : > { %5020 = vmatprep.subr.mxu1 %v1144_v8  ;;  %4986 = vmatpush3.msra.mxu0 %v1096_v9  ;;  %v1195_v5 = vld [vmem:[%s5331_s29 + $0x1d48] sm:$0xff]  ;;  %v1210_v7 = vld [vmem:[%s5331_s29 + $0x1dc0] sm:$0xff] }
 0x1e5   : > { %5021 = vmatpush3.msra.mxu1 %v1128_v10  ;;  %4987 = vmatprep.subr.mxu0 %v1111_v11  ;;  %v1162_v8 = vld [vmem:[%s5331_s29 + $0x1c40] sm:$0xff]  ;;  %v1177_v10 = vld [vmem:[%s5331_s29 + $0x1cb8] sm:$0xff] }
 0x1e6   : > { %5022 = vmatprep.subr.mxu1 %v1143_v12  ;;  %4988 = vmatpush3.msra.mxu0 %v1095_v13  ;;  %v1194_v9 = vld [vmem:[%s5331_s29 + $0x1d40] sm:$0xff]  ;;  %v1209_v11 = vld [vmem:[%s5331_s29 + $0x1db8] sm:$0xff] }
 0x1e7   : > { %5023 = vmatpush3.msra.mxu1 %v1127_v14  ;;  %4989 = vmatprep.subr.mxu0 %v1110_v16  ;;  %v1161_v12 = vld [vmem:[%s5331_s29 + $0x1c38] sm:$0xff]  ;;  %v1176_v14 = vld [vmem:[%s5331_s29 + $0x1cb0] sm:$0xff] }
 0x1e8   : > { %5024 = vmatprep.subr.mxu1 %v1142_v17  ;;  %4990 = vmatpush3.msra.mxu0 %v1094_v18  ;;  %v1193_v13 = vld [vmem:[%s5331_s29 + $0x1d38] sm:$0xff]  ;;  %v1160_v16 = vld [vmem:[%s5331_s29 + $0x1c30] sm:$0xff]  ;;  %v1175_v18 = vld [vmem:[%s5331_s29 + $0x1ca8] sm:$0xff] }
 0x1e9   : > { %5025 = vmatpush3.msra.mxu1 %v1126_v19  ;;  %4991 = vmatprep.subr.mxu0 %v1109_v20  ;;  %v1192_v17 = vld [vmem:[%s5331_s29 + $0x1d30] sm:$0xff]  ;;  %v1207_v19 = vld [vmem:[%s5331_s29 + $0x1da8] sm:$0xff] }
 0x1ea   : > { %5026 = vmatprep.subr.mxu1 %v1141_v21  ;;  %4992 = vmatpush3.msra.mxu0 %v1093_v23  ;;  %v1159_v20 = vld [vmem:[%s5331_s29 + $0x1c28] sm:$0xff]  ;;  %v1174_v23 = vld [vmem:[%s5331_s29 + $0x1ca0] sm:$0xff] }
 0x1eb   : > { %5027 = vmatpush3.msra.mxu1 %v1125_v24  ;;  %4993 = vmatprep.subr.mxu0 %v1108_v25  ;;  %v1191_v21 = vld [vmem:[%s5331_s29 + $0x1d28] sm:$0xff]  ;;  %v1206_v24 = vld [vmem:[%s5331_s29 + $0x1da0] sm:$0xff] }
 0x1ec   : > { %5028 = vmatprep.subr.mxu1 %v1140_v26  ;;  %4994 = vmatpush3.msra.mxu0 %v1092_v28  ;;  %v1158_v25 = vld [vmem:[%s5331_s29 + $0x1c20] sm:$0xff]  ;;  %v1205_v28 = vld [vmem:[%s5331_s29 + $0x1d98] sm:$0xff] }
 0x1ed   : > { %5029 = vmatpush3.msra.mxu1 %v1124_v29  ;;  %4995 = vmatprep.subr.mxu0 %v1107_v30  ;;  %v1190_v26 = vld [vmem:[%s5331_s29 + $0x1d20] sm:$0xff]  ;;  %v1536_v29 = vcombine.high %v256_v22, %v256_v22  ;;  %v1157_v30 = vld [vmem:[%s5331_s29 + $0x1c18] sm:$0xff] }
 0x1ee   : > { %5030 = vmatprep.subr.mxu1 %v1139_v31  ;;  %4996 = vmatpush3.msra.mxu0 %v1091_v33  ;;  %v1189_v31 = vld [vmem:[%s5331_s29 + $0x1d18] sm:$0xff]  ;;  %v1204_v33 = vld [vmem:[%s5331_s29 + $0x1d90] sm:$0xff] }
 0x1ef   : > { %5031 = vmatpush3.msra.mxu1 %v1123_v34  ;;  %4997 = vmatprep.subr.mxu0 %v1106_v35  ;;  %v1543_v34 = vrot.slane %v256_v22, %v5380_v52  ;;  %v1156_v35 = vld [vmem:[%s5331_s29 + $0x1c10] sm:$0xff] }
 0x1f0   : > { %5032 = vmatprep.subr.mxu1 %v1138_v36  ;;  %4998 = vmatpush3.msra.mxu0 %v1090_v38  ;;  %v1188_v36 = vld [vmem:[%s5331_s29 + $0x1d10] sm:$0xff]  ;;  %v1203_v38 = vld [vmem:[%s5331_s29 + $0x1d88] sm:$0xff] }
 0x1f1   : > { %3518 = vmatprep.mubr.f32.mxu0 %v1534_v37  ;;  %5033 = vmatpush3.msra.mxu1 %v1122_v39  ;;  %v1171_v37 = vld [vmem:[%s5331_s29 + $0x1c88] sm:$0xff]  ;;  %v1550_v39 = vrot.slane %v1536_v29, %v5380_v52  ;;  %v1272_v22 = vld [vmem:[%s5331_s29 + $0x1fb0] sm:$0xff] }
 0x1f2   : > { %3519 = vmatmul.mubr.f32.vlgmr.msra.gmra.mxu0 %v1526_v27  ;;  %3588 = vmatprep.mubr.f32.mxu1 %v1535_v40  ;;  %v1173_v27 = vld [vmem:[%s5331_s29 + $0x1c98] sm:$0xff]  ;;  %v1155_v40 = vld [vmem:[%s5331_s29 + $0x1c08] sm:$0xff] }
 0x1f3   : > { %5037 = vmatprep.subr.mxu0 %v1185_v41  ;;  %5072 = vmatprep.subr.mxu1 %v1217_v42  ;;  %v1187_v41 = vld [vmem:[%s5331_s29 + $0x1d08] sm:$0xff]  ;;  %v1170_v42 = vld [vmem:[%s5331_s29 + $0x1c80] sm:$0xff] }
 0x1f4   : > { %3589 = vmatmul.mubr.f32.vlgmr.msra.gmra.mxu1 %v1533_v32  ;;  %5038 = vmatpush3.msra.mxu0 %v1169_v43  ;;  %v1172_v32 = vld [vmem:[%s5331_s29 + $0x1c90] sm:$0xff]  ;;  %v1202_v43 = vld [vmem:[%s5331_s29 + $0x1d80] sm:$0xff]  ;;  %v1255_v29 = vld [vmem:[%s5331_s29 + $0x1f28] sm:$0xff] }
 0x1f5   : > { %5073 = vmatpush3.msra.mxu1 %v1201_v44  ;;  %5039 = vmatprep.subr.mxu0 %v1184_v45  ;;  %v1551_v44 = vcombine.high %v1543_v34, %v1543_v34  ;;  %v1154_v45 = vld [vmem:[%s5331_s29 + $0x1c00] sm:$0xff] }
 0x1f6   : > { %5074 = vmatprep.subr.mxu1 %v1216_v46  ;;  %5040 = vmatpush3.msra.mxu0 %v1168_v47  ;;  %v1186_v46 = vld [vmem:[%s5331_s29 + $0x1d00] sm:$0xff]  ;;  %v1552_v47 = vcombine.high %v1550_v39, %v1550_v39 }
 0x1f7   : > { %5075 = vmatpush3.msra.mxu1 %v1200_v48  ;;  %5041 = vmatprep.subr.mxu0 %v1183_v49  ;;  %v1249_v48 = vld [vmem:[%s5331_s29 + $0x1ef8] sm:$0xff] }
 0x1f8   : > { %5076 = vmatprep.subr.mxu1 %v1215_v50  ;;  %5042 = vmatpush3.msra.mxu0 %v1167_v51  ;;  %v1281_v49 = vld [vmem:[%s5331_s29 + $0x1ff8] sm:$0xff] }
 0x1f9   : > { %5077 = vmatpush3.msra.mxu1 %v1199_v53  ;;  %5043 = vmatprep.subr.mxu0 %v1182_v54  ;;  %v1233_v50 = vld [vmem:[%s5331_s29 + $0x1e78] sm:$0xff]  ;;  %v1248_v53 = vld [vmem:[%s5331_s29 + $0x1ef0] sm:$0xff] }
 0x1fa   : > { %5078 = vmatprep.subr.mxu1 %v1214_v55  ;;  %5044 = vmatpush3.msra.mxu0 %v1166_v56  ;;  %v1265_v51 = vld [vmem:[%s5331_s29 + $0x1f78] sm:$0xff]  ;;  %v1280_v54 = vld [vmem:[%s5331_s29 + $0x1ff0] sm:$0xff] }
 0x1fb   : > { %5079 = vmatpush3.msra.mxu1 %v1198_v57  ;;  %5045 = vmatprep.subr.mxu0 %v1181_v58  ;;  %v1232_v55 = vld [vmem:[%s5331_s29 + $0x1e70] sm:$0xff]  ;;  %v1247_v57 = vld [vmem:[%s5331_s29 + $0x1ee8] sm:$0xff] }
 0x1fc   : > { %5080 = vmatprep.subr.mxu1 %v1213_v59  ;;  %5046 = vmatpush3.msra.mxu0 %v1165_v60  ;;  %v1264_v56 = vld [vmem:[%s5331_s29 + $0x1f70] sm:$0xff]  ;;  %v1279_v58 = vld [vmem:[%s5331_s29 + $0x1fe8] sm:$0xff] }
 0x1fd   : > { %5081 = vmatpush3.msra.mxu1 %v1197_v61  ;;  %5047 = vmatprep.subr.mxu0 %v1180_v62  ;;  %v1231_v59 = vld [vmem:[%s5331_s29 + $0x1e68] sm:$0xff]  ;;  %v1246_v61 = vld [vmem:[%s5331_s29 + $0x1ee0] sm:$0xff] }
 0x1fe   : > { %5082 = vmatprep.subr.mxu1 %v1212_v63  ;;  %5048 = vmatpush3.msra.mxu0 %v1164_v0  ;;  %v1263_v60 = vld [vmem:[%s5331_s29 + $0x1f68] sm:$0xff]  ;;  %v1278_v62 = vld [vmem:[%s5331_s29 + $0x1fe0] sm:$0xff] }
 0x1ff   : > { %5083 = vmatpush3.msra.mxu1 %v1196_v1  ;;  %5049 = vmatprep.subr.mxu0 %v1179_v2  ;;  %v1230_v63 = vld [vmem:[%s5331_s29 + $0x1e60] sm:$0xff]  ;;  %v1245_v1 = vld [vmem:[%s5331_s29 + $0x1ed8] sm:$0xff] }
 0x200   : > { %5084 = vmatprep.subr.mxu1 %v1211_v3  ;;  %5050 = vmatpush3.msra.mxu0 %v1163_v4  ;;  %v1262_v0 = vld [vmem:[%s5331_s29 + $0x1f60] sm:$0xff]  ;;  %v1277_v2 = vld [vmem:[%s5331_s29 + $0x1fd8] sm:$0xff] }
 0x201   : > { %5085 = vmatpush3.msra.mxu1 %v1195_v5  ;;  %5051 = vmatprep.subr.mxu0 %v1178_v6  ;;  %v1229_v3 = vld [vmem:[%s5331_s29 + $0x1e58] sm:$0xff]  ;;  %v1244_v5 = vld [vmem:[%s5331_s29 + $0x1ed0] sm:$0xff] }
 0x202   : > { %5086 = vmatprep.subr.mxu1 %v1210_v7  ;;  %5052 = vmatpush3.msra.mxu0 %v1162_v8  ;;  %v1261_v4 = vld [vmem:[%s5331_s29 + $0x1f58] sm:$0xff]  ;;  %v1276_v6 = vld [vmem:[%s5331_s29 + $0x1fd0] sm:$0xff] }
 0x203   : > { %5087 = vmatpush3.msra.mxu1 %v1194_v9  ;;  %5053 = vmatprep.subr.mxu0 %v1177_v10  ;;  %v1228_v7 = vld [vmem:[%s5331_s29 + $0x1e50] sm:$0xff]  ;;  %v1243_v9 = vld [vmem:[%s5331_s29 + $0x1ec8] sm:$0xff] }
 0x204   : > { %5088 = vmatprep.subr.mxu1 %v1209_v11  ;;  %5054 = vmatpush3.msra.mxu0 %v1161_v12  ;;  %v1260_v8 = vld [vmem:[%s5331_s29 + $0x1f50] sm:$0xff]  ;;  %v1275_v10 = vld [vmem:[%s5331_s29 + $0x1fc8] sm:$0xff] }
 0x205   : > { %5089 = vmatpush3.msra.mxu1 %v1193_v13  ;;  %5055 = vmatprep.subr.mxu0 %v1176_v14  ;;  %v1227_v11 = vld [vmem:[%s5331_s29 + $0x1e48] sm:$0xff]  ;;  %v1242_v13 = vld [vmem:[%s5331_s29 + $0x1ec0] sm:$0xff] }
 0x206   : > { %5090 = vmatprep.subr.mxu1 %v1208_v15  ;;  %5056 = vmatpush3.msra.mxu0 %v1160_v16  ;;  %v1259_v12 = vld [vmem:[%s5331_s29 + $0x1f48] sm:$0xff]  ;;  %v1274_v14 = vld [vmem:[%s5331_s29 + $0x1fc0] sm:$0xff] }
 0x207   : > { %5091 = vmatpush3.msra.mxu1 %v1192_v17  ;;  %5057 = vmatprep.subr.mxu0 %v1175_v18  ;;  %v1226_v15 = vld [vmem:[%s5331_s29 + $0x1e40] sm:$0xff]  ;;  %v1241_v17 = vld [vmem:[%s5331_s29 + $0x1eb8] sm:$0xff] }
 0x208   : > { %5092 = vmatprep.subr.mxu1 %v1207_v19  ;;  %5058 = vmatpush3.msra.mxu0 %v1159_v20  ;;  %v1258_v16 = vld [vmem:[%s5331_s29 + $0x1f40] sm:$0xff]  ;;  %v1273_v18 = vld [vmem:[%s5331_s29 + $0x1fb8] sm:$0xff] }
 0x209   : > { %5093 = vmatpush3.msra.mxu1 %v1191_v21  ;;  %5059 = vmatprep.subr.mxu0 %v1174_v23  ;;  %v1225_v19 = vld [vmem:[%s5331_s29 + $0x1e38] sm:$0xff]  ;;  %v1240_v21 = vld [vmem:[%s5331_s29 + $0x1eb0] sm:$0xff] }
 0x20a   : > { %5094 = vmatprep.subr.mxu1 %v1206_v24  ;;  %5060 = vmatpush3.msra.mxu0 %v1158_v25  ;;  %v1257_v20 = vld [vmem:[%s5331_s29 + $0x1f38] sm:$0xff]  ;;  %v1224_v23 = vld [vmem:[%s5331_s29 + $0x1e30] sm:$0xff]  ;;  %v1239_v25 = vld [vmem:[%s5331_s29 + $0x1ea8] sm:$0xff] }
 0x20b   : > { %5095 = vmatpush3.msra.mxu1 %v1190_v26  ;;  %5061 = vmatprep.subr.mxu0 %v1173_v27  ;;  %v1256_v24 = vld [vmem:[%s5331_s29 + $0x1f30] sm:$0xff]  ;;  %v1271_v26 = vld [vmem:[%s5331_s29 + $0x1fa8] sm:$0xff]  ;;  %v257_v27 = vld [vmem:[%s5326_s25 + $0x78] sm:$0xff] }
 0x20c   : > { %5096 = vmatprep.subr.mxu1 %v1205_v28  ;;  %5062 = vmatpush3.msra.mxu0 %v1157_v30  ;;  %v1223_v28 = vld [vmem:[%s5331_s29 + $0x1e28] sm:$0xff]  ;;  %v1238_v30 = vld [vmem:[%s5331_s29 + $0x1ea0] sm:$0xff] }
 0x20d   : > { %5097 = vmatpush3.msra.mxu1 %v1189_v31  ;;  %5063 = vmatprep.subr.mxu0 %v1172_v32  ;;  %v1270_v31 = vld [vmem:[%s5331_s29 + $0x1fa0] sm:$0xff] }
 0x20e   : > { %5098 = vmatprep.subr.mxu1 %v1204_v33  ;;  %5064 = vmatpush3.msra.mxu0 %v1156_v35  ;;  %v1222_v32 = vld [vmem:[%s5331_s29 + $0x1e20] sm:$0xff]  ;;  %v1237_v35 = vld [vmem:[%s5331_s29 + $0x1e98] sm:$0xff] }
 0x20f   : > { %5099 = vmatpush3.msra.mxu1 %v1188_v36  ;;  %5065 = vmatprep.subr.mxu0 %v1171_v37  ;;  %v1254_v33 = vld [vmem:[%s5331_s29 + $0x1f20] sm:$0xff]  ;;  %v1269_v36 = vld [vmem:[%s5331_s29 + $0x1f98] sm:$0xff] }
 0x210   : > { %5100 = vmatprep.subr.mxu1 %v1203_v38  ;;  %5066 = vmatpush3.msra.mxu0 %v1155_v40  ;;  %v1221_v37 = vld [vmem:[%s5331_s29 + $0x1e18] sm:$0xff]  ;;  %v1268_v40 = vld [vmem:[%s5331_s29 + $0x1f90] sm:$0xff] }
 0x211   : > { %5101 = vmatpush3.msra.mxu1 %v1187_v41  ;;  %5067 = vmatprep.subr.mxu0 %v1170_v42  ;;  %v1253_v38 = vld [vmem:[%s5331_s29 + $0x1f18] sm:$0xff]  ;;  %v1560_v41 = vrot.slane %v257_v27, %v5380_v52  ;;  %v1220_v42 = vld [vmem:[%s5331_s29 + $0x1e10] sm:$0xff] }
 0x212   : > { %5102 = vmatprep.subr.mxu1 %v1202_v43  ;;  %5068 = vmatpush3.msra.mxu0 %v1154_v45  ;;  %v1252_v43 = vld [vmem:[%s5331_s29 + $0x1f10] sm:$0xff]  ;;  %v1235_v45 = vld [vmem:[%s5331_s29 + $0x1e88] sm:$0xff] }
 0x213   : > { %3658 = vmatprep.mubr.f32.mxu0 %v1551_v44  ;;  %5103 = vmatpush3.msra.mxu1 %v1186_v46  ;;  %v1267_v46 = vld [vmem:[%s5331_s29 + $0x1f88] sm:$0xff] }
 0x214   : > { %3659 = vmatmul.mubr.f32.vlgmr.msra.gmra.mxu0 %v1543_v34  ;;  %3728 = vmatprep.mubr.f32.mxu1 %v1552_v47  ;;  %v1553_v34 = vcombine.high %v257_v27, %v257_v27  ;;  %v1219_v47 = vld [vmem:[%s5331_s29 + $0x1e08] sm:$0xff] }
 0x215   : > { %5107 = vmatprep.subr.mxu0 %v1249_v48  ;;  %5142 = vmatprep.subr.mxu1 %v1281_v49  ;;  %v1251_v48 = vld [vmem:[%s5331_s29 + $0x1f08] sm:$0xff]  ;;  %v1234_v49 = vld [vmem:[%s5331_s29 + $0x1e80] sm:$0xff] }
 0x216   : > { %3729 = vmatmul.mubr.f32.vlgmr.msra.gmra.mxu1 %v1550_v39  ;;  %5108 = vmatpush3.msra.mxu0 %v1233_v50  ;;  %v1236_v39 = vld [vmem:[%s5331_s29 + $0x1e90] sm:$0xff]  ;;  %v1567_v44 = vrot.slane %v1553_v34, %v5380_v52  ;;  %v1266_v50 = vld [vmem:[%s5331_s29 + $0x1f80] sm:$0xff] }
 0x217   : > { %5143 = vmatpush3.msra.mxu1 %v1265_v51  ;;  %5109 = vmatprep.subr.mxu0 %v1248_v53  ;;  %v1568_v51 = vcombine.high %v1560_v41, %v1560_v41  ;;  %v1218_v53 = vld [vmem:[%s5331_s29 + $0x1e00] sm:$0xff] }
 0x218   : > { %5144 = vmatprep.subr.mxu1 %v1280_v54  ;;  %5110 = vmatpush3.msra.mxu0 %v1232_v55  ;;  %v1569_v54 = vcombine.high %v1567_v44, %v1567_v44  ;;  %v1250_v52 = vld [vmem:[%s5331_s29 + $0x1f00] sm:$0xff]  ;;  %v4089_v55 = vpop.f32.mrf.mxu0 }
 0x219   : > { %5145 = vmatpush3.msra.mxu1 %v1264_v56  ;;  %5111 = vmatprep.subr.mxu0 %v1247_v57  ;;  %v4124_v56 = vpop.f32.mrf.mxu1 }
 0x21a   : > { %5146 = vmatprep.subr.mxu1 %v1279_v58  ;;  %5112 = vmatpush3.msra.mxu0 %v1231_v59  ;;  %v4090_v57 = vpop.f32.mrf.mxu0 }
 0x21b   : > { %5147 = vmatpush3.msra.mxu1 %v1263_v60  ;;  %5113 = vmatprep.subr.mxu0 %v1246_v61  ;;  %v4125_v59 = vpop.f32.mrf.mxu1 }
 0x21c   : > { %5148 = vmatprep.subr.mxu1 %v1278_v62  ;;  %5114 = vmatpush3.msra.mxu0 %v1230_v63  ;;  %v4159_v58 = vpop.f32.mrf.mxu0  ;;  %v4091_v62 = vadd.f32 %v4090_v57, %v4089_v55  ;;  %v4126_v63 = vadd.f32 %v4125_v59, %v4124_v56 }
 0x21d   : > { %5149 = vmatpush3.msra.mxu1 %v1262_v0  ;;  %5115 = vmatprep.subr.mxu0 %v1245_v1  ;;  %v4194_v60 = vpop.f32.mrf.mxu1 }
 0x21e   : > { %5150 = vmatprep.subr.mxu1 %v1277_v2  ;;  %5116 = vmatpush3.msra.mxu0 %v1229_v3  ;;  %v4160_v61 = vpop.f32.mrf.mxu0  ;;  %v1771_v3 = vadd.f32 %v4126_v63, %v4091_v62 }
 0x21f   : > { %5151 = vmatpush3.msra.mxu1 %v1261_v4  ;;  %5117 = vmatprep.subr.mxu0 %v1244_v5  ;;  %v4161_v1 = vadd.f32 %v4160_v61, %v4159_v58  ;;  %v4195_v2 = vpop.f32.mrf.mxu1 }
 0x220   : > { %5152 = vmatprep.subr.mxu1 %v1276_v6  ;;  %5118 = vmatpush3.msra.mxu0 %v1228_v7  ;;  %v4229_v0 = vpop.f32.mrf.mxu0  ;;  %v4196_v7 = vadd.f32 %v4195_v2, %v4194_v60 }
 0x221   : > { %5153 = vmatpush3.msra.mxu1 %v1260_v8  ;;  %5119 = vmatprep.subr.mxu0 %v1243_v9  ;;  %v4264_v4 = vpop.f32.mrf.mxu1  ;;  %v1841_v6 = vadd.f32 %v4161_v1, %v1771_v3 }
 0x222   : > { %5154 = vmatprep.subr.mxu1 %v1275_v10  ;;  %5120 = vmatpush3.msra.mxu0 %v1227_v11  ;;  %v4230_v5 = vpop.f32.mrf.mxu0 }
 0x223   : > { %5155 = vmatpush3.msra.mxu1 %v1259_v12  ;;  %5121 = vmatprep.subr.mxu0 %v1242_v13  ;;  %v4231_v9 = vadd.f32 %v4230_v5, %v4229_v0  ;;  %v4265_v10 = vpop.f32.mrf.mxu1  ;;  %v1911_v11 = vadd.f32 %v4196_v7, %v1841_v6 }
 0x224   : > { %5156 = vmatprep.subr.mxu1 %v1274_v14  ;;  %5122 = vmatpush3.msra.mxu0 %v1226_v15  ;;  %v4299_v8 = vpop.f32.mrf.mxu0  ;;  %v4266_v15 = vadd.f32 %v4265_v10, %v4264_v4 }
 0x225   : > { %5157 = vmatpush3.msra.mxu1 %v1258_v16  ;;  %5123 = vmatprep.subr.mxu0 %v1241_v17  ;;  %v4334_v12 = vpop.f32.mrf.mxu1  ;;  %v1981_v14 = vadd.f32 %v4231_v9, %v1911_v11 }
 0x226   : > { %5158 = vmatprep.subr.mxu1 %v1273_v18  ;;  %5124 = vmatpush3.msra.mxu0 %v1225_v19  ;;  %v4300_v13 = vpop.f32.mrf.mxu0 }
 0x227   : > { %5159 = vmatpush3.msra.mxu1 %v1257_v20  ;;  %5125 = vmatprep.subr.mxu0 %v1240_v21  ;;  %v4301_v17 = vadd.f32 %v4300_v13, %v4299_v8  ;;  %v4335_v18 = vpop.f32.mrf.mxu1  ;;  %v2051_v19 = vadd.f32 %v4266_v15, %v1981_v14 }
 0x228   : > { %5160 = vmatprep.subr.mxu1 %v1272_v22  ;;  %5126 = vmatpush3.msra.mxu0 %v1224_v23  ;;  %v4369_v16 = vpop.f32.mrf.mxu0  ;;  %v4336_v23 = vadd.f32 %v4335_v18, %v4334_v12 }
 0x229   : > { %5161 = vmatpush3.msra.mxu1 %v1256_v24  ;;  %5127 = vmatprep.subr.mxu0 %v1239_v25  ;;  %v4404_v20 = vpop.f32.mrf.mxu1  ;;  %v2121_v22 = vadd.f32 %v4301_v17, %v2051_v19 }
 0x22a   : > { %5162 = vmatprep.subr.mxu1 %v1271_v26  ;;  %5128 = vmatpush3.msra.mxu0 %v1223_v28  ;;  %v4370_v21 = vpop.f32.mrf.mxu0 }
 0x22b   : > { %5163 = vmatpush3.msra.mxu1 %v1255_v29  ;;  %5129 = vmatprep.subr.mxu0 %v1238_v30  ;;  %v4371_v25 = vadd.f32 %v4370_v21, %v4369_v16  ;;  %v4405_v26 = vpop.f32.mrf.mxu1  ;;  %v2191_v27 = vadd.f32 %v4336_v23, %v2121_v22 }
 0x22c   : > { %5164 = vmatprep.subr.mxu1 %v1270_v31  ;;  %5130 = vmatpush3.msra.mxu0 %v1222_v32  ;;  %v4439_v24 = vpop.f32.mrf.mxu0  ;;  %v4406_v31 = vadd.f32 %v4405_v26, %v4404_v20 }
 0x22d   : > { %5165 = vmatpush3.msra.mxu1 %v1254_v33  ;;  %5131 = vmatprep.subr.mxu0 %v1237_v35  ;;  %v4474_v28 = vpop.f32.mrf.mxu1  ;;  %v2261_v30 = vadd.f32 %v4371_v25, %v2191_v27 }
 0x22e   : > { %5166 = vmatprep.subr.mxu1 %v1269_v36  ;;  %5132 = vmatpush3.msra.mxu0 %v1221_v37  ;;  %v4440_v29 = vpop.f32.mrf.mxu0 }
 0x22f   : > { %5167 = vmatpush3.msra.mxu1 %v1253_v38  ;;  %5133 = vmatprep.subr.mxu0 %v1236_v39  ;;  %v4441_v33 = vadd.f32 %v4440_v29, %v4439_v24  ;;  %v4475_v34 = vpop.f32.mrf.mxu1  ;;  %v2331_v35 = vadd.f32 %v4406_v31, %v2261_v30 }
 0x230   : > { %5168 = vmatprep.subr.mxu1 %v1268_v40  ;;  %5134 = vmatpush3.msra.mxu0 %v1220_v42  ;;  %v4509_v32 = vpop.f32.mrf.mxu0  ;;  %v4476_v39 = vadd.f32 %v4475_v34, %v4474_v28 }
 0x231   : > { %5169 = vmatpush3.msra.mxu1 %v1252_v43  ;;  %5135 = vmatprep.subr.mxu0 %v1235_v45  ;;  %v4544_v36 = vpop.f32.mrf.mxu1  ;;  %v2401_v38 = vadd.f32 %v4441_v33, %v2331_v35 }
 0x232   : > { %5170 = vmatprep.subr.mxu1 %v1267_v46  ;;  %5136 = vmatpush3.msra.mxu0 %v1219_v47  ;;  %v4510_v37 = vpop.f32.mrf.mxu0 }
 0x233   : > { %5171 = vmatpush3.msra.mxu1 %v1251_v48  ;;  %5137 = vmatprep.subr.mxu0 %v1234_v49  ;;  %v4545_v42 = vpop.f32.mrf.mxu1  ;;  %v2471_v43 = vadd.f32 %v4476_v39, %v2401_v38 }
 0x234   : > { %5172 = vmatprep.subr.mxu1 %v1266_v50  ;;  %5138 = vmatpush3.msra.mxu0 %v1218_v53  ;;  %v4579_v40 = vpop.f32.mrf.mxu0  ;;  %v4546_v47 = vadd.f32 %v4545_v42, %v4544_v36 }
 0x235   : > { %3798 = vmatprep.mubr.f32.mxu0 %v1568_v51  ;;  %5173 = vmatpush3.msra.mxu1 %v1250_v52 }
 0x236   : > { %3868 = vmatprep.mubr.f32.mxu1 %v1569_v54  ;;  %3799 = vmatmul.mubr.f32.vlgmr.msra.gmra.mxu0 %v1560_v41  ;;  %v4511_v41 = vadd.f32 %v4510_v37, %v4509_v32  ;;  %v4580_v45 = vpop.f32.mrf.mxu0 }
 0x237   : > { %3869 = vmatmul.mubr.f32.vlgmr.msra.gmra.mxu1 %v1567_v44  ;;  %v4614_v44 = vpop.f32.mrf.mxu1  ;;  %v4581_v49 = vadd.f32 %v4580_v45, %v4579_v40 }
 0x238   : > { %v2541_v46 = vadd.f32 %v4511_v41, %v2471_v43  ;;  %v4649_v48 = vpop.f32.mrf.mxu0 }
 0x239   : > { %v4615_v50 = vpop.f32.mrf.mxu1 }
 0x23a   : > { %v2611_v51 = vadd.f32 %v4546_v47, %v2541_v46  ;;  %v4650_v54 = vpop.f32.mrf.mxu0  ;;  %v4616_v55 = vadd.f32 %v4615_v50, %v4614_v44 }
 0x23b   : > { %v4684_v53 = vpop.f32.mrf.mxu1  ;;  %v4651_v57 = vadd.f32 %v4650_v54, %v4649_v48  ;;  %v241_v54 = vld [vmem:[#allocation2] sm:$0x3] }
 0x23c   : > { %v2681_v52 = vadd.f32 %v4581_v49, %v2611_v51  ;;  %v4719_v56 = vpop.f32.mrf.mxu0 }
 0x23d   : > { %v4685_v58 = vpop.f32.mrf.mxu1 }
 0x23e   : > { %v2751_v59 = vadd.f32 %v4616_v55, %v2681_v52  ;;  %v4720_v61 = vpop.f32.mrf.mxu0  ;;  %v4686_v63 = vadd.f32 %v4685_v58, %v4684_v53 }
 0x23f   : > { %v4754_v60 = vpop.f32.mrf.mxu1  ;;  %v4721_v1 = vadd.f32 %v4720_v61, %v4719_v56 }
 0x240   : > { %v2821_v62 = vadd.f32 %v4651_v57, %v2751_v59 }
 0x241   : > { %v4755_v2 = vpop.f32.mrf.mxu1 }
 0x242   : > { %v2891_v3 = vadd.f32 %v4686_v63, %v2821_v62  ;;  %v4756_v7 = vadd.f32 %v4755_v2, %v4754_v60 }
 0x244   : > { %v2961_v6 = vadd.f32 %v4721_v1, %v2891_v3 }
 0x246   : > { %v3031_v11 = vadd.f32 %v4756_v7, %v2961_v6 }
 0x24c   : > { %v4789_v0 = vpop.f32.mrf.mxu0 }
 0x24e   : > { %v4824_v4 = vpop.f32.mrf.mxu1  ;;  %v4790_v5 = vpop.f32.mrf.mxu0 }
 0x24f   : > { %v4791_v9 = vadd.f32 %v4790_v5, %v4789_v0 }
 0x250   : > { %v4825_v10 = vpop.f32.mrf.mxu1 }
 0x251   : > { %v3101_v14 = vadd.f32 %v4791_v9, %v3031_v11  ;;  %v4826_v15 = vadd.f32 %v4825_v10, %v4824_v4 }
 0x253   : > { %v3171_v19 = vadd.f32 %v4826_v15, %v3101_v14 }
 0x26e   : > { %v4859_v8 = vpop.f32.mrf.mxu0 }
 0x270   : > { %v4894_v12 = vpop.f32.mrf.mxu1  ;;  %v4860_v13 = vpop.f32.mrf.mxu0 }
 0x271   : > { %v4861_v17 = vadd.f32 %v4860_v13, %v4859_v8 }
 0x272   : > { %v4895_v18 = vpop.f32.mrf.mxu1 }
 0x273   : > { %v3241_v22 = vadd.f32 %v4861_v17, %v3171_v19  ;;  %v4896_v23 = vadd.f32 %v4895_v18, %v4894_v12 }
 0x275   : > { %v3311_v27 = vadd.f32 %v4896_v23, %v3241_v22 }
 0x290   : > { %v4929_v16 = vpop.f32.mrf.mxu0 }
 0x292   : > { %v4964_v20 = vpop.f32.mrf.mxu1  ;;  %v4930_v21 = vpop.f32.mrf.mxu0 }
 0x293   : > { %v4931_v25 = vadd.f32 %v4930_v21, %v4929_v16 }
 0x294   : > { %v4965_v26 = vpop.f32.mrf.mxu1 }
 0x295   : > { %v3381_v30 = vadd.f32 %v4931_v25, %v3311_v27  ;;  %v4966_v31 = vadd.f32 %v4965_v26, %v4964_v20 }
 0x297   : > { %v3451_v35 = vadd.f32 %v4966_v31, %v3381_v30 }
 0x2b2   : > { %v4999_v24 = vpop.f32.mrf.mxu0 }
 0x2b4   : > { %v5034_v28 = vpop.f32.mrf.mxu1  ;;  %v5000_v29 = vpop.f32.mrf.mxu0 }
 0x2b5   : > { %v5001_v33 = vadd.f32 %v5000_v29, %v4999_v24 }
 0x2b6   : > { %v5035_v34 = vpop.f32.mrf.mxu1 }
 0x2b7   : > { %v3521_v38 = vadd.f32 %v5001_v33, %v3451_v35  ;;  %v5036_v39 = vadd.f32 %v5035_v34, %v5034_v28 }
 0x2b9   : > { %v3591_v42 = vadd.f32 %v5036_v39, %v3521_v38 }
 0x2d4   : > { %v5069_v32 = vpop.f32.mrf.mxu0 }
 0x2d6   : > { %v5104_v36 = vpop.f32.mrf.mxu1  ;;  %v5070_v37 = vpop.f32.mrf.mxu0 }
 0x2d7   : > { %v5071_v40 = vadd.f32 %v5070_v37, %v5069_v32 }
 0x2d8   : > { %v5105_v41 = vpop.f32.mrf.mxu1 }
 0x2d9   : > { %v3661_v43 = vadd.f32 %v5071_v40, %v3591_v42  ;;  %v5106_v44 = vadd.f32 %v5105_v41, %v5104_v36 }
 0x2db   : > { %v3731_v49 = vadd.f32 %v5106_v44, %v3661_v43 }
 0x2f6   : > { %v5139_v45 = vpop.f32.mrf.mxu0 }
 0x2f7   : > { %v5174_v46 = vpop.f32.mrf.mxu1 }
 0x2f8   : > { %v5140_v47 = vpop.f32.mrf.mxu0 }
 0x2f9   : > { %v5175_v48 = vpop.f32.mrf.mxu1  ;;  %v5141_v50 = vadd.f32 %v5140_v47, %v5139_v45 }
 0x2fa   : > { %v5176_v53 = vadd.f32 %v5175_v48, %v5174_v46 }
 0x2fb   : > { %v3801_v51 = vadd.f32 %v5141_v50, %v3731_v49 }
 0x2fd   : > { %v3871_v52 = vadd.f32 %v5176_v53, %v3801_v51  ;;  %3880 = sbr.rel (%p4049_p6) target bundleno = 983 (0x3d7), region = 48 }
 0x2ff   : > { %v3874_v55 = vadd.f32 %v3871_v52, %v241_v54 }
 0x301   : > { %3876 = vst.msk [vmem:[#allocation2] sm:$0x3] %vm3875_vm1, %v3874_v55 }
 0x302   : > { %v3898_v56 = vld [vmem:[%s6457_s3 + $0x38] sm:$0xff]  ;;  %v5278_v57 = vmov 0.0   ;;  %v3897_v58 = vld [vmem:[%s6457_s3 + $0x30] sm:$0xff]  ;;  %vm5279_vm2 = vmmov 0   ;;  %v3896_v59 = vld [vmem:[%s6457_s3 + $0x28] sm:$0xff]  ;;  %vm3906_vm3 = vcmask 523264  }
 0x303   : > { %5186 = vmatprep.subr.mxu0 %v5278_v57  ;;  %5202 = vmatprep.mubr.msk.f32.mxu0 %vm5279_vm2, %v5278_v57  ;;  %v3895_v60 = vld [vmem:[%s6457_s3 + $0x20] sm:$0xff]  ;;  %v3894_v63 = vld [vmem:[%s6457_s3 + $0x18] sm:$0xff]  ;;  %v3893_v0 = vld [vmem:[%s6457_s3 + $0x10] sm:$0xff]  ;;  %vm3980_vm4 = vcmask 74752  }
 0x304   : > { %5187 = vmatpush3.msra.mxu0 %v3898_v56  ;;  %v4050_v62 = vld [vmem:[%s6456_s2] ss:$0 sm:$0xff]  ;;  %v3892_v2 = vld [vmem:[%s6457_s3 + $0x8] sm:$0xff] }
 0x305   : > { %5188 = vmatprep.subr.mxu0 %v5278_v57  ;;  %v3891_v3 = vld [vmem:[%s6457_s3] sm:$0xff] }
 0x306   : > { %5189 = vmatpush3.msra.mxu0 %v3897_v58  ;;  %v4051_v5 = vld [vmem:[%s6458_s4] ss:$0 sm:$0xff] }
 0x307   : > { %5190 = vmatprep.subr.mxu0 %v5278_v57 }
 0x308   : > { %5191 = vmatpush3.msra.mxu0 %v3896_v59  ;;  %v3881_v61 = vld [vmem:[#allocation2] sm:$0x3] }
 0x309   : > { %5192 = vmatprep.subr.mxu0 %v5278_v57  ;;  %v3889_v1 = vadd.f32 %v4050_v62, %v3881_v61 }
 0x30a   : > { %5193 = vmatpush3.msra.mxu0 %v3895_v60 }
 0x30b   : > { %5194 = vmatprep.subr.mxu0 %v5278_v57  ;;  %v3890_v4 = vmax.f32 %v3889_v1, 0.0 }
 0x30c   : > { %5195 = vmatpush3.msra.mxu0 %v3894_v63 }
 0x30d   : > { %5196 = vmatprep.subr.mxu0 %v5278_v57 }
 0x30e   : > { %5197 = vmatpush3.msra.mxu0 %v3893_v0 }
 0x30f   : > { %5198 = vmatprep.subr.mxu0 %v5278_v57 }
 0x310   : > { %5199 = vmatpush3.msra.mxu0 %v3892_v2 }
 0x311   : > { %5200 = vmatprep.subr.mxu0 %v5278_v57 }
 0x312   : > { %5201 = vmatpush3.msra.mxu0 %v3891_v3 }
 0x313   : > { %5203 = vmatmul.mubr.msk.f32.vlgmr.msra.gmra.mxu0 %vm3906_vm3, %v3890_v4 }
 0x3d3   : > { %v3976_v6 = vpop.f32.mrf.mxu0 }
 0x3d4   : > { %v3977_v7 = vadd.f32 %v4051_v5, %v3976_v6 }
 0x3d5   : > { %v5204_v8 = vpop.f32.mrf.mxu0 }
 0x3d6   : > { %3981 = vst.msk [vmem:[#allocation3] sm:$0x3] %vm3980_vm4, %v3977_v7 }
 0x3d7 PF: > { %p5209_p7 = scmp.eq.s32.totalorder %s5317_s19, 3  ;;  %s5280_s27 = smov [#allocation3]  }
 0x3d8   : > { %s3989_s28 = sshll.u32 %s5280_s27, 4  ;;  %s3990_s28 = int_to_ptr.vmem [resolvable:$true] %s3989_s28 }
 0x3d9   : > { %s5240_s29 = scalar_lea.vmem %s3990_s28, 32  ;;  %p5247_p11 = scmp.lt.s32.totalorder %s3990_s28, %s3990_s28 }
 0x3da   : > { %p5241_p8 = scmp.ne.s32.totalorder %s3990_s28, %s5240_s29  ;;  %p5248_p12 = scmp.lt.s32.totalorder %s5240_s29, %s5240_s29 }
 0x3dc   : > { %p5242_p9 = pnand %p5241_p8, %p5209_p7  ;;  %p5249_p13 = por %p5248_p12, %p5247_p11 }
 0x3de   : > { %p5243_p10 = pneg %p5242_p9 }
 0x3e0   : > { %p5250_p0 = pnand %p5249_p13, %p5243_p10 }
 0x3e2   : > { %5253 = shalt.err (!%p5250_p0)
}
 0x3e3   : > { %5206 = dma.vmem_to_hbm [thread:$0]  (%p5209_p7), %s3990_s28, 32, %s6459_s5, [#allocation4]  }
 0x3e4   : > { %5269 = dma.done.wait (%p5209_p7), [#allocation4], 32  }
 0x3e5   : > { %5271 = vsyncadd (%p5209_p7), [#allocation4], 4294967264 }
 0x3e6 PF: > { %s16_s18 = sadd.s32 1, %s5274_s18  }
 0x3e7   : > { %p13_p1 = scmp.ge.s32.totalorder %s16_s18, 6  }
 0x3e9   :  { %15 = sbr.rel (!%p13_p1) target bundleno = 1 (0x1), region = 78 }
 0x3ee   :  { %4002 = vsyncpa [#allocation4], 1 }
 0x3ef   :  { %4004 = vsyncpa [#allocation4 + $0x1], 1 }

</bundles_post_ra>
